<compile_context>
chip_gen: v7x
topology: tpu7x:2x2x1
jax: 0.10.0
libtpu: 0.0.40
codegen_flags: <defaults>
</compile_context>

<pallas_src>
import numpy as np

import jax
import jax.numpy as jnp
from jax.experimental import pallas as pl
from jax.experimental.pallas import tpu as pltpu

_BN_EPS = 1e-3        # nn.BatchNorm1d(..., eps=0.001)
_FC_K_BLOCKS = 3      # K-tiling of the fused fc1+fc2 kernel


# -----------------------------------------------------------------------------
# Pallas kernels
# -----------------------------------------------------------------------------
def _full_spec(shape):
    zeros = (0,) * len(shape)
    return pl.BlockSpec(shape, lambda: zeros)


def _inception_branches(x, sh_ref, w1_ref, wa2_ref, ba2_ref, wa3_ref, ba3_ref,
                        w2t_ref, w3t_ref, w4_ref, bout_ref):
    """All four Inception branches; returns relu(sum of per-branch pre-activations),
    each branch occupying its own column block of the 256-wide output."""
    def dot(a, b):
        return jnp.dot(a, b, preferred_element_type=jnp.float32)

    # branch1 (1x1 conv) + every branch's folded-BN bias (disjoint column blocks)
    acc = dot(x, w1_ref[...]) + bout_ref[...]

    # branch2: 1x1 reduce -> k=3 conv; taps via zero-fill shift-matrix matmuls
    b2a = jnp.maximum(dot(x, wa2_ref[...]) + ba2_ref[...], 0.0)
    for t in range(3):                       # shift s = t - 1  -> sh index s + 3
        acc = acc + dot(dot(sh_ref[t + 2], b2a), w2t_ref[t])

    # branch3: 1x1 reduce -> k=7 conv
    b3a = jnp.maximum(dot(x, wa3_ref[...]) + ba3_ref[...], 0.0)
    for t in range(7):                       # shift s = t - 3  -> sh index s + 3
        acc = acc + dot(dot(sh_ref[t], b3a), w3t_ref[t])

    # branch4: MaxPool1d(3,1,1).  Edge rows map to themselves, equivalent to -inf padding
    # since the center element is always in the window.
    pooled = jnp.maximum(jnp.maximum(x, dot(sh_ref[7], x)), dot(sh_ref[8], x))
    acc = acc + dot(pooled, w4_ref[...])

    return jnp.maximum(acc, 0.0)


def _inception_kernel(x_ref, sh_ref, w1_ref, wa2_ref, ba2_ref, wa3_ref, ba3_ref,
                      w2t_ref, w3t_ref, w4_ref, bout_ref, out_ref):
    out_ref[...] = _inception_branches(
        x_ref[...], sh_ref, w1_ref, wa2_ref, ba2_ref, wa3_ref, ba3_ref,
        w2t_ref, w3t_ref, w4_ref, bout_ref)


def _inception_resize_kernel(x_ref, sh_ref, w1_ref, wa2_ref, ba2_ref, wa3_ref, ba3_ref,
                             w2t_ref, w3t_ref, w4_ref, bout_ref, r_ref, br_ref, out_ref):
    y = _inception_branches(
        x_ref[...], sh_ref, w1_ref, wa2_ref, ba2_ref, wa3_ref, ba3_ref,
        w2t_ref, w3t_ref, w4_ref, bout_ref)
    # fnl_resize (1x1 conv over the former-length axis) + folded BN + ReLU, fused here as a
    # block-diagonal (per-batch) matmul on the NLC inception output.
    z = jnp.dot(r_ref[...], y, preferred_element_type=jnp.float32) + br_ref[...]
    out_ref[...] = jnp.maximum(z, 0.0)


def _fc_kernel(x_ref, w1_ref, b1_ref, w2_ref, b2_ref, o_ref, acc_ref):
    """Fused fc1 (bf16 weight, K-tiled, f32 accumulation) + ReLU + fc2."""
    k = pl.program_id(0)

    @pl.when(k == 0)
    def _():
        acc_ref[...] = jnp.zeros_like(acc_ref)

    acc_ref[...] += jnp.dot(x_ref[...], w1_ref[...], preferred_element_type=jnp.float32)

    @pl.when(k == pl.num_programs(0) - 1)
    def _():
        h = jnp.maximum(acc_ref[...] + b1_ref[...], 0.0)                       # fc1 + ReLU
        o_ref[...] = (jnp.dot(h, w2_ref[...], preferred_element_type=jnp.float32)
                      + b2_ref[...])                                           # fc2


# -----------------------------------------------------------------------------
# Wrappers around pallas_call
# -----------------------------------------------------------------------------
def _shift_matrices(batch, length):
    """(9, B*L, B*L) constants: idx 0..6 = zero-fill row shifts -3..+3 (conv taps with zero
    padding); idx 7,8 = shifts -1,+1 with out-of-range rows mapped to themselves (maxpool)."""
    bl = batch * length
    s_all = np.zeros((9, bl, bl), np.float32)
    for k, s in enumerate(range(-3, 4)):
        for b in range(batch):
            for l in range(length):
                j = l + s
                if 0 <= j < length:
                    s_all[k, b * length + l, b * length + j] = 1.0
    for k, s in ((7, -1), (8, 1)):
        for b in range(batch):
            for l in range(length):
                j = l + s
                if not (0 <= j < length):
                    j = l
                s_all[k, b * length + l, b * length + j] = 1.0
    return s_all


def _inception_args(pi, x_ncl):
    B, Cin, L = x_ncl.shape
    x2 = jnp.transpose(x_ncl, (0, 2, 1)).reshape(B * L, Cin)      # NLC rows (b, l)
    sh = jnp.asarray(_shift_matrices(B, L))                       # trace-time constant
    return (x2, sh, pi["w1"], pi["wa2"], pi["ba2"], pi["wa3"], pi["ba3"],
            pi["w2t"], pi["w3t"], pi["w4"], pi["bout"])


def inception_fused(pi, x_ncl):
    B, _, L = x_ncl.shape
    args = _inception_args(pi, x_ncl)
    return pl.pallas_call(
        _inception_kernel,
        out_shape=jax.ShapeDtypeStruct((B * L, 256), jnp.float32),
        grid=(),
        in_specs=[_full_spec(a.shape) for a in args],
        out_specs=_full_spec((B * L, 256)),
    )(*args)


def inception_resize_fused(pi, r_mat, r_bias, x_ncl):
    args = _inception_args(pi, x_ncl) + (r_mat, r_bias)
    m = r_mat.shape[0]
    return pl.pallas_call(
        _inception_resize_kernel,
        out_shape=jax.ShapeDtypeStruct((m, 256), jnp.float32),
        grid=(),
        in_specs=[_full_spec(a.shape) for a in args],
        out_specs=_full_spec((m, 256)),
    )(*args)


def fc_fused(x, w1, b1, w2, b2):
    B, kp = x.shape
    n1 = w1.shape[1]
    no = w2.shape[1]
    nk = _FC_K_BLOCKS
    tk = kp // nk
    assert kp == nk * tk and tk % 128 == 0, (kp, tk)
    return pl.pallas_call(
        _fc_kernel,
        out_shape=jax.ShapeDtypeStruct((B, no), jnp.float32),
        grid=(nk,),
        in_specs=[
            pl.BlockSpec((B, tk), lambda k: (0, k)),     # x     (bf16)
            pl.BlockSpec((tk, n1), lambda k: (k, 0)),    # fc1_w (bf16, K-tiled)
            pl.BlockSpec((1, n1), lambda k: (0, 0)),     # fc1_b
            pl.BlockSpec((n1, no), lambda k: (0, 0)),    # fc2_w
            pl.BlockSpec((1, no), lambda k: (0, 0)),     # fc2_b
        ],
        out_specs=pl.BlockSpec((B, no), lambda k: (0, 0)),
        scratch_shapes=[pltpu.VMEM((B, n1), jnp.float32)],
        compiler_params=pltpu.CompilerParams(dimension_semantics=("arbitrary",)),
    )(x, w1, b1, w2, b2)


# -----------------------------------------------------------------------------
# GRU (kept in plain JAX: tiny, strictly sequential recurrence)
# -----------------------------------------------------------------------------
def gru_last_hidden(x_btd, p):
    B = x_btd.shape[0]
    H = p["w_hh"].shape[1]

    def step(h, x_t):
        gi = x_t @ p["w_ih"].T + p["b_ih"]
        gh = h @ p["w_hh"].T + p["b_hh"]
        i_r, i_z, i_n = jnp.split(gi, 3, axis=1)
        h_r, h_z, h_n = jnp.split(gh, 3, axis=1)
        r = jax.nn.sigmoid(i_r + h_r)
        z = jax.nn.sigmoid(i_z + h_z)
        n = jnp.tanh(i_n + r * h_n)
        return (1.0 - z) * n + z * h, None

    h0 = jnp.zeros((B, H), jnp.float32)
    h_last, _ = jax.lax.scan(step, h0, jnp.transpose(x_btd, (1, 0, 2)))
    return h_last


# -----------------------------------------------------------------------------
# Full forward pass (== SingleInceptionModel_v2.forward, inference mode)
# -----------------------------------------------------------------------------
def forward(prep, x_obs, x_fnl, x_num, point_num):
    B = x_obs.shape[0]
    Lo = x_obs.shape[2]

    y_obs = inception_fused(prep["obs_inc"], x_obs)                       # (B*Lo, 256)
    y_fnl = inception_resize_fused(prep["fnl_inc"], prep["fnl_R"],
                                   prep["fnl_b"], x_fnl)                  # (B*Lo, 256)

    gru_h = gru_last_hidden(x_num, prep["gru"])                           # (B, H)
    tail = jnp.concatenate([gru_h, point_num], axis=1)                    # added_point=True

    # fc1 weight rows were permuted at prep time to match this NLC-flattened order, so the
    # torch channel-major .view() needs no activation transpose here.
    x_cat = jnp.concatenate(
        [y_obs.reshape(B, Lo * 256), y_fnl.reshape(B, Lo * 256), tail], axis=1)
    pad = prep["fc1_w"].shape[0] - x_cat.shape[1]
    if pad:
        x_cat = jnp.concatenate([x_cat, jnp.zeros((B, pad), x_cat.dtype)], axis=1)

    return fc_fused(x_cat.astype(jnp.bfloat16), prep["fc1_w"], prep["fc1_b"],
                    prep["fc2_w"], prep["fc2_b"])


# -----------------------------------------------------------------------------
# One-time parameter preparation (BN folding, weight layout, bf16 cast)
# -----------------------------------------------------------------------------
def _fold_conv(p):
    inv = p["gamma"] / jnp.sqrt(p["var"] + _BN_EPS)
    return p["weight"] * inv[:, None, None], p["beta"] - p["mean"] * inv


def _place_cols(mat, off):
    k = mat.shape[0]
    return jnp.zeros((k, 256), jnp.float32).at[:, off:off + mat.shape[1]].set(mat)


def _prep_inception(p):
    w1, b1 = _fold_conv(p["b1"])      # (64, Cin, 1)
    wa2, ba2 = _fold_conv(p["b2a"])   # (96, Cin, 1)
    w2b, b2b = _fold_conv(p["b2b"])   # (128, 96, 3)
    wa3, ba3 = _fold_conv(p["b3a"])   # (16, Cin, 1)
    w3b, b3b = _fold_conv(p["b3b"])   # (32, 16, 7)
    w4, b4 = _fold_conv(p["b4"])      # (32, Cin, 1)

    bout = jnp.zeros((1, 256), jnp.float32)
    bout = bout.at[:, 0:64].set(b1[None, :])
    bout = bout.at[:, 64:192].set(b2b[None, :])
    bout = bout.at[:, 192:224].set(b3b[None, :])
    bout = bout.at[:, 224:256].set(b4[None, :])

    return dict(
        w1=_place_cols(w1[:, :, 0].T, 0),
        wa2=wa2[:, :, 0].T, ba2=ba2[None, :],
        wa3=wa3[:, :, 0].T, ba3=ba3[None, :],
        w2t=jnp.stack([_place_cols(w2b[:, :, t].T, 64) for t in range(3)]),
        w3t=jnp.stack([_place_cols(w3b[:, :, t].T, 192) for t in range(7)]),
        w4=_place_cols(w4[:, :, 0].T, 224),
        bout=bout,
    )


def prepare_params(params, batch_size):
    pr = params["fnl_resize"]
    obs_time = pr["weight"].shape[0]

    # fnl_resize as a block-diagonal (per-batch) matrix applied to the (B*fnl_time, 256)
    # NLC output of the fnl inception kernel.
    wr, br = _fold_conv(pr)                                               # (To, Tf, 1), (To,)
    r_mat = jnp.kron(jnp.eye(batch_size, dtype=jnp.float32), wr[:, :, 0])  # (B*To, B*Tf)
    r_bias = jnp.tile(br[:, None], (batch_size, 1))                        # (B*To, 1)

    # fc1: transpose once, permute rows so NLC-flattened activations can be fed directly
    # (reproduces torch's channel-major .view()), zero-pad K, cast to bf16.
    lo = obs_time
    wt = params["fc1_w"].T                                                # (fc1_in, 256)
    fc1_in = wt.shape[0]
    blk = 256 * lo

    def perm(block):                                                      # rows j*Lo+o -> o*256+j
        return block.reshape(256, lo, 256).transpose(1, 0, 2).reshape(blk, 256)

    per_blk = -(-fc1_in // _FC_K_BLOCKS)
    tk = -(-per_blk // 128) * 128
    kp = tk * _FC_K_BLOCKS
    w1p = jnp.concatenate(
        [perm(wt[:blk]), perm(wt[blk:2 * blk]), wt[2 * blk:],
         jnp.zeros((kp - fc1_in, 256), jnp.float32)], axis=0).astype(jnp.bfloat16)

    return dict(
        obs_inc=_prep_inception(params["obs_inc"]),
        fnl_inc=_prep_inception(params["fnl_inc"]),
        fnl_R=r_mat, fnl_b=r_bias,
        gru=params["gru"],
        fc1_w=w1p, fc1_b=params["fc1_b"][None, :],
        fc2_w=params["fc2_w"].T, fc2_b=params["fc2_b"][None, :],
    )


# -----------------------------------------------------------------------------
# Deterministic raw (PyTorch-layout) parameter construction
# -----------------------------------------------------------------------------
def _conv_bn_params(key, cin, cout, k):
    k1, k2, k3 = jax.random.split(key, 3)
    return dict(
        weight=0.1 * jax.random.normal(k1, (cout, cin, k), jnp.float32),
        gamma=1.0 + 0.1 * jax.random.normal(k2, (cout,), jnp.float32),
        beta=0.1 * jax.random.normal(k3, (cout,), jnp.float32),
        mean=jnp.zeros((cout,), jnp.float32),
        var=jnp.ones((cout,), jnp.float32),
    )


def _inception_params(key, cin, ch1, ch3r, ch3, ch5r, ch5, pp):
    ks = jax.random.split(key, 6)
    return dict(
        b1=_conv_bn_params(ks[0], cin, ch1, 1),
        b2a=_conv_bn_params(ks[1], cin, ch3r, 1),
        b2b=_conv_bn_params(ks[2], ch3r, ch3, 3),
        b3a=_conv_bn_params(ks[3], cin, ch5r, 1),
        b3b=_conv_bn_params(ks[4], ch5r, ch5, 7),
        b4=_conv_bn_params(ks[5], cin, pp, 1),
    )


def make_params(key, obs_dim, fnl_dim, num_dim, lag, added_point=True, reg=False):
    obs_time = lag * 4
    fnl_time = lag * 4 - 2
    ks = jax.random.split(key, 12)
    num_fc_dim = num_dim * 2 if added_point else num_dim
    fc1_in = 256 * 2 * obs_time + num_fc_dim
    fc2_out = 1 if reg else 4
    return dict(
        obs_inc=_inception_params(ks[0], obs_dim, 64, 96, 128, 16, 32, 32),
        fnl_inc=_inception_params(ks[1], fnl_dim, 64, 96, 128, 16, 32, 32),
        fnl_resize=_conv_bn_params(ks[2], fnl_time, obs_time, 1),
        gru=dict(
            w_ih=0.1 * jax.random.normal(ks[3], (3 * num_dim, num_dim), jnp.float32),
            w_hh=0.1 * jax.random.normal(ks[4], (3 * num_dim, num_dim), jnp.float32),
            b_ih=0.1 * jax.random.normal(ks[5], (3 * num_dim,), jnp.float32),
            b_hh=0.1 * jax.random.normal(ks[6], (3 * num_dim,), jnp.float32),
        ),
        fc1_w=0.02 * jax.random.normal(ks[7], (256, fc1_in), jnp.float32),
        fc1_b=0.1 * jax.random.normal(ks[8], (256,), jnp.float32),
        fc2_w=0.1 * jax.random.normal(ks[9], (fc2_out, 256), jnp.float32),
        fc2_b=0.1 * jax.random.normal(ks[10], (fc2_out,), jnp.float32),
    )


# -----------------------------------------------------------------------------
if __name__ == "__main__":
    key = jax.random.PRNGKey(0)
    B, obs_dim, fnl_dim, num_dim, lag = 2, 4, 4, 8, 4
    obs_time, fnl_time = lag * 4, lag * 4 - 2
    T = 8  # GRU sequence length

    kp, k1, k2, k3, k4 = jax.random.split(key, 5)
    raw = make_params(kp, obs_dim, fnl_dim, num_dim, lag, added_point=True, reg=False)
    prep = prepare_params(raw, batch_size=B)   # one-time weight prep (outside the hot path)

    x_obs = jax.random.normal(k1, (B, obs_dim, obs_time), jnp.float32)
    x_fnl = jax.random.normal(k2, (B, fnl_dim, fnl_time), jnp.float32)
    x_num = jax.random.normal(k3, (B, T, num_dim), jnp.float32)
    point_num = jax.random.normal(k4, (B, num_dim), jnp.float32)

    out = jax.jit(forward)(prep, x_obs, x_fnl, x_num, point_num)
    out = jax.block_until_ready(out)
    assert out.shape == (B, 4), out.shape
    assert bool(jnp.all(jnp.isfinite(out)))
    print("KERNEL_OK")
</pallas_src>

<mosaic_0001>
module attributes {stable_mosaic.version = 11 : i64} {
  func.func @_inception_kernel(%arg0: memref<32x4xf32, #tpu.memory_space<vmem>>, %arg1: memref<9x32x32xf32, #tpu.memory_space<vmem>>, %arg2: memref<4x256xf32, #tpu.memory_space<vmem>>, %arg3: memref<4x96xf32, #tpu.memory_space<vmem>>, %arg4: memref<1x96xf32, #tpu.memory_space<vmem>>, %arg5: memref<4x16xf32, #tpu.memory_space<vmem>>, %arg6: memref<1x16xf32, #tpu.memory_space<vmem>>, %arg7: memref<3x96x256xf32, #tpu.memory_space<vmem>>, %arg8: memref<7x16x256xf32, #tpu.memory_space<vmem>>, %arg9: memref<4x256xf32, #tpu.memory_space<vmem>>, %arg10: memref<1x256xf32, #tpu.memory_space<vmem>>, %arg11: memref<32x256xf32, #tpu.memory_space<vmem>>) attributes {dimension_semantics = [], scalar_prefetch = 0 : i64, scratch_operands = 0 : i64, tpu.core_type = #tpu.core_type<tc>} {
    %c0 = arith.constant 0 : index
    %c0_0 = arith.constant 0 : index
    %0 = vector.load %arg0[%c0, %c0_0] : memref<32x4xf32, #tpu.memory_space<vmem>>, vector<32x4xf32>
    %c0_1 = arith.constant 0 : index
    %c0_2 = arith.constant 0 : index
    %1 = vector.load %arg2[%c0_1, %c0_2] : memref<4x256xf32, #tpu.memory_space<vmem>>, vector<4x256xf32>
    %cst = arith.constant dense<0.000000e+00> : vector<32x256xf32>
    %2 = tpu.matmul %0, %1, %cst {dimension_numbers = #tpu.dot_dimension_numbers<[1], [0], [0], [1], [0, 0, 1, 1], [], []>} : vector<32x4xf32>, vector<4x256xf32>, vector<32x256xf32> -> vector<32x256xf32>
    %c0_3 = arith.constant 0 : index
    %c0_4 = arith.constant 0 : index
    %3 = vector.load %arg10[%c0_3, %c0_4] : memref<1x256xf32, #tpu.memory_space<vmem>>, vector<1x256xf32>
    %4 = vector.broadcast %3 : vector<1x256xf32> to vector<32x256xf32>
    %5 = arith.addf %2, %4 : vector<32x256xf32>
    %c0_5 = arith.constant 0 : index
    %c0_6 = arith.constant 0 : index
    %6 = vector.load %arg3[%c0_5, %c0_6] : memref<4x96xf32, #tpu.memory_space<vmem>>, vector<4x96xf32>
    %cst_7 = arith.constant dense<0.000000e+00> : vector<32x96xf32>
    %7 = tpu.matmul %0, %6, %cst_7 {dimension_numbers = #tpu.dot_dimension_numbers<[1], [0], [0], [1], [0, 0, 1, 1], [], []>} : vector<32x4xf32>, vector<4x96xf32>, vector<32x96xf32> -> vector<32x96xf32>
    %c0_8 = arith.constant 0 : index
    %c0_9 = arith.constant 0 : index
    %8 = vector.load %arg4[%c0_8, %c0_9] : memref<1x96xf32, #tpu.memory_space<vmem>>, vector<1x96xf32>
    %9 = vector.broadcast %8 : vector<1x96xf32> to vector<32x96xf32>
    %10 = arith.addf %7, %9 : vector<32x96xf32>
    %cst_10 = arith.constant 0.000000e+00 : f32
    %11 = vector.broadcast %cst_10 : f32 to vector<32x96xf32>
    %12 = arith.maximumf %10, %11 : vector<32x96xf32>
    %c2 = arith.constant 2 : index
    %c0_11 = arith.constant 0 : index
    %c0_12 = arith.constant 0 : index
    %13 = vector.load %arg1[%c2, %c0_11, %c0_12] : memref<9x32x32xf32, #tpu.memory_space<vmem>>, vector<1x32x32xf32>
    %14 = vector.shape_cast %13 : vector<1x32x32xf32> to vector<32x32xf32>
    %cst_13 = arith.constant dense<0.000000e+00> : vector<32x96xf32>
    %15 = tpu.matmul %14, %12, %cst_13 {dimension_numbers = #tpu.dot_dimension_numbers<[1], [0], [0], [1], [0, 0, 1, 1], [], []>} : vector<32x32xf32>, vector<32x96xf32>, vector<32x96xf32> -> vector<32x96xf32>
    %c0_14 = arith.constant 0 : index
    %c0_15 = arith.constant 0 : index
    %c0_16 = arith.constant 0 : index
    %16 = vector.load %arg7[%c0_14, %c0_15, %c0_16] : memref<3x96x256xf32, #tpu.memory_space<vmem>>, vector<1x96x256xf32>
    %17 = vector.shape_cast %16 : vector<1x96x256xf32> to vector<96x256xf32>
    %cst_17 = arith.constant dense<0.000000e+00> : vector<32x256xf32>
    %18 = tpu.matmul %15, %17, %cst_17 {dimension_numbers = #tpu.dot_dimension_numbers<[1], [0], [0], [1], [0, 0, 1, 1], [], []>} : vector<32x96xf32>, vector<96x256xf32>, vector<32x256xf32> -> vector<32x256xf32>
    %19 = arith.addf %5, %18 : vector<32x256xf32>
    %c3 = arith.constant 3 : index
    %c0_18 = arith.constant 0 : index
    %c0_19 = arith.constant 0 : index
    %20 = vector.load %arg1[%c3, %c0_18, %c0_19] : memref<9x32x32xf32, #tpu.memory_space<vmem>>, vector<1x32x32xf32>
    %21 = vector.shape_cast %20 : vector<1x32x32xf32> to vector<32x32xf32>
    %cst_20 = arith.constant dense<0.000000e+00> : vector<32x96xf32>
    %22 = tpu.matmul %21, %12, %cst_20 {dimension_numbers = #tpu.dot_dimension_numbers<[1], [0], [0], [1], [0, 0, 1, 1], [], []>} : vector<32x32xf32>, vector<32x96xf32>, vector<32x96xf32> -> vector<32x96xf32>
    %c1 = arith.constant 1 : index
    %c0_21 = arith.constant 0 : index
    %c0_22 = arith.constant 0 : index
    %23 = vector.load %arg7[%c1, %c0_21, %c0_22] : memref<3x96x256xf32, #tpu.memory_space<vmem>>, vector<1x96x256xf32>
    %24 = vector.shape_cast %23 : vector<1x96x256xf32> to vector<96x256xf32>
    %cst_23 = arith.constant dense<0.000000e+00> : vector<32x256xf32>
    %25 = tpu.matmul %22, %24, %cst_23 {dimension_numbers = #tpu.dot_dimension_numbers<[1], [0], [0], [1], [0, 0, 1, 1], [], []>} : vector<32x96xf32>, vector<96x256xf32>, vector<32x256xf32> -> vector<32x256xf32>
    %26 = arith.addf %19, %25 : vector<32x256xf32>
    %c4 = arith.constant 4 : index
    %c0_24 = arith.constant 0 : index
    %c0_25 = arith.constant 0 : index
    %27 = vector.load %arg1[%c4, %c0_24, %c0_25] : memref<9x32x32xf32, #tpu.memory_space<vmem>>, vector<1x32x32xf32>
    %28 = vector.shape_cast %27 : vector<1x32x32xf32> to vector<32x32xf32>
    %cst_26 = arith.constant dense<0.000000e+00> : vector<32x96xf32>
    %29 = tpu.matmul %28, %12, %cst_26 {dimension_numbers = #tpu.dot_dimension_numbers<[1], [0], [0], [1], [0, 0, 1, 1], [], []>} : vector<32x32xf32>, vector<32x96xf32>, vector<32x96xf32> -> vector<32x96xf32>
    %c2_27 = arith.constant 2 : index
    %c0_28 = arith.constant 0 : index
    %c0_29 = arith.constant 0 : index
    %30 = vector.load %arg7[%c2_27, %c0_28, %c0_29] : memref<3x96x256xf32, #tpu.memory_space<vmem>>, vector<1x96x256xf32>
    %31 = vector.shape_cast %30 : vector<1x96x256xf32> to vector<96x256xf32>
    %cst_30 = arith.constant dense<0.000000e+00> : vector<32x256xf32>
    %32 = tpu.matmul %29, %31, %cst_30 {dimension_numbers = #tpu.dot_dimension_numbers<[1], [0], [0], [1], [0, 0, 1, 1], [], []>} : vector<32x96xf32>, vector<96x256xf32>, vector<32x256xf32> -> vector<32x256xf32>
    %33 = arith.addf %26, %32 : vector<32x256xf32>
    %c0_31 = arith.constant 0 : index
    %c0_32 = arith.constant 0 : index
    %34 = vector.load %arg5[%c0_31, %c0_32] : memref<4x16xf32, #tpu.memory_space<vmem>>, vector<4x16xf32>
    %cst_33 = arith.constant dense<0.000000e+00> : vector<32x16xf32>
    %35 = tpu.matmul %0, %34, %cst_33 {dimension_numbers = #tpu.dot_dimension_numbers<[1], [0], [0], [1], [0, 0, 1, 1], [], []>} : vector<32x4xf32>, vector<4x16xf32>, vector<32x16xf32> -> vector<32x16xf32>
    %c0_34 = arith.constant 0 : index
    %c0_35 = arith.constant 0 : index
    %36 = vector.load %arg6[%c0_34, %c0_35] : memref<1x16xf32, #tpu.memory_space<vmem>>, vector<1x16xf32>
    %37 = vector.broadcast %36 : vector<1x16xf32> to vector<32x16xf32>
    %38 = arith.addf %35, %37 : vector<32x16xf32>
    %cst_36 = arith.constant 0.000000e+00 : f32
    %39 = vector.broadcast %cst_36 : f32 to vector<32x16xf32>
    %40 = arith.maximumf %38, %39 : vector<32x16xf32>
    %c0_37 = arith.constant 0 : index
    %c0_38 = arith.constant 0 : index
    %c0_39 = arith.constant 0 : index
    %41 = vector.load %arg1[%c0_37, %c0_38, %c0_39] : memref<9x32x32xf32, #tpu.memory_space<vmem>>, vector<1x32x32xf32>
    %42 = vector.shape_cast %41 : vector<1x32x32xf32> to vector<32x32xf32>
    %cst_40 = arith.constant dense<0.000000e+00> : vector<32x16xf32>
    %43 = tpu.matmul %42, %40, %cst_40 {dimension_numbers = #tpu.dot_dimension_numbers<[1], [0], [0], [1], [0, 0, 1, 1], [], []>} : vector<32x32xf32>, vector<32x16xf32>, vector<32x16xf32> -> vector<32x16xf32>
    %c0_41 = arith.constant 0 : index
    %c0_42 = arith.constant 0 : index
    %c0_43 = arith.constant 0 : index
    %44 = vector.load %arg8[%c0_41, %c0_42, %c0_43] : memref<7x16x256xf32, #tpu.memory_space<vmem>>, vector<1x16x256xf32>
    %45 = vector.shape_cast %44 : vector<1x16x256xf32> to vector<16x256xf32>
    %cst_44 = arith.constant dense<0.000000e+00> : vector<32x256xf32>
    %46 = tpu.matmul %43, %45, %cst_44 {dimension_numbers = #tpu.dot_dimension_numbers<[1], [0], [0], [1], [0, 0, 1, 1], [], []>} : vector<32x16xf32>, vector<16x256xf32>, vector<32x256xf32> -> vector<32x256xf32>
    %47 = arith.addf %33, %46 : vector<32x256xf32>
    %c1_45 = arith.constant 1 : index
    %c0_46 = arith.constant 0 : index
    %c0_47 = arith.constant 0 : index
    %48 = vector.load %arg1[%c1_45, %c0_46, %c0_47] : memref<9x32x32xf32, #tpu.memory_space<vmem>>, vector<1x32x32xf32>
    %49 = vector.shape_cast %48 : vector<1x32x32xf32> to vector<32x32xf32>
    %cst_48 = arith.constant dense<0.000000e+00> : vector<32x16xf32>
    %50 = tpu.matmul %49, %40, %cst_48 {dimension_numbers = #tpu.dot_dimension_numbers<[1], [0], [0], [1], [0, 0, 1, 1], [], []>} : vector<32x32xf32>, vector<32x16xf32>, vector<32x16xf32> -> vector<32x16xf32>
    %c1_49 = arith.constant 1 : index
    %c0_50 = arith.constant 0 : index
    %c0_51 = arith.constant 0 : index
    %51 = vector.load %arg8[%c1_49, %c0_50, %c0_51] : memref<7x16x256xf32, #tpu.memory_space<vmem>>, vector<1x16x256xf32>
    %52 = vector.shape_cast %51 : vector<1x16x256xf32> to vector<16x256xf32>
    %cst_52 = arith.constant dense<0.000000e+00> : vector<32x256xf32>
    %53 = tpu.matmul %50, %52, %cst_52 {dimension_numbers = #tpu.dot_dimension_numbers<[1], [0], [0], [1], [0, 0, 1, 1], [], []>} : vector<32x16xf32>, vector<16x256xf32>, vector<32x256xf32> -> vector<32x256xf32>
    %54 = arith.addf %47, %53 : vector<32x256xf32>
    %c2_53 = arith.constant 2 : index
    %c0_54 = arith.constant 0 : index
    %c0_55 = arith.constant 0 : index
    %55 = vector.load %arg1[%c2_53, %c0_54, %c0_55] : memref<9x32x32xf32, #tpu.memory_space<vmem>>, vector<1x32x32xf32>
    %56 = vector.shape_cast %55 : vector<1x32x32xf32> to vector<32x32xf32>
    %cst_56 = arith.constant dense<0.000000e+00> : vector<32x16xf32>
    %57 = tpu.matmul %56, %40, %cst_56 {dimension_numbers = #tpu.dot_dimension_numbers<[1], [0], [0], [1], [0, 0, 1, 1], [], []>} : vector<32x32xf32>, vector<32x16xf32>, vector<32x16xf32> -> vector<32x16xf32>
    %c2_57 = arith.constant 2 : index
    %c0_58 = arith.constant 0 : index
    %c0_59 = arith.constant 0 : index
    %58 = vector.load %arg8[%c2_57, %c0_58, %c0_59] : memref<7x16x256xf32, #tpu.memory_space<vmem>>, vector<1x16x256xf32>
    %59 = vector.shape_cast %58 : vector<1x16x256xf32> to vector<16x256xf32>
    %cst_60 = arith.constant dense<0.000000e+00> : vector<32x256xf32>
    %60 = tpu.matmul %57, %59, %cst_60 {dimension_numbers = #tpu.dot_dimension_numbers<[1], [0], [0], [1], [0, 0, 1, 1], [], []>} : vector<32x16xf32>, vector<16x256xf32>, vector<32x256xf32> -> vector<32x256xf32>
    %61 = arith.addf %54, %60 : vector<32x256xf32>
    %c3_61 = arith.constant 3 : index
    %c0_62 = arith.constant 0 : index
    %c0_63 = arith.constant 0 : index
    %62 = vector.load %arg1[%c3_61, %c0_62, %c0_63] : memref<9x32x32xf32, #tpu.memory_space<vmem>>, vector<1x32x32xf32>
    %63 = vector.shape_cast %62 : vector<1x32x32xf32> to vector<32x32xf32>
    %cst_64 = arith.constant dense<0.000000e+00> : vector<32x16xf32>
    %64 = tpu.matmul %63, %40, %cst_64 {dimension_numbers = #tpu.dot_dimension_numbers<[1], [0], [0], [1], [0, 0, 1, 1], [], []>} : vector<32x32xf32>, vector<32x16xf32>, vector<32x16xf32> -> vector<32x16xf32>
    %c3_65 = arith.constant 3 : index
    %c0_66 = arith.constant 0 : index
    %c0_67 = arith.constant 0 : index
    %65 = vector.load %arg8[%c3_65, %c0_66, %c0_67] : memref<7x16x256xf32, #tpu.memory_space<vmem>>, vector<1x16x256xf32>
    %66 = vector.shape_cast %65 : vector<1x16x256xf32> to vector<16x256xf32>
    %cst_68 = arith.constant dense<0.000000e+00> : vector<32x256xf32>
    %67 = tpu.matmul %64, %66, %cst_68 {dimension_numbers = #tpu.dot_dimension_numbers<[1], [0], [0], [1], [0, 0, 1, 1], [], []>} : vector<32x16xf32>, vector<16x256xf32>, vector<32x256xf32> -> vector<32x256xf32>
    %68 = arith.addf %61, %67 : vector<32x256xf32>
    %c4_69 = arith.constant 4 : index
    %c0_70 = arith.constant 0 : index
    %c0_71 = arith.constant 0 : index
    %69 = vector.load %arg1[%c4_69, %c0_70, %c0_71] : memref<9x32x32xf32, #tpu.memory_space<vmem>>, vector<1x32x32xf32>
    %70 = vector.shape_cast %69 : vector<1x32x32xf32> to vector<32x32xf32>
    %cst_72 = arith.constant dense<0.000000e+00> : vector<32x16xf32>
    %71 = tpu.matmul %70, %40, %cst_72 {dimension_numbers = #tpu.dot_dimension_numbers<[1], [0], [0], [1], [0, 0, 1, 1], [], []>} : vector<32x32xf32>, vector<32x16xf32>, vector<32x16xf32> -> vector<32x16xf32>
    %c4_73 = arith.constant 4 : index
    %c0_74 = arith.constant 0 : index
    %c0_75 = arith.constant 0 : index
    %72 = vector.load %arg8[%c4_73, %c0_74, %c0_75] : memref<7x16x256xf32, #tpu.memory_space<vmem>>, vector<1x16x256xf32>
    %73 = vector.shape_cast %72 : vector<1x16x256xf32> to vector<16x256xf32>
    %cst_76 = arith.constant dense<0.000000e+00> : vector<32x256xf32>
    %74 = tpu.matmul %71, %73, %cst_76 {dimension_numbers = #tpu.dot_dimension_numbers<[1], [0], [0], [1], [0, 0, 1, 1], [], []>} : vector<32x16xf32>, vector<16x256xf32>, vector<32x256xf32> -> vector<32x256xf32>
    %75 = arith.addf %68, %74 : vector<32x256xf32>
    %c5 = arith.constant 5 : index
    %c0_77 = arith.constant 0 : index
    %c0_78 = arith.constant 0 : index
    %76 = vector.load %arg1[%c5, %c0_77, %c0_78] : memref<9x32x32xf32, #tpu.memory_space<vmem>>, vector<1x32x32xf32>
    %77 = vector.shape_cast %76 : vector<1x32x32xf32> to vector<32x32xf32>
    %cst_79 = arith.constant dense<0.000000e+00> : vector<32x16xf32>
    %78 = tpu.matmul %77, %40, %cst_79 {dimension_numbers = #tpu.dot_dimension_numbers<[1], [0], [0], [1], [0, 0, 1, 1], [], []>} : vector<32x32xf32>, vector<32x16xf32>, vector<32x16xf32> -> vector<32x16xf32>
    %c5_80 = arith.constant 5 : index
    %c0_81 = arith.constant 0 : index
    %c0_82 = arith.constant 0 : index
    %79 = vector.load %arg8[%c5_80, %c0_81, %c0_82] : memref<7x16x256xf32, #tpu.memory_space<vmem>>, vector<1x16x256xf32>
    %80 = vector.shape_cast %79 : vector<1x16x256xf32> to vector<16x256xf32>
    %cst_83 = arith.constant dense<0.000000e+00> : vector<32x256xf32>
    %81 = tpu.matmul %78, %80, %cst_83 {dimension_numbers = #tpu.dot_dimension_numbers<[1], [0], [0], [1], [0, 0, 1, 1], [], []>} : vector<32x16xf32>, vector<16x256xf32>, vector<32x256xf32> -> vector<32x256xf32>
    %82 = arith.addf %75, %81 : vector<32x256xf32>
    %c6 = arith.constant 6 : index
    %c0_84 = arith.constant 0 : index
    %c0_85 = arith.constant 0 : index
    %83 = vector.load %arg1[%c6, %c0_84, %c0_85] : memref<9x32x32xf32, #tpu.memory_space<vmem>>, vector<1x32x32xf32>
    %84 = vector.shape_cast %83 : vector<1x32x32xf32> to vector<32x32xf32>
    %cst_86 = arith.constant dense<0.000000e+00> : vector<32x16xf32>
    %85 = tpu.matmul %84, %40, %cst_86 {dimension_numbers = #tpu.dot_dimension_numbers<[1], [0], [0], [1], [0, 0, 1, 1], [], []>} : vector<32x32xf32>, vector<32x16xf32>, vector<32x16xf32> -> vector<32x16xf32>
    %c6_87 = arith.constant 6 : index
    %c0_88 = arith.constant 0 : index
    %c0_89 = arith.constant 0 : index
    %86 = vector.load %arg8[%c6_87, %c0_88, %c0_89] : memref<7x16x256xf32, #tpu.memory_space<vmem>>, vector<1x16x256xf32>
    %87 = vector.shape_cast %86 : vector<1x16x256xf32> to vector<16x256xf32>
    %cst_90 = arith.constant dense<0.000000e+00> : vector<32x256xf32>
    %88 = tpu.matmul %85, %87, %cst_90 {dimension_numbers = #tpu.dot_dimension_numbers<[1], [0], [0], [1], [0, 0, 1, 1], [], []>} : vector<32x16xf32>, vector<16x256xf32>, vector<32x256xf32> -> vector<32x256xf32>
    %89 = arith.addf %82, %88 : vector<32x256xf32>
    %c7 = arith.constant 7 : index
    %c0_91 = arith.constant 0 : index
    %c0_92 = arith.constant 0 : index
    %90 = vector.load %arg1[%c7, %c0_91, %c0_92] : memref<9x32x32xf32, #tpu.memory_space<vmem>>, vector<1x32x32xf32>
    %91 = vector.shape_cast %90 : vector<1x32x32xf32> to vector<32x32xf32>
    %cst_93 = arith.constant dense<0.000000e+00> : vector<32x4xf32>
    %92 = tpu.matmul %91, %0, %cst_93 {dimension_numbers = #tpu.dot_dimension_numbers<[1], [0], [0], [1], [0, 0, 1, 1], [], []>} : vector<32x32xf32>, vector<32x4xf32>, vector<32x4xf32> -> vector<32x4xf32>
    %93 = arith.maximumf %0, %92 : vector<32x4xf32>
    %c8 = arith.constant 8 : index
    %c0_94 = arith.constant 0 : index
    %c0_95 = arith.constant 0 : index
    %94 = vector.load %arg1[%c8, %c0_94, %c0_95] : memref<9x32x32xf32, #tpu.memory_space<vmem>>, vector<1x32x32xf32>
    %95 = vector.shape_cast %94 : vector<1x32x32xf32> to vector<32x32xf32>
    %cst_96 = arith.constant dense<0.000000e+00> : vector<32x4xf32>
    %96 = tpu.matmul %95, %0, %cst_96 {dimension_numbers = #tpu.dot_dimension_numbers<[1], [0], [0], [1], [0, 0, 1, 1], [], []>} : vector<32x32xf32>, vector<32x4xf32>, vector<32x4xf32> -> vector<32x4xf32>
    %97 = arith.maximumf %93, %96 : vector<32x4xf32>
    %c0_97 = arith.constant 0 : index
    %c0_98 = arith.constant 0 : index
    %98 = vector.load %arg9[%c0_97, %c0_98] : memref<4x256xf32, #tpu.memory_space<vmem>>, vector<4x256xf32>
    %cst_99 = arith.constant dense<0.000000e+00> : vector<32x256xf32>
    %99 = tpu.matmul %97, %98, %cst_99 {dimension_numbers = #tpu.dot_dimension_numbers<[1], [0], [0], [1], [0, 0, 1, 1], [], []>} : vector<32x4xf32>, vector<4x256xf32>, vector<32x256xf32> -> vector<32x256xf32>
    %100 = arith.addf %89, %99 : vector<32x256xf32>
    %cst_100 = arith.constant 0.000000e+00 : f32
    %101 = vector.broadcast %cst_100 : f32 to vector<32x256xf32>
    %102 = arith.maximumf %100, %101 : vector<32x256xf32>
    %c0_101 = arith.constant 0 : index
    %c0_102 = arith.constant 0 : index
    %103 = vector.load %arg11[%c0_101, %c0_102] : memref<32x256xf32, #tpu.memory_space<vmem>>, vector<32x256xf32>
    tpu.vector_store %arg11[%c0_101, %c0_102], %102 {strides = array<i32>} : memref<32x256xf32, #tpu.memory_space<vmem>>, vector<32x256xf32>,
    return
  }
}

module attributes {stable_mosaic.version = 11 : i64} {
  func.func @_inception_resize_kernel(%arg0: memref<28x4xf32, #tpu.memory_space<vmem>>, %arg1: memref<9x28x28xf32, #tpu.memory_space<vmem>>, %arg2: memref<4x256xf32, #tpu.memory_space<vmem>>, %arg3: memref<4x96xf32, #tpu.memory_space<vmem>>, %arg4: memref<1x96xf32, #tpu.memory_space<vmem>>, %arg5: memref<4x16xf32, #tpu.memory_space<vmem>>, %arg6: memref<1x16xf32, #tpu.memory_space<vmem>>, %arg7: memref<3x96x256xf32, #tpu.memory_space<vmem>>, %arg8: memref<7x16x256xf32, #tpu.memory_space<vmem>>, %arg9: memref<4x256xf32, #tpu.memory_space<vmem>>, %arg10: memref<1x256xf32, #tpu.memory_space<vmem>>, %arg11: memref<32x28xf32, #tpu.memory_space<vmem>>, %arg12: memref<32x1xf32, #tpu.memory_space<vmem>>, %arg13: memref<32x256xf32, #tpu.memory_space<vmem>>) attributes {dimension_semantics = [], scalar_prefetch = 0 : i64, scratch_operands = 0 : i64, tpu.core_type = #tpu.core_type<tc>} {
    %c0 = arith.constant 0 : index
    %c0_0 = arith.constant 0 : index
    %0 = vector.load %arg0[%c0, %c0_0] : memref<28x4xf32, #tpu.memory_space<vmem>>, vector<28x4xf32>
    %c0_1 = arith.constant 0 : index
    %c0_2 = arith.constant 0 : index
    %1 = vector.load %arg2[%c0_1, %c0_2] : memref<4x256xf32, #tpu.memory_space<vmem>>, vector<4x256xf32>
    %cst = arith.constant dense<0.000000e+00> : vector<28x256xf32>
    %2 = tpu.matmul %0, %1, %cst {dimension_numbers = #tpu.dot_dimension_numbers<[1], [0], [0], [1], [0, 0, 1, 1], [], []>} : vector<28x4xf32>, vector<4x256xf32>, vector<28x256xf32> -> vector<28x256xf32>
    %c0_3 = arith.constant 0 : index
    %c0_4 = arith.constant 0 : index
    %3 = vector.load %arg10[%c0_3, %c0_4] : memref<1x256xf32, #tpu.memory_space<vmem>>, vector<1x256xf32>
    %4 = vector.broadcast %3 : vector<1x256xf32> to vector<28x256xf32>
    %5 = arith.addf %2, %4 : vector<28x256xf32>
    %c0_5 = arith.constant 0 : index
    %c0_6 = arith.constant 0 : index
    %6 = vector.load %arg3[%c0_5, %c0_6] : memref<4x96xf32, #tpu.memory_space<vmem>>, vector<4x96xf32>
    %cst_7 = arith.constant dense<0.000000e+00> : vector<28x96xf32>
    %7 = tpu.matmul %0, %6, %cst_7 {dimension_numbers = #tpu.dot_dimension_numbers<[1], [0], [0], [1], [0, 0, 1, 1], [], []>} : vector<28x4xf32>, vector<4x96xf32>, vector<28x96xf32> -> vector<28x96xf32>
    %c0_8 = arith.constant 0 : index
    %c0_9 = arith.constant 0 : index
    %8 = vector.load %arg4[%c0_8, %c0_9] : memref<1x96xf32, #tpu.memory_space<vmem>>, vector<1x96xf32>
    %9 = vector.broadcast %8 : vector<1x96xf32> to vector<28x96xf32>
    %10 = arith.addf %7, %9 : vector<28x96xf32>
    %cst_10 = arith.constant 0.000000e+00 : f32
    %11 = vector.broadcast %cst_10 : f32 to vector<28x96xf32>
    %12 = arith.maximumf %10, %11 : vector<28x96xf32>
    %c2 = arith.constant 2 : index
    %c0_11 = arith.constant 0 : index
    %c0_12 = arith.constant 0 : index
    %13 = vector.load %arg1[%c2, %c0_11, %c0_12] : memref<9x28x28xf32, #tpu.memory_space<vmem>>, vector<1x28x28xf32>
    %14 = vector.shape_cast %13 : vector<1x28x28xf32> to vector<28x28xf32>
    %cst_13 = arith.constant dense<0.000000e+00> : vector<28x96xf32>
    %15 = tpu.matmul %14, %12, %cst_13 {dimension_numbers = #tpu.dot_dimension_numbers<[1], [0], [0], [1], [0, 0, 1, 1], [], []>} : vector<28x28xf32>, vector<28x96xf32>, vector<28x96xf32> -> vector<28x96xf32>
    %c0_14 = arith.constant 0 : index
    %c0_15 = arith.constant 0 : index
    %c0_16 = arith.constant 0 : index
    %16 = vector.load %arg7[%c0_14, %c0_15, %c0_16] : memref<3x96x256xf32, #tpu.memory_space<vmem>>, vector<1x96x256xf32>
    %17 = vector.shape_cast %16 : vector<1x96x256xf32> to vector<96x256xf32>
    %cst_17 = arith.constant dense<0.000000e+00> : vector<28x256xf32>
    %18 = tpu.matmul %15, %17, %cst_17 {dimension_numbers = #tpu.dot_dimension_numbers<[1], [0], [0], [1], [0, 0, 1, 1], [], []>} : vector<28x96xf32>, vector<96x256xf32>, vector<28x256xf32> -> vector<28x256xf32>
    %19 = arith.addf %5, %18 : vector<28x256xf32>
    %c3 = arith.constant 3 : index
    %c0_18 = arith.constant 0 : index
    %c0_19 = arith.constant 0 : index
    %20 = vector.load %arg1[%c3, %c0_18, %c0_19] : memref<9x28x28xf32, #tpu.memory_space<vmem>>, vector<1x28x28xf32>
    %21 = vector.shape_cast %20 : vector<1x28x28xf32> to vector<28x28xf32>
    %cst_20 = arith.constant dense<0.000000e+00> : vector<28x96xf32>
    %22 = tpu.matmul %21, %12, %cst_20 {dimension_numbers = #tpu.dot_dimension_numbers<[1], [0], [0], [1], [0, 0, 1, 1], [], []>} : vector<28x28xf32>, vector<28x96xf32>, vector<28x96xf32> -> vector<28x96xf32>
    %c1 = arith.constant 1 : index
    %c0_21 = arith.constant 0 : index
    %c0_22 = arith.constant 0 : index
    %23 = vector.load %arg7[%c1, %c0_21, %c0_22] : memref<3x96x256xf32, #tpu.memory_space<vmem>>, vector<1x96x256xf32>
    %24 = vector.shape_cast %23 : vector<1x96x256xf32> to vector<96x256xf32>
    %cst_23 = arith.constant dense<0.000000e+00> : vector<28x256xf32>
    %25 = tpu.matmul %22, %24, %cst_23 {dimension_numbers = #tpu.dot_dimension_numbers<[1], [0], [0], [1], [0, 0, 1, 1], [], []>} : vector<28x96xf32>, vector<96x256xf32>, vector<28x256xf32> -> vector<28x256xf32>
    %26 = arith.addf %19, %25 : vector<28x256xf32>
    %c4 = arith.constant 4 : index
    %c0_24 = arith.constant 0 : index
    %c0_25 = arith.constant 0 : index
    %27 = vector.load %arg1[%c4, %c0_24, %c0_25] : memref<9x28x28xf32, #tpu.memory_space<vmem>>, vector<1x28x28xf32>
    %28 = vector.shape_cast %27 : vector<1x28x28xf32> to vector<28x28xf32>
    %cst_26 = arith.constant dense<0.000000e+00> : vector<28x96xf32>
    %29 = tpu.matmul %28, %12, %cst_26 {dimension_numbers = #tpu.dot_dimension_numbers<[1], [0], [0], [1], [0, 0, 1, 1], [], []>} : vector<28x28xf32>, vector<28x96xf32>, vector<28x96xf32> -> vector<28x96xf32>
    %c2_27 = arith.constant 2 : index
    %c0_28 = arith.constant 0 : index
    %c0_29 = arith.constant 0 : index
    %30 = vector.load %arg7[%c2_27, %c0_28, %c0_29] : memref<3x96x256xf32, #tpu.memory_space<vmem>>, vector<1x96x256xf32>
    %31 = vector.shape_cast %30 : vector<1x96x256xf32> to vector<96x256xf32>
    %cst_30 = arith.constant dense<0.000000e+00> : vector<28x256xf32>
    %32 = tpu.matmul %29, %31, %cst_30 {dimension_numbers = #tpu.dot_dimension_numbers<[1], [0], [0], [1], [0, 0, 1, 1], [], []>} : vector<28x96xf32>, vector<96x256xf32>, vector<28x256xf32> -> vector<28x256xf32>
    %33 = arith.addf %26, %32 : vector<28x256xf32>
    %c0_31 = arith.constant 0 : index
    %c0_32 = arith.constant 0 : index
    %34 = vector.load %arg5[%c0_31, %c0_32] : memref<4x16xf32, #tpu.memory_space<vmem>>, vector<4x16xf32>
    %cst_33 = arith.constant dense<0.000000e+00> : vector<28x16xf32>
    %35 = tpu.matmul %0, %34, %cst_33 {dimension_numbers = #tpu.dot_dimension_numbers<[1], [0], [0], [1], [0, 0, 1, 1], [], []>} : vector<28x4xf32>, vector<4x16xf32>, vector<28x16xf32> -> vector<28x16xf32>
    %c0_34 = arith.constant 0 : index
    %c0_35 = arith.constant 0 : index
    %36 = vector.load %arg6[%c0_34, %c0_35] : memref<1x16xf32, #tpu.memory_space<vmem>>, vector<1x16xf32>
    %37 = vector.broadcast %36 : vector<1x16xf32> to vector<28x16xf32>
    %38 = arith.addf %35, %37 : vector<28x16xf32>
    %cst_36 = arith.constant 0.000000e+00 : f32
    %39 = vector.broadcast %cst_36 : f32 to vector<28x16xf32>
    %40 = arith.maximumf %38, %39 : vector<28x16xf32>
    %c0_37 = arith.constant 0 : index
    %c0_38 = arith.constant 0 : index
    %c0_39 = arith.constant 0 : index
    %41 = vector.load %arg1[%c0_37, %c0_38, %c0_39] : memref<9x28x28xf32, #tpu.memory_space<vmem>>, vector<1x28x28xf32>
    %42 = vector.shape_cast %41 : vector<1x28x28xf32> to vector<28x28xf32>
    %cst_40 = arith.constant dense<0.000000e+00> : vector<28x16xf32>
    %43 = tpu.matmul %42, %40, %cst_40 {dimension_numbers = #tpu.dot_dimension_numbers<[1], [0], [0], [1], [0, 0, 1, 1], [], []>} : vector<28x28xf32>, vector<28x16xf32>, vector<28x16xf32> -> vector<28x16xf32>
    %c0_41 = arith.constant 0 : index
    %c0_42 = arith.constant 0 : index
    %c0_43 = arith.constant 0 : index
    %44 = vector.load %arg8[%c0_41, %c0_42, %c0_43] : memref<7x16x256xf32, #tpu.memory_space<vmem>>, vector<1x16x256xf32>
    %45 = vector.shape_cast %44 : vector<1x16x256xf32> to vector<16x256xf32>
    %cst_44 = arith.constant dense<0.000000e+00> : vector<28x256xf32>
    %46 = tpu.matmul %43, %45, %cst_44 {dimension_numbers = #tpu.dot_dimension_numbers<[1], [0], [0], [1], [0, 0, 1, 1], [], []>} : vector<28x16xf32>, vector<16x256xf32>, vector<28x256xf32> -> vector<28x256xf32>
    %47 = arith.addf %33, %46 : vector<28x256xf32>
    %c1_45 = arith.constant 1 : index
    %c0_46 = arith.constant 0 : index
    %c0_47 = arith.constant 0 : index
    %48 = vector.load %arg1[%c1_45, %c0_46, %c0_47] : memref<9x28x28xf32, #tpu.memory_space<vmem>>, vector<1x28x28xf32>
    %49 = vector.shape_cast %48 : vector<1x28x28xf32> to vector<28x28xf32>
    %cst_48 = arith.constant dense<0.000000e+00> : vector<28x16xf32>
    %50 = tpu.matmul %49, %40, %cst_48 {dimension_numbers = #tpu.dot_dimension_numbers<[1], [0], [0], [1], [0, 0, 1, 1], [], []>} : vector<28x28xf32>, vector<28x16xf32>, vector<28x16xf32> -> vector<28x16xf32>
    %c1_49 = arith.constant 1 : index
    %c0_50 = arith.constant 0 : index
    %c0_51 = arith.constant 0 : index
    %51 = vector.load %arg8[%c1_49, %c0_50, %c0_51] : memref<7x16x256xf32, #tpu.memory_space<vmem>>, vector<1x16x256xf32>
    %52 = vector.shape_cast %51 : vector<1x16x256xf32> to vector<16x256xf32>
    %cst_52 = arith.constant dense<0.000000e+00> : vector<28x256xf32>
    %53 = tpu.matmul %50, %52, %cst_52 {dimension_numbers = #tpu.dot_dimension_numbers<[1], [0], [0], [1], [0, 0, 1, 1], [], []>} : vector<28x16xf32>, vector<16x256xf32>, vector<28x256xf32> -> vector<28x256xf32>
    %54 = arith.addf %47, %53 : vector<28x256xf32>
    %c2_53 = arith.constant 2 : index
    %c0_54 = arith.constant 0 : index
    %c0_55 = arith.constant 0 : index
    %55 = vector.load %arg1[%c2_53, %c0_54, %c0_55] : memref<9x28x28xf32, #tpu.memory_space<vmem>>, vector<1x28x28xf32>
    %56 = vector.shape_cast %55 : vector<1x28x28xf32> to vector<28x28xf32>
    %cst_56 = arith.constant dense<0.000000e+00> : vector<28x16xf32>
    %57 = tpu.matmul %56, %40, %cst_56 {dimension_numbers = #tpu.dot_dimension_numbers<[1], [0], [0], [1], [0, 0, 1, 1], [], []>} : vector<28x28xf32>, vector<28x16xf32>, vector<28x16xf32> -> vector<28x16xf32>
    %c2_57 = arith.constant 2 : index
    %c0_58 = arith.constant 0 : index
    %c0_59 = arith.constant 0 : index
    %58 = vector.load %arg8[%c2_57, %c0_58, %c0_59] : memref<7x16x256xf32, #tpu.memory_space<vmem>>, vector<1x16x256xf32>
    %59 = vector.shape_cast %58 : vector<1x16x256xf32> to vector<16x256xf32>
    %cst_60 = arith.constant dense<0.000000e+00> : vector<28x256xf32>
    %60 = tpu.matmul %57, %59, %cst_60 {dimension_numbers = #tpu.dot_dimension_numbers<[1], [0], [0], [1], [0, 0, 1, 1], [], []>} : vector<28x16xf32>, vector<16x256xf32>, vector<28x256xf32> -> vector<28x256xf32>
    %61 = arith.addf %54, %60 : vector<28x256xf32>
    %c3_61 = arith.constant 3 : index
    %c0_62 = arith.constant 0 : index
    %c0_63 = arith.constant 0 : index
    %62 = vector.load %arg1[%c3_61, %c0_62, %c0_63] : memref<9x28x28xf32, #tpu.memory_space<vmem>>, vector<1x28x28xf32>
    %63 = vector.shape_cast %62 : vector<1x28x28xf32> to vector<28x28xf32>
    %cst_64 = arith.constant dense<0.000000e+00> : vector<28x16xf32>
    %64 = tpu.matmul %63, %40, %cst_64 {dimension_numbers = #tpu.dot_dimension_numbers<[1], [0], [0], [1], [0, 0, 1, 1], [], []>} : vector<28x28xf32>, vector<28x16xf32>, vector<28x16xf32> -> vector<28x16xf32>
    %c3_65 = arith.constant 3 : index
    %c0_66 = arith.constant 0 : index
    %c0_67 = arith.constant 0 : index
    %65 = vector.load %arg8[%c3_65, %c0_66, %c0_67] : memref<7x16x256xf32, #tpu.memory_space<vmem>>, vector<1x16x256xf32>
    %66 = vector.shape_cast %65 : vector<1x16x256xf32> to vector<16x256xf32>
    %cst_68 = arith.constant dense<0.000000e+00> : vector<28x256xf32>
    %67 = tpu.matmul %64, %66, %cst_68 {dimension_numbers = #tpu.dot_dimension_numbers<[1], [0], [0], [1], [0, 0, 1, 1], [], []>} : vector<28x16xf32>, vector<16x256xf32>, vector<28x256xf32> -> vector<28x256xf32>
    %68 = arith.addf %61, %67 : vector<28x256xf32>
    %c4_69 = arith.constant 4 : index
    %c0_70 = arith.constant 0 : index
    %c0_71 = arith.constant 0 : index
    %69 = vector.load %arg1[%c4_69, %c0_70, %c0_71] : memref<9x28x28xf32, #tpu.memory_space<vmem>>, vector<1x28x28xf32>
    %70 = vector.shape_cast %69 : vector<1x28x28xf32> to vector<28x28xf32>
    %cst_72 = arith.constant dense<0.000000e+00> : vector<28x16xf32>
    %71 = tpu.matmul %70, %40, %cst_72 {dimension_numbers = #tpu.dot_dimension_numbers<[1], [0], [0], [1], [0, 0, 1, 1], [], []>} : vector<28x28xf32>, vector<28x16xf32>, vector<28x16xf32> -> vector<28x16xf32>
    %c4_73 = arith.constant 4 : index
    %c0_74 = arith.constant 0 : index
    %c0_75 = arith.constant 0 : index
    %72 = vector.load %arg8[%c4_73, %c0_74, %c0_75] : memref<7x16x256xf32, #tpu.memory_space<vmem>>, vector<1x16x256xf32>
    %73 = vector.shape_cast %72 : vector<1x16x256xf32> to vector<16x256xf32>
    %cst_76 = arith.constant dense<0.000000e+00> : vector<28x256xf32>
    %74 = tpu.matmul %71, %73, %cst_76 {dimension_numbers = #tpu.dot_dimension_numbers<[1], [0], [0], [1], [0, 0, 1, 1], [], []>} : vector<28x16xf32>, vector<16x256xf32>, vector<28x256xf32> -> vector<28x256xf32>
    %75 = arith.addf %68, %74 : vector<28x256xf32>
    %c5 = arith.constant 5 : index
    %c0_77 = arith.constant 0 : index
    %c0_78 = arith.constant 0 : index
    %76 = vector.load %arg1[%c5, %c0_77, %c0_78] : memref<9x28x28xf32, #tpu.memory_space<vmem>>, vector<1x28x28xf32>
    %77 = vector.shape_cast %76 : vector<1x28x28xf32> to vector<28x28xf32>
    %cst_79 = arith.constant dense<0.000000e+00> : vector<28x16xf32>
    %78 = tpu.matmul %77, %40, %cst_79 {dimension_numbers = #tpu.dot_dimension_numbers<[1], [0], [0], [1], [0, 0, 1, 1], [], []>} : vector<28x28xf32>, vector<28x16xf32>, vector<28x16xf32> -> vector<28x16xf32>
    %c5_80 = arith.constant 5 : index
    %c0_81 = arith.constant 0 : index
    %c0_82 = arith.constant 0 : index
    %79 = vector.load %arg8[%c5_80, %c0_81, %c0_82] : memref<7x16x256xf32, #tpu.memory_space<vmem>>, vector<1x16x256xf32>
    %80 = vector.shape_cast %79 : vector<1x16x256xf32> to vector<16x256xf32>
    %cst_83 = arith.constant dense<0.000000e+00> : vector<28x256xf32>
    %81 = tpu.matmul %78, %80, %cst_83 {dimension_numbers = #tpu.dot_dimension_numbers<[1], [0], [0], [1], [0, 0, 1, 1], [], []>} : vector<28x16xf32>, vector<16x256xf32>, vector<28x256xf32> -> vector<28x256xf32>
    %82 = arith.addf %75, %81 : vector<28x256xf32>
    %c6 = arith.constant 6 : index
    %c0_84 = arith.constant 0 : index
    %c0_85 = arith.constant 0 : index
    %83 = vector.load %arg1[%c6, %c0_84, %c0_85] : memref<9x28x28xf32, #tpu.memory_space<vmem>>, vector<1x28x28xf32>
    %84 = vector.shape_cast %83 : vector<1x28x28xf32> to vector<28x28xf32>
    %cst_86 = arith.constant dense<0.000000e+00> : vector<28x16xf32>
    %85 = tpu.matmul %84, %40, %cst_86 {dimension_numbers = #tpu.dot_dimension_numbers<[1], [0], [0], [1], [0, 0, 1, 1], [], []>} : vector<28x28xf32>, vector<28x16xf32>, vector<28x16xf32> -> vector<28x16xf32>
    %c6_87 = arith.constant 6 : index
    %c0_88 = arith.constant 0 : index
    %c0_89 = arith.constant 0 : index
    %86 = vector.load %arg8[%c6_87, %c0_88, %c0_89] : memref<7x16x256xf32, #tpu.memory_space<vmem>>, vector<1x16x256xf32>
    %87 = vector.shape_cast %86 : vector<1x16x256xf32> to vector<16x256xf32>
    %cst_90 = arith.constant dense<0.000000e+00> : vector<28x256xf32>
    %88 = tpu.matmul %85, %87, %cst_90 {dimension_numbers = #tpu.dot_dimension_numbers<[1], [0], [0], [1], [0, 0, 1, 1], [], []>} : vector<28x16xf32>, vector<16x256xf32>, vector<28x256xf32> -> vector<28x256xf32>
    %89 = arith.addf %82, %88 : vector<28x256xf32>
    %c7 = arith.constant 7 : index
    %c0_91 = arith.constant 0 : index
    %c0_92 = arith.constant 0 : index
    %90 = vector.load %arg1[%c7, %c0_91, %c0_92] : memref<9x28x28xf32, #tpu.memory_space<vmem>>, vector<1x28x28xf32>
    %91 = vector.shape_cast %90 : vector<1x28x28xf32> to vector<28x28xf32>
    %cst_93 = arith.constant dense<0.000000e+00> : vector<28x4xf32>
    %92 = tpu.matmul %91, %0, %cst_93 {dimension_numbers = #tpu.dot_dimension_numbers<[1], [0], [0], [1], [0, 0, 1, 1], [], []>} : vector<28x28xf32>, vector<28x4xf32>, vector<28x4xf32> -> vector<28x4xf32>
    %93 = arith.maximumf %0, %92 : vector<28x4xf32>
    %c8 = arith.constant 8 : index
    %c0_94 = arith.constant 0 : index
    %c0_95 = arith.constant 0 : index
    %94 = vector.load %arg1[%c8, %c0_94, %c0_95] : memref<9x28x28xf32, #tpu.memory_space<vmem>>, vector<1x28x28xf32>
    %95 = vector.shape_cast %94 : vector<1x28x28xf32> to vector<28x28xf32>
    %cst_96 = arith.constant dense<0.000000e+00> : vector<28x4xf32>
    %96 = tpu.matmul %95, %0, %cst_96 {dimension_numbers = #tpu.dot_dimension_numbers<[1], [0], [0], [1], [0, 0, 1, 1], [], []>} : vector<28x28xf32>, vector<28x4xf32>, vector<28x4xf32> -> vector<28x4xf32>
    %97 = arith.maximumf %93, %96 : vector<28x4xf32>
    %c0_97 = arith.constant 0 : index
    %c0_98 = arith.constant 0 : index
    %98 = vector.load %arg9[%c0_97, %c0_98] : memref<4x256xf32, #tpu.memory_space<vmem>>, vector<4x256xf32>
    %cst_99 = arith.constant dense<0.000000e+00> : vector<28x256xf32>
    %99 = tpu.matmul %97, %98, %cst_99 {dimension_numbers = #tpu.dot_dimension_numbers<[1], [0], [0], [1], [0, 0, 1, 1], [], []>} : vector<28x4xf32>, vector<4x256xf32>, vector<28x256xf32> -> vector<28x256xf32>
    %100 = arith.addf %89, %99 : vector<28x256xf32>
    %cst_100 = arith.constant 0.000000e+00 : f32
    %101 = vector.broadcast %cst_100 : f32 to vector<28x256xf32>
    %102 = arith.maximumf %100, %101 : vector<28x256xf32>
    %c0_101 = arith.constant 0 : index
    %c0_102 = arith.constant 0 : index
    %103 = vector.load %arg11[%c0_101, %c0_102] : memref<32x28xf32, #tpu.memory_space<vmem>>, vector<32x28xf32>
    %cst_103 = arith.constant dense<0.000000e+00> : vector<32x256xf32>
    %104 = tpu.matmul %103, %102, %cst_103 {dimension_numbers = #tpu.dot_dimension_numbers<[1], [0], [0], [1], [0, 0, 1, 1], [], []>} : vector<32x28xf32>, vector<28x256xf32>, vector<32x256xf32> -> vector<32x256xf32>
    %c0_104 = arith.constant 0 : index
    %c0_105 = arith.constant 0 : index
    %105 = vector.load %arg12[%c0_104, %c0_105] : memref<32x1xf32, #tpu.memory_space<vmem>>, vector<32x1xf32>
    %106 = vector.broadcast %105 : vector<32x1xf32> to vector<32x256xf32>
    %107 = arith.addf %104, %106 : vector<32x256xf32>
    %cst_106 = arith.constant 0.000000e+00 : f32
    %108 = vector.broadcast %cst_106 : f32 to vector<32x256xf32>
    %109 = arith.maximumf %107, %108 : vector<32x256xf32>
    %c0_107 = arith.constant 0 : index
    %c0_108 = arith.constant 0 : index
    %110 = vector.load %arg13[%c0_107, %c0_108] : memref<32x256xf32, #tpu.memory_space<vmem>>, vector<32x256xf32>
    tpu.vector_store %arg13[%c0_107, %c0_108], %109 {strides = array<i32>} : memref<32x256xf32, #tpu.memory_space<vmem>>, vector<32x256xf32>,
    return
  }
}

module attributes {stable_mosaic.version = 11 : i64} {
  func.func @_fc_kernel(%arg0: i32, %arg1: memref<2x2816xbf16, #tpu.memory_space<vmem>>, %arg2: memref<2816x256xbf16, #tpu.memory_space<vmem>>, %arg3: memref<1x256xf32, #tpu.memory_space<vmem>>, %arg4: memref<256x4xf32, #tpu.memory_space<vmem>>, %arg5: memref<1x4xf32, #tpu.memory_space<vmem>>, %arg6: memref<2x4xf32, #tpu.memory_space<vmem>>, %arg7: memref<2x256xf32, #tpu.memory_space<vmem>>) attributes {dimension_semantics = [#tpu.dimension_semantics<arbitrary>], iteration_bounds = array<i64: 3>, scalar_prefetch = 0 : i64, scratch_operands = 1 : i64, tpu.core_type = #tpu.core_type<tc>, window_params = [{transform_indices = @transform_0, window_bounds = array<i64: 2, 2816>}, {transform_indices = @transform_1, window_bounds = array<i64: 2816, 256>}, {pipeline_mode = #tpu.pipeline_mode<synchronous>, transform_indices = @transform_2, window_bounds = array<i64: 1, 256>}, {pipeline_mode = #tpu.pipeline_mode<synchronous>, transform_indices = @transform_3, window_bounds = array<i64: 256, 4>}, {pipeline_mode = #tpu.pipeline_mode<synchronous>, transform_indices = @transform_4, window_bounds = array<i64: 1, 4>}, {pipeline_mode = #tpu.pipeline_mode<synchronous>, transform_indices = @transform_5, window_bounds = array<i64: 2, 4>}]} {
    %c0_i32 = arith.constant 0 : i32
    %0 = arith.cmpi eq, %arg0, %c0_i32 : i32
    %1 = arith.extui %0 : i1 to i32
    %c0_i32_0 = arith.constant 0 : i32
    %2 = arith.cmpi ne, %1, %c0_i32_0 : i32
    scf.if %2 {
      %cst_9 = arith.constant 0.000000e+00 : f32
      %12 = vector.broadcast %cst_9 : f32 to vector<2x256xf32>
      %c0_10 = arith.constant 0 : index
      %c0_11 = arith.constant 0 : index
      %13 = vector.load %arg7[%c0_10, %c0_11] : memref<2x256xf32, #tpu.memory_space<vmem>>, vector<2x256xf32>
      tpu.vector_store %arg7[%c0_10, %c0_11], %12 {strides = array<i32>} : memref<2x256xf32, #tpu.memory_space<vmem>>, vector<2x256xf32>,
    } else {
    }
    %c0 = arith.constant 0 : index
    %c0_1 = arith.constant 0 : index
    %3 = vector.load %arg7[%c0, %c0_1] : memref<2x256xf32, #tpu.memory_space<vmem>>, vector<2x256xf32>
    %c0_2 = arith.constant 0 : index
    %c0_3 = arith.constant 0 : index
    %4 = vector.load %arg1[%c0_2, %c0_3] : memref<2x2816xbf16, #tpu.memory_space<vmem>>, vector<2x2816xbf16>
    %c0_4 = arith.constant 0 : index
    %c0_5 = arith.constant 0 : index
    %5 = vector.load %arg2[%c0_4, %c0_5] : memref<2816x256xbf16, #tpu.memory_space<vmem>>, vector<2816x256xbf16>
    %cst = arith.constant dense<0.000000e+00> : vector<2x256xf32>
    %6 = tpu.matmul %4, %5, %cst {dimension_numbers = #tpu.dot_dimension_numbers<[1], [0], [0], [1], [0, 0, 1, 1], [], []>} : vector<2x2816xbf16>, vector<2816x256xbf16>, vector<2x256xf32> -> vector<2x256xf32>
    %7 = arith.addf %3, %6 : vector<2x256xf32>
    %c0_6 = arith.constant 0 : index
    %c0_7 = arith.constant 0 : index
    %8 = vector.load %arg7[%c0_6, %c0_7] : memref<2x256xf32, #tpu.memory_space<vmem>>, vector<2x256xf32>
    tpu.vector_store %arg7[%c0_6, %c0_7], %7 {strides = array<i32>} : memref<2x256xf32, #tpu.memory_space<vmem>>, vector<2x256xf32>,
    %c2_i32 = arith.constant 2 : i32
    %9 = arith.cmpi eq, %arg0, %c2_i32 : i32
    %10 = arith.extui %9 : i1 to i32
    %c0_i32_8 = arith.constant 0 : i32
    %11 = arith.cmpi ne, %10, %c0_i32_8 : i32
    scf.if %11 {
      %c0_9 = arith.constant 0 : index
      %c0_10 = arith.constant 0 : index
      %12 = vector.load %arg7[%c0_9, %c0_10] : memref<2x256xf32, #tpu.memory_space<vmem>>, vector<2x256xf32>
      %c0_11 = arith.constant 0 : index
      %c0_12 = arith.constant 0 : index
      %13 = vector.load %arg3[%c0_11, %c0_12] : memref<1x256xf32, #tpu.memory_space<vmem>>, vector<1x256xf32>
      %14 = vector.broadcast %13 : vector<1x256xf32> to vector<2x256xf32>
      %15 = arith.addf %12, %14 : vector<2x256xf32>
      %cst_13 = arith.constant 0.000000e+00 : f32
      %16 = vector.broadcast %cst_13 : f32 to vector<2x256xf32>
      %17 = arith.maximumf %15, %16 : vector<2x256xf32>
      %c0_14 = arith.constant 0 : index
      %c0_15 = arith.constant 0 : index
      %18 = vector.load %arg4[%c0_14, %c0_15] : memref<256x4xf32, #tpu.memory_space<vmem>>, vector<256x4xf32>
      %cst_16 = arith.constant dense<0.000000e+00> : vector<2x4xf32>
      %19 = tpu.matmul %17, %18, %cst_16 {dimension_numbers = #tpu.dot_dimension_numbers<[1], [0], [0], [1], [0, 0, 1, 1], [], []>} : vector<2x256xf32>, vector<256x4xf32>, vector<2x4xf32> -> vector<2x4xf32>
      %c0_17 = arith.constant 0 : index
      %c0_18 = arith.constant 0 : index
      %20 = vector.load %arg5[%c0_17, %c0_18] : memref<1x4xf32, #tpu.memory_space<vmem>>, vector<1x4xf32>
      %21 = vector.broadcast %20 : vector<1x4xf32> to vector<2x4xf32>
      %22 = arith.addf %19, %21 : vector<2x4xf32>
      %c0_19 = arith.constant 0 : index
      %c0_20 = arith.constant 0 : index
      %23 = vector.load %arg6[%c0_19, %c0_20] : memref<2x4xf32, #tpu.memory_space<vmem>>, vector<2x4xf32>
      tpu.vector_store %arg6[%c0_19, %c0_20], %22 {strides = array<i32>} : memref<2x4xf32, #tpu.memory_space<vmem>>, vector<2x4xf32>,
    } else {
    }
    return
  }
  func.func @transform_0(%arg0: i32) -> (i32, i32) {
    %c0_i32 = arith.constant 0 : i32
    %c0_i32_0 = arith.constant 0 : i32
    return %c0_i32, %arg0 : i32, i32
  }
  func.func @transform_1(%arg0: i32) -> (i32, i32) {
    %c0_i32 = arith.constant 0 : i32
    %c0_i32_0 = arith.constant 0 : i32
    return %arg0, %c0_i32 : i32, i32
  }
  func.func @transform_2(%arg0: i32) -> (i32, i32) {
    %c0_i32 = arith.constant 0 : i32
    %c0_i32_0 = arith.constant 0 : i32
    %c0_i32_1 = arith.constant 0 : i32
    return %c0_i32, %c0_i32_0 : i32, i32
  }
  func.func @transform_3(%arg0: i32) -> (i32, i32) {
    %c0_i32 = arith.constant 0 : i32
    %c0_i32_0 = arith.constant 0 : i32
    %c0_i32_1 = arith.constant 0 : i32
    return %c0_i32, %c0_i32_0 : i32, i32
  }
  func.func @transform_4(%arg0: i32) -> (i32, i32) {
    %c0_i32 = arith.constant 0 : i32
    %c0_i32_0 = arith.constant 0 : i32
    %c0_i32_1 = arith.constant 0 : i32
    return %c0_i32, %c0_i32_0 : i32, i32
  }
  func.func @transform_5(%arg0: i32) -> (i32, i32) {
    %c0_i32 = arith.constant 0 : i32
    %c0_i32_0 = arith.constant 0 : i32
    %c0_i32_1 = arith.constant 0 : i32
    return %c0_i32, %c0_i32_0 : i32, i32
  }
}

</mosaic_0001>

<bundles_post_ra>
// kernel: custom-call
= control target key start
LH: loop header
LB: loop body
LE: loop exit
PB: predicated region body
PF: predicated region fallthrough
CT: control target
= control target key end

     0   :  { %s6_s0 = inlined_call_operand.vmem [shape: f32[2,8], index: 0, kind: output, shape index: {}]  }

// kernel: forward.3
= control target key start
LH: loop header
LB: loop body
LE: loop exit
PB: predicated region body
PF: predicated region fallthrough
CT: control target
= control target key end

     0   :  { %16 = vsyncpa [#allocation3], 0  ;;  %s4519_s0 = inlined_call_operand.vmem [shape: f32[32,4], index: 0, kind: input, shape index: {}]   ;;  %s4520_s1 = inlined_call_operand.hbm [shape: f32[9,32,32], index: 1, kind: input, shape index: {}]   ;;  %s4521_s2 = inlined_call_operand.hbm [shape: f32[4,256], index: 2, kind: input, shape index: {}]   ;;  %s4522_s3 = inlined_call_operand.hbm [shape: f32[4,96], index: 3, kind: input, shape index: {}]   ;;  %s4523_s4 = inlined_call_operand.hbm [shape: f32[1,96], index: 4, kind: input, shape index: {}]   ;;  %s4524_s5 = inlined_call_operand.hbm [shape: f32[4,16], index: 5, kind: input, shape index: {}]   ;;  %s4525_s6 = inlined_call_operand.hbm [shape: f32[1,16], index: 6, kind: input, shape index: {}]   ;;  %s4526_s7 = inlined_call_operand.hbm [shape: f32[3,96,256], index: 7, kind: input, shape index: {}]   ;;  %s4527_s8 = inlined_call_operand.hbm [shape: f32[7,16,256], index: 8, kind: input, shape index: {}]   ;;  %s4528_s9 = inlined_call_operand.hbm [shape: f32[4,256], index: 9, kind: input, shape index: {}]   ;;  %s4529_s10 = inlined_call_operand.hbm [shape: f32[1,256], index: 10, kind: input, shape index: {}]   ;;  %s4530_s11 = inlined_call_operand.vmem [shape: f32[32,256], index: 11, kind: output, shape index: {}]  }
   0x1   :  { %17 = vsyncpa [#allocation5], 0 }
   0x2   :  { %18 = vsyncpa [#allocation8], 0 }
   0x3   :  { %19 = vsyncpa [#allocation11], 0 }
   0x4   :  { %20 = vsyncpa [#allocation14], 0 }
   0x5   :  { %21 = vsyncpa [#allocation17], 0  ;;  %s3960_s17 = smov [#allocation4]   ;;  %s3961_s19 = smov [#allocation7]  }
   0x6   :  { %s42_s18 = sshll.u32 %s3960_s17, 4  ;;  %s62_s20 = sshll.u32 %s3961_s19, 4  ;;  %s43_s18 = int_to_ptr.vmem [resolvable:$true] %s42_s18  ;;  %s63_s20 = int_to_ptr.vmem [resolvable:$true] %s62_s20 }
   0x7   :  { %s3728_s23 = scalar_lea.hbm %s4521_s2, 128 }
   0x8   :  { %p3729_p0 = scmp.ne.s32.totalorder %s4521_s2, %s3728_s23  ;;  %p3732_p1 = scmp.lt.u32.totalorder %s3728_s23, %s4521_s2 }
   0xa   :  { %p3734_p2 = pnand %p3732_p1, %p3729_p0 }
   0xc   :  { %3737 = shalt.err (!%p3734_p2)
}
   0xd   :  { %s3738_s28 = scalar_lea.vmem %s43_s18, 128  ;;  %p3743_p4 = scmp.lt.s32.totalorder %s43_s18, %s43_s18 }
   0xe   :  { %p3739_p3 = scmp.ne.s32.totalorder %s43_s18, %s3738_s28  ;;  %p3744_p5 = scmp.lt.s32.totalorder %s3738_s28, %s3738_s28 }
  0x10   :  { %p3745_p6 = por %p3744_p5, %p3743_p4 }
  0x12   :  { %p3746_p7 = pnand %p3745_p6, %p3739_p3 }
  0x14   :  { %3749 = shalt.err (!%p3746_p7)
}
  0x15   :  { %45 = dma.hbm_to_vmem [thread:$0]  %s4521_s2, 128, %s43_s18, [#allocation5]  }
  0x16   :  { %s3750_s14 = scalar_lea.hbm %s4523_s4, 16 }
  0x17   :  { %p3751_p8 = scmp.ne.s32.totalorder %s4523_s4, %s3750_s14  ;;  %p3754_p9 = scmp.lt.u32.totalorder %s3750_s14, %s4523_s4 }
  0x19   :  { %p3756_p10 = pnand %p3754_p9, %p3751_p8 }
  0x1b   :  { %3759 = shalt.err (!%p3756_p10)
}
  0x1c   :  { %s3760_s21 = scalar_lea.vmem %s63_s20, 16  ;;  %s3764_s22 = scalar_lea.vmem %s63_s20, 32 }
  0x1d   :  { %p3761_p11 = scmp.ne.s32.totalorder %s63_s20, %s3760_s21  ;;  %p3765_p12 = scmp.lt.s32.totalorder %s63_s20, %s63_s20 }
  0x1e   :  { %p3766_p13 = scmp.lt.s32.totalorder %s3764_s22, %s3760_s21 }
  0x20   :  { %p3767_p0 = por %p3766_p13, %p3765_p12 }
  0x22   :  { %p3768_p1 = pnand %p3767_p0, %p3761_p11 }
  0x24   :  { %3771 = shalt.err (!%p3768_p1)
}
  0x25   :  { %65 = dma.hbm_to_vmem [thread:$0]  %s4523_s4, 16, %s63_s20, [#allocation8]  }
  0x26   :  { %s3962_s23 = smov [#allocation10]   ;;  %s3772_s27 = scalar_lea.hbm %s4525_s6, 16 }
  0x27   :  { %s82_s24 = sshll.u32 %s3962_s23, 4  ;;  %p3773_p2 = scmp.ne.s32.totalorder %s4525_s6, %s3772_s27  ;;  %s83_s24 = int_to_ptr.vmem [resolvable:$true] %s82_s24 }
  0x28   :  { %p3776_p3 = scmp.lt.u32.totalorder %s3772_s27, %s4525_s6 }
  0x2a   :  { %p3778_p4 = pnand %p3776_p3, %p3773_p2 }
  0x2c   :  { %3781 = shalt.err (!%p3778_p4)
}
  0x2d   :  { %s3782_s13 = scalar_lea.vmem %s83_s24, 16  ;;  %s3786_s4 = scalar_lea.vmem %s83_s24, 32 }
  0x2e   :  { %p3783_p5 = scmp.ne.s32.totalorder %s83_s24, %s3782_s13  ;;  %p3787_p6 = scmp.lt.s32.totalorder %s83_s24, %s83_s24 }
  0x2f   :  { %p3788_p7 = scmp.lt.s32.totalorder %s3786_s4, %s3782_s13 }
  0x31   :  { %p3789_p8 = por %p3788_p7, %p3787_p6 }
  0x33   :  { %p3790_p9 = pnand %p3789_p8, %p3783_p5 }
  0x35   :  { %3793 = shalt.err (!%p3790_p9)
}
  0x36   :  { %85 = dma.hbm_to_vmem [thread:$0]  %s4525_s6, 16, %s83_s24, [#allocation11]  }
  0x37   :  { %s3963_s15 = smov [#allocation13]   ;;  %s3964_s17 = smov [#allocation2]  }
  0x38   :  { %s103_s16 = sshll.u32 %s3963_s15, 4  ;;  %s29_s19 = sshll.u32 %s3964_s17, 4  ;;  %s104_s16 = int_to_ptr.vmem [resolvable:$true] %s103_s16  ;;  %s30_s19 = int_to_ptr.vmem [resolvable:$true] %s29_s19 }
  0x39   :  { %s3794_s2 = scalar_lea.hbm %s4527_s8, 3584 }
  0x3a   :  { %p3795_p10 = scmp.ne.s32.totalorder %s4527_s8, %s3794_s2  ;;  %p3798_p11 = scmp.lt.u32.totalorder %s3794_s2, %s4527_s8 }
  0x3c   :  { %p3800_p12 = pnand %p3798_p11, %p3795_p10 }
  0x3e   :  { %3803 = shalt.err (!%p3800_p12)
}
  0x3f   :  { %s3804_s6 = scalar_lea.vmem %s104_s16, 3584  ;;  %p3809_p0 = scmp.lt.s32.totalorder %s104_s16, %s104_s16 }
  0x40   :  { %p3805_p13 = scmp.ne.s32.totalorder %s104_s16, %s3804_s6  ;;  %p3810_p1 = scmp.lt.s32.totalorder %s3804_s6, %s3804_s6 }
  0x42   :  { %p3811_p2 = por %p3810_p1, %p3809_p0 }
  0x44   :  { %p3812_p3 = pnand %p3811_p2, %p3805_p13 }
  0x46   :  { %3815 = shalt.err (!%p3812_p3)
}
  0x47   :  { %s3965_s24 = smov 256   ;;  %s3966_s27 = smov 16  }
  0x48   :  { %109 = dma.hbm_to_vmem [thread:$0]  %s4527_s8, 3584, %s104_s16, [#allocation14], %s3965_s24, %s3965_s24, %s3966_s27  }
  0x49   :  { %s3816_s13 = scalar_lea.hbm %s4520_s1, 4608 }
  0x4a   :  { %p3817_p4 = scmp.ne.s32.totalorder %s4520_s1, %s3816_s13  ;;  %p3820_p5 = scmp.lt.u32.totalorder %s3816_s13, %s4520_s1 }
  0x4c   :  { %p3822_p6 = pnand %p3820_p5, %p3817_p4 }
  0x4e   :  { %3825 = shalt.err (!%p3822_p6)
}
  0x4f   :  { %s3826_s17 = scalar_lea.vmem %s30_s19, 4608  ;;  %p3831_p8 = scmp.lt.s32.totalorder %s30_s19, %s30_s19 }
  0x50   :  { %p3827_p7 = scmp.ne.s32.totalorder %s30_s19, %s3826_s17  ;;  %p3832_p9 = scmp.lt.s32.totalorder %s3826_s17, %s3826_s17 }
  0x52   :  { %p3833_p10 = por %p3832_p9, %p3831_p8 }
  0x54   :  { %p3834_p11 = pnand %p3833_p10, %p3827_p7 }
  0x56   :  { %3837 = shalt.err (!%p3834_p11)
}
  0x57   :  { %s3967_s8 = smov 128   ;;  %s3968_s16 = smov 8  }
  0x58   :  { %35 = dma.hbm_to_vmem [thread:$0]  %s4520_s1, 4608, %s30_s19, [#allocation3], %s3967_s8, %s3967_s8, %s3968_s16  }
  0x59   :  { %s3969_s2 = smov [#allocation6]   ;;  %s3970_s23 = smov [#allocation9]  }
  0x5a   :  { %s52_s18 = sshll.u32 %s3969_s2, 4  ;;  %s72_s25 = sshll.u32 %s3970_s23, 4  ;;  %s53_s18 = int_to_ptr.vmem [resolvable:$true] %s52_s18  ;;  %s73_s25 = int_to_ptr.vmem [resolvable:$true] %s72_s25 }
  0x5b   :  { %s3838_s28 = scalar_lea.hbm %s4522_s3, 64 }
  0x5c   :  { %p3839_p12 = scmp.ne.s32.totalorder %s4522_s3, %s3838_s28  ;;  %p3842_p13 = scmp.lt.u32.totalorder %s3838_s28, %s4522_s3 }
  0x5e   :  { %p3844_p0 = pnand %p3842_p13, %p3839_p12 }
  0x60   :  { %3847 = shalt.err (!%p3844_p0)
}
  0x61   :  { %s3848_s1 = scalar_lea.vmem %s53_s18, 64  ;;  %p3853_p2 = scmp.lt.s32.totalorder %s53_s18, %s53_s18 }
  0x62   :  { %p3849_p1 = scmp.ne.s32.totalorder %s53_s18, %s3848_s1  ;;  %p3854_p3 = scmp.lt.s32.totalorder %s3848_s1, %s3848_s1 }
  0x64   :  { %p3855_p4 = por %p3854_p3, %p3853_p2 }
  0x66   :  { %p3856_p5 = pnand %p3855_p4, %p3849_p1 }
  0x68   :  { %3859 = shalt.err (!%p3856_p5)
}
  0x69   :  { %55 = dma.hbm_to_vmem [thread:$0]  %s4522_s3, 64, %s53_s18, [#allocation5]  }
  0x6a   :  { %s3860_s15 = scalar_lea.hbm %s4524_s5, 64 }
  0x6b   :  { %p3861_p6 = scmp.ne.s32.totalorder %s4524_s5, %s3860_s15  ;;  %p3864_p7 = scmp.lt.u32.totalorder %s3860_s15, %s4524_s5 }
  0x6d   :  { %p3866_p8 = pnand %p3864_p7, %p3861_p6 }
  0x6f   :  { %3869 = shalt.err (!%p3866_p8)
}
  0x70   :  { %s3870_s22 = scalar_lea.vmem %s73_s25, 64  ;;  %p3875_p10 = scmp.lt.s32.totalorder %s73_s25, %s73_s25 }
  0x71   :  { %p3871_p9 = scmp.ne.s32.totalorder %s73_s25, %s3870_s22  ;;  %p3876_p11 = scmp.lt.s32.totalorder %s3870_s22, %s3870_s22 }
  0x73   :  { %p3877_p12 = por %p3876_p11, %p3875_p10 }
  0x75   :  { %p3878_p13 = pnand %p3877_p12, %p3871_p9 }
  0x77   :  { %3881 = shalt.err (!%p3878_p13)
}
  0x78   :  { %75 = dma.hbm_to_vmem [thread:$0]  %s4524_s5, 64, %s73_s25, [#allocation8]  }
  0x79   :  { %s3971_s18 = smov [#allocation12]   ;;  %s3972_s26 = smov [#allocation15]  }
  0x7a   :  { %s91_s23 = sshll.u32 %s3971_s18, 4  ;;  %s116_s6 = sshll.u32 %s3972_s26, 4  ;;  %s92_s23 = int_to_ptr.vmem [resolvable:$true] %s91_s23  ;;  %s117_s6 = int_to_ptr.vmem [resolvable:$true] %s116_s6 }
  0x7b   :  { %s3882_s30 = scalar_lea.hbm %s4526_s7, 9216 }
  0x7c   :  { %p3883_p0 = scmp.ne.s32.totalorder %s4526_s7, %s3882_s30  ;;  %p3886_p1 = scmp.lt.u32.totalorder %s3882_s30, %s4526_s7 }
  0x7e   :  { %p3888_p2 = pnand %p3886_p1, %p3883_p0 }
  0x80   :  { %3891 = shalt.err (!%p3888_p2)
}
  0x81   :  { %s3892_s5 = scalar_lea.vmem %s92_s23, 9216  ;;  %p3897_p4 = scmp.lt.s32.totalorder %s92_s23, %s92_s23 }
  0x82   :  { %p3893_p3 = scmp.ne.s32.totalorder %s92_s23, %s3892_s5  ;;  %p3898_p5 = scmp.lt.s32.totalorder %s3892_s5, %s3892_s5 }
  0x84   :  { %p3899_p6 = por %p3898_p5, %p3897_p4 }
  0x86   :  { %p3900_p7 = pnand %p3899_p6, %p3893_p3 }
  0x88   :  { %3903 = shalt.err (!%p3900_p7)
}
  0x89   :  { %97 = dma.hbm_to_vmem [thread:$0]  %s4526_s7, 9216, %s92_s23, [#allocation11], %s3965_s24, %s3965_s24, %s3966_s27  }
  0x8a   :  { %s3904_s15 = scalar_lea.hbm %s4528_s9, 128 }
  0x8b   :  { %p3905_p8 = scmp.ne.s32.totalorder %s4528_s9, %s3904_s15  ;;  %p3908_p9 = scmp.lt.u32.totalorder %s3904_s15, %s4528_s9 }
  0x8d   :  { %p3910_p10 = pnand %p3908_p9, %p3905_p8 }
  0x8f   :  { %3913 = shalt.err (!%p3910_p10)
}
  0x90   :  { %s3914_s22 = scalar_lea.vmem %s117_s6, 128  ;;  %p3919_p12 = scmp.lt.s32.totalorder %s117_s6, %s117_s6 }
  0x91   :  { %p3915_p11 = scmp.ne.s32.totalorder %s117_s6, %s3914_s22  ;;  %p3920_p13 = scmp.lt.s32.totalorder %s3914_s22, %s3914_s22 }
  0x93   :  { %p3921_p0 = por %p3920_p13, %p3919_p12 }
  0x95   :  { %p3922_p1 = pnand %p3921_p0, %p3915_p11 }
  0x97   :  { %3925 = shalt.err (!%p3922_p1)
}
  0x98   :  { %119 = dma.hbm_to_vmem [thread:$0]  %s4528_s9, 128, %s117_s6, [#allocation14]  }
  0x99   :  { %s3973_s27 = smov [#allocation16]   ;;  %s3926_s23 = scalar_lea.hbm %s4529_s10, 32 }
  0x9a   :  { %s126_s3 = sshll.u32 %s3973_s27, 4  ;;  %p3927_p2 = scmp.ne.s32.totalorder %s4529_s10, %s3926_s23  ;;  %s127_s3 = int_to_ptr.vmem [resolvable:$true] %s126_s3 }
  0x9b   :  { %p3930_p3 = scmp.lt.u32.totalorder %s3926_s23, %s4529_s10 }
  0x9d   :  { %p3932_p4 = pnand %p3930_p3, %p3927_p2 }
  0x9f   :  { %3935 = shalt.err (!%p3932_p4)
}
  0xa0   :  { %s3936_s12 = scalar_lea.vmem %s127_s3, 32  ;;  %p3941_p6 = scmp.lt.s32.totalorder %s127_s3, %s127_s3 }
  0xa1   :  { %p3937_p5 = scmp.ne.s32.totalorder %s127_s3, %s3936_s12  ;;  %p3942_p7 = scmp.lt.s32.totalorder %s3936_s12, %s3936_s12 }
  0xa3   :  { %p3943_p8 = por %p3942_p7, %p3941_p6 }
  0xa5   :  { %p3944_p9 = pnand %p3943_p8, %p3937_p5 }
  0xa7   :  { %3947 = shalt.err (!%p3944_p9)
}
  0xa8   :  { %129 = dma.hbm_to_vmem [thread:$0]  %s4529_s10, 32, %s127_s3, [#allocation17]  }
  0xa9   :  { %3948 = dma.done.wait [#allocation3], 4608  }
  0xaa   :  { %3949 = vsyncadd [#allocation3], 4294962688 }
  0xab   :  { %3950 = dma.done.wait [#allocation5], 192  }
  0xac   :  { %3951 = vsyncadd [#allocation5], 4294967104 }
  0xad   :  { %3952 = dma.done.wait [#allocation8], 80  }
  0xae   :  { %3953 = vsyncadd [#allocation8], 4294967216 }
  0xaf   :  { %3954 = dma.done.wait [#allocation11], 9232  }
  0xb0   :  { %3955 = vsyncadd [#allocation11], 4294958064 }
  0xb1   :  { %3956 = dma.done.wait [#allocation14], 3712  }
  0xb2   :  { %3957 = vsyncadd [#allocation14], 4294963584 }
  0xb3   :  { %3958 = dma.done.wait [#allocation17], 32  }
  0xb4   :  { %3959 = vsyncadd [#allocation17], 4294967264  ;;  %vm192_vm0 = vcmask 1043456   ;;  %vm179_vm1 = vcmask 31744   ;;  %v286_v0 = vld [vmem:[#allocation6] sm:$0xf] }
  0xb5   :  { %v4164_v1 = vld [vmem:[%s4519_s0] sm:$0xff]  ;;  %v4169_v2 = vld [vmem:[%s4519_s0 + $0x8] sm:$0xff]  ;;  %3227 = vmatprep.subr.msk.mxu1 %vm192_vm0, %v286_v0  ;;  %v4177_v3 = vld [vmem:[%s4519_s0 + $0x10] sm:$0xff]  ;;  %vm391_vm2 = vcmask 261120   ;;  %v3974_v60 = vmov 0.0   ;;  %vm513_vm3 = vcmask 785408  }
  0xb6   :  { %3229 = vmatprep.mubr.msk.f32.mxu1 %vm179_vm1, %v4164_v1  ;;  %3228 = vmatpush3.msk.msra.mxu1 %vm192_vm0, %v286_v0  ;;  %v4187_v4 = vld [vmem:[%s4519_s0 + $0x18] sm:$0xff]  ;;  %v4191_v5 = vld [vmem:[#allocation2 + $0x40] sm:$0xff]  ;;  %v3015_v6 = vld [vmem:[#allocation7] ss:$0 sm:$0xff]  ;;  %vm1300_vm4 = vcmask 130048  }
  0xb7   :  { %3230 = vmatmul.mubr.msk.f32.vlgmr.msra.gmra.mrb[0].mxu1 %vm179_vm1, %v4169_v2  ;;  %v490_v19 = vld [vmem:[#allocation12 + $0x8] sm:$0xff]  ;;  %v492_v20 = vld [vmem:[#allocation12 + $0x18] sm:$0xff]  ;;  %v489_v24 = vld [vmem:[#allocation12] sm:$0xff]  ;;  %261 = vmatprep.mubr.f32.mxu0 %v3974_v60 }
  0xb8   :  { %3232 = vmatprep.mubr.msk.f32.mxu1 %vm179_vm1, %v4177_v3  ;;  %v3419_v23 = vpack.c.bf16 %v492_v20, %v490_v19  ;;  %v491_v25 = vld [vmem:[#allocation12 + $0x10] sm:$0xff]  ;;  %v494_v26 = vld [vmem:[#allocation12 + $0x28] sm:$0xff]  ;;  %v496_v27 = vld [vmem:[#allocation12 + $0x38] sm:$0xff] }
  0xb9   :  { %v4203_v28 = vld [vmem:[#allocation2 + $0x48] sm:$0xff]  ;;  %v3421_v29 = vpack.c.bf16 %v491_v25, %v489_v24  ;;  %v3423_v30 = vpack.c.bf16 %v496_v27, %v494_v26  ;;  %v493_v31 = vld [vmem:[#allocation12 + $0x20] sm:$0xff]  ;;  %v498_v34 = vld [vmem:[#allocation12 + $0x48] sm:$0xff] }
  0xba   :  { %v495_v32 = vld [vmem:[#allocation12 + $0x30] sm:$0xff]  ;;  %v4205_v33 = vld [vmem:[#allocation2 + $0x50] sm:$0xff]  ;;  %v4211_v37 = vld [vmem:[#allocation2 + $0x58] sm:$0xff] }
  0xbb   :  { %3233 = vmatmul.mubr.msk.f32.gmra.mrb[2].mxu1 %vm179_vm1, %v4187_v4  ;;  %v500_v35 = vld [vmem:[#allocation12 + $0x58] sm:$0xff]  ;;  %v3425_v36 = vpack.c.bf16 %v495_v32, %v493_v31  ;;  %v497_v39 = vld [vmem:[#allocation12 + $0x40] sm:$0xff]  ;;  %v499_v40 = vld [vmem:[#allocation12 + $0x50] sm:$0xff] }
  0xbc   :  { %3243 = vmatprep.mubr.msk.f32.mxu1 %vm391_vm2, %v4191_v5  ;;  %v3427_v38 = vpack.c.bf16 %v500_v35, %v498_v34  ;;  %v502_v41 = vld [vmem:[#allocation12 + $0x68] sm:$0xff]  ;;  %v504_v42 = vld [vmem:[#allocation12 + $0x78] sm:$0xff]  ;;  %v3429_v43 = vpack.c.bf16 %v499_v40, %v497_v39  ;;  %v501_v45 = vld [vmem:[#allocation12 + $0x60] sm:$0xff] }
  0xbd   :  { %v3431_v44 = vpack.c.bf16 %v504_v42, %v502_v41  ;;  %v503_v46 = vld [vmem:[#allocation12 + $0x70] sm:$0xff]  ;;  %v506_v47 = vld [vmem:[#allocation12 + $0x88] sm:$0xff]  ;;  %v508_v48 = vld [vmem:[#allocation12 + $0x98] sm:$0xff] }
  0xbe   :  { %v3433_v49 = vpack.c.bf16 %v503_v46, %v501_v45  ;;  %v3435_v50 = vpack.c.bf16 %v508_v48, %v506_v47  ;;  %v505_v51 = vld [vmem:[#allocation12 + $0x80] sm:$0xff]  ;;  %v507_v52 = vld [vmem:[#allocation12 + $0x90] sm:$0xff]  ;;  %v510_v53 = vld [vmem:[#allocation12 + $0xa8] sm:$0xff] }
  0xbf   :  { %v512_v54 = vld [vmem:[#allocation12 + $0xb8] sm:$0xff]  ;;  %v3437_v55 = vpack.c.bf16 %v507_v52, %v505_v51  ;;  %v509_v57 = vld [vmem:[#allocation12 + $0xa0] sm:$0xff]  ;;  %v511_v58 = vld [vmem:[#allocation12 + $0xb0] sm:$0xff] }
  0xc0   :  { %v3439_v56 = vpack.c.bf16 %v512_v54, %v510_v53  ;;  %v3441_v59 = vpack.c.bf16 %v511_v58, %v509_v57  ;;  %v164_v61 = vld [vmem:[#allocation4] sm:$0xff]  ;;  %v730_v20 = vld [vmem:[#allocation12 + $0xe0] sm:$0xff]  ;;  %v737_v25 = vld [vmem:[#allocation12 + $0x118] sm:$0xff] }
  0xc1   :  { %v178_v62 = vcombine.high %v164_v61, %v164_v61  ;;  %v735_v24 = vld [vmem:[#allocation12 + $0x108] sm:$0xff]  ;;  %v736_v31 = vld [vmem:[#allocation12 + $0x110] sm:$0xff]  ;;  %v741_v34 = vld [vmem:[#allocation12 + $0x138] sm:$0xff] }
  0xc2   :  { %v4254_v27 = vld [vmem:[#allocation2 + $0x78] sm:$0xff]  ;;  %v740_v39 = vld [vmem:[#allocation12 + $0x130] sm:$0xff]  ;;  %v745_v41 = vld [vmem:[#allocation12 + $0x158] sm:$0xff] }
  0xc3   :  { %3009 = vmatprep.subr.msk.mxu0 %vm192_vm0, %v178_v62  ;;  %v739_v32 = vld [vmem:[#allocation12 + $0x128] sm:$0xff]  ;;  %v744_v45 = vld [vmem:[#allocation12 + $0x150] sm:$0xff]  ;;  %v749_v47 = vld [vmem:[#allocation12 + $0x178] sm:$0xff] }
  0xc4   :  { %3010 = vmatpush1.msk.msra.mxu0 %vm192_vm0, %v164_v61  ;;  %v743_v40 = vld [vmem:[#allocation12 + $0x148] sm:$0xff]  ;;  %v748_v51 = vld [vmem:[#allocation12 + $0x170] sm:$0xff]  ;;  %v965_v54 = vld [vmem:[#allocation12 + $0x198] sm:$0xff] }
  0xc5   :  { %3011 = vmatmul.mubr.msk.f32.vlgmr.msra.gmra.mrb[0].mxu0 %vm179_vm1, %v4164_v1  ;;  %v747_v46 = vld [vmem:[#allocation12 + $0x168] sm:$0xff]  ;;  %v964_v58 = vld [vmem:[#allocation12 + $0x190] sm:$0xff] }
  0xc6   :  { %267 = vmatprep.mubr.f32.mxu0 %v3974_v60  ;;  %v963_v53 = vld [vmem:[#allocation12 + $0x188] sm:$0xff] }
  0xc7   :  { %v3483_v57 = vpack.c.bf16 %v965_v54, %v963_v53  ;;  %v984_v53 = vld [vmem:[#allocation12 + $0x230] sm:$0xff] }
  0xc9   :  { %3012 = vmatmul.mubr.msk.f32.gmra.mrb[2].mxu0 %vm179_vm1, %v4169_v2  ;;  %3484 = vmatprep.subr.bf16.mxu0 %v3483_v57  ;;  %v1297_v57 = vld [vmem:[#allocation13 + $0x8] sm:$0xff] }
  0xca   :  { %273 = vmatprep.mubr.f32.mxu0 %v3974_v60 }
  0xcd   :  { %3013 = vmatmul.mubr.msk.f32.gmra.mrb[4].mxu0 %vm179_vm1, %v4177_v3 }
  0xce   :  { %279 = vmatprep.mubr.f32.mxu0 %v3974_v60 }
  0xd1   :  { %3014 = vmatmul.mubr.msk.f32.gmra.mrb[6].mxu0 %vm179_vm1, %v4187_v4 }
  0xd2   :  { %1062 = vmatprep.mubr.f32.mxu0 %v3974_v60 }
 0x18a   :  { %v3231_v7 = vpop.f32.mrb[0].mxu1 }
 0x18b   :  { %v369_v8 = vadd.f32 %v3231_v7, %v3015_v6  ;;  %v363_v9 = vpop.f32.mrb[1].mxu1  ;;  %v729_v7 = vld [vmem:[#allocation12 + $0xd8] sm:$0xff] }
 0x18c   :  { %v364_v10 = vadd.f32 %v3015_v6, %v363_v9 }
 0x18d   :  { %v383_v11 = vmax.f32 %v369_v8, 0.0 }
 0x18e   :  { %v382_v12 = vmax.f32 %v364_v10, 0.0  ;;  %v3234_v13 = vpop.f32.mrb[2].mxu1 }
 0x18f   :  { %v379_v14 = vadd.f32 %v3234_v13, %v3015_v6  ;;  %v373_v15 = vpop.f32.mrb[3].mxu1  ;;  %v728_v13 = vld [vmem:[#allocation12 + $0xd0] sm:$0xff] }
 0x190   :  { %v4195_v16 = vpack.c.bf16 %v383_v11, %v382_v12  ;;  %v374_v17 = vadd.f32 %v3015_v6, %v373_v15  ;;  %v727_v6 = vld [vmem:[#allocation12 + $0xc8] sm:$0xff]  ;;  %v726_v12 = vld [vmem:[#allocation12 + $0xc0] sm:$0xff]  ;;  %v733_v15 = vld [vmem:[#allocation12 + $0xf8] sm:$0xff] }
 0x191   :  { %v385_v18 = vmax.f32 %v379_v14, 0.0  ;;  %v3451_v9 = vpack.c.bf16 %v729_v7, %v727_v6  ;;  %v4241_v11 = vld [vmem:[#allocation2 + $0x60] sm:$0xff] }
 0x192   :  { %v384_v21 = vmax.f32 %v374_v17, 0.0  ;;  %3412 = vmatprep.subr.bf16.mxu1 %v4195_v16  ;;  %v731_v14 = vld [vmem:[#allocation12 + $0xe8] sm:$0xff]  ;;  %v4246_v17 = vld [vmem:[#allocation2 + $0x68] sm:$0xff] }
 0x193   :  { %3414 = vmatpush3.bf16.msra.mxu1 %v4195_v16  ;;  %v3455_v19 = vpack.c.bf16 %v733_v15, %v731_v14  ;;  %v968_v6 = vld [vmem:[#allocation12 + $0x1b0] sm:$0xff]  ;;  %v1095_v14 = vld [vmem:[#allocation9] sm:$0xf] }
 0x194   :  { %v4199_v22 = vpack.c.bf16 %v385_v18, %v384_v21  ;;  %v3453_v18 = vpack.c.bf16 %v728_v13, %v726_v12  ;;  %v732_v21 = vld [vmem:[#allocation12 + $0xf0] sm:$0xff] }
 0x195   :  { %v3457_v26 = vpack.c.bf16 %v732_v21, %v730_v20  ;;  %v4279_v15 = vld [vmem:[#allocation2 + $0x88] sm:$0xff] }
 0x196   :  { %3416 = vmatprep.subr.bf16.mxu1 %v4199_v22  ;;  %v973_v20 = vld [vmem:[#allocation12 + $0x1d8] sm:$0xff] }
 0x197   :  { %3418 = vmatpush3.bf16.msra.mxu1 %v4199_v22 }
 0x198   :  { %3420 = vmatprep.subr.bf16.mxu1 %v3419_v23  ;;  %v4248_v23 = vld [vmem:[#allocation2 + $0x70] sm:$0xff] }
 0x19a   :  { %3244 = vmatmul.mubr.msk.f32.vlgmr.msra.gmra.mrb[4].mxu1 %vm391_vm2, %v4203_v28 }
 0x19b   :  { %3422 = vmatpush1.bf16.msra.mxu1 %v3421_v29  ;;  %3246 = vmatprep.mubr.msk.f32.mxu1 %vm391_vm2, %v4205_v33  ;;  %v3459_v29 = vpack.c.bf16 %v737_v25, %v735_v24  ;;  %v970_v24 = vld [vmem:[#allocation12 + $0x1c0] sm:$0xff]  ;;  %v972_v25 = vld [vmem:[#allocation12 + $0x1d0] sm:$0xff] }
 0x19c   :  { %3424 = vmatprep.subr.bf16.mxu1 %v3423_v30  ;;  %v734_v30 = vld [vmem:[#allocation12 + $0x100] sm:$0xff] }
 0x19d   :  { %v3461_v35 = vpack.c.bf16 %v736_v31, %v734_v30  ;;  %v975_v31 = vld [vmem:[#allocation12 + $0x1e8] sm:$0xff] }
 0x19e   :  { %3247 = vmatmul.mubr.msk.f32.gmra.mrb[6].mxu1 %vm391_vm2, %v4211_v37 }
 0x19f   :  { %3426 = vmatpush1.bf16.msra.mxu1 %v3425_v36  ;;  %590 = vmatprep.mubr.f32.mxu1 %v3974_v60  ;;  %v3463_v36 = vpack.c.bf16 %v741_v34, %v739_v32  ;;  %v977_v32 = vld [vmem:[#allocation12 + $0x1f8] sm:$0xff] }
 0x1a0   :  { %3428 = vmatprep.subr.bf16.mxu1 %v3427_v38  ;;  %v738_v38 = vld [vmem:[#allocation12 + $0x120] sm:$0xff]  ;;  %v3495_v34 = vpack.c.bf16 %v977_v32, %v975_v31 }
 0x1a1   :  { %v3465_v42 = vpack.c.bf16 %v740_v39, %v738_v38 }
 0x1a3   :  { %3430 = vmatpush1.bf16.msra.mxu1 %v3429_v43  ;;  %v3467_v43 = vpack.c.bf16 %v745_v41, %v743_v40  ;;  %v979_v41 = vld [vmem:[#allocation12 + $0x208] sm:$0xff] }
 0x1a4   :  { %3432 = vmatprep.subr.bf16.mxu1 %v3431_v44  ;;  %v742_v44 = vld [vmem:[#allocation12 + $0x140] sm:$0xff] }
 0x1a5   :  { %v3469_v48 = vpack.c.bf16 %v744_v45, %v742_v44  ;;  %v978_v44 = vld [vmem:[#allocation12 + $0x200] sm:$0xff]  ;;  %v980_v45 = vld [vmem:[#allocation12 + $0x210] sm:$0xff] }
 0x1a7   :  { %3434 = vmatpush1.bf16.msra.mxu1 %v3433_v49  ;;  %v3471_v49 = vpack.c.bf16 %v749_v47, %v747_v46  ;;  %v3501_v47 = vpack.c.bf16 %v980_v45, %v978_v44  ;;  %v1298_v44 = vld [vmem:[#allocation13 + $0x10] sm:$0xff] }
 0x1a8   :  { %3436 = vmatprep.subr.bf16.mxu1 %v3435_v50  ;;  %v746_v50 = vld [vmem:[#allocation12 + $0x160] sm:$0xff] }
 0x1a9   :  { %v3473_v52 = vpack.c.bf16 %v748_v51, %v746_v50  ;;  %v985_v50 = vld [vmem:[#allocation12 + $0x238] sm:$0xff] }
 0x1ab   :  { %3438 = vmatpush1.bf16.msra.mxu1 %v3437_v55  ;;  %v962_v55 = vld [vmem:[#allocation12 + $0x180] sm:$0xff] }
 0x1ac   :  { %3440 = vmatprep.subr.bf16.mxu1 %v3439_v56  ;;  %v4260_v56 = vpop.f32.mrb[0].mxu0  ;;  %v3485_v62 = vpack.c.bf16 %v964_v58, %v962_v55  ;;  %v1195_v55 = vld [vmem:[#allocation2] sm:$0xff]  ;;  %v1299_v58 = vld [vmem:[#allocation13 + $0x18] sm:$0xff] }
 0x1ad   :  { %v4262_v61 = vpop.f32.mrb[1].mxu0 }
 0x1ae   :  { %3486 = vmatpush1.bf16.msra.mxu0 %v3485_v62  ;;  %v167_v62 = vlaneseq }
 0x1af   :  { %3442 = vmatpush1.bf16.msra.mxu1 %v3441_v59  ;;  %v967_v59 = vld [vmem:[#allocation12 + $0x1a8] sm:$0xff] }
 0x1b0   :  { %3444 = vmatprep.subr.bf16.mxu1 %v4195_v16 }
 0x26d   :  { %v3245_v63 = vpop.f32.mrb[4].mxu1 }
 0x26e   :  { %v470_v0 = vpop.f32.mrb[5].mxu1 }
 0x26f   :  { %3025 = vmatmul.mubr.msk.f32.vlgmr.msra.gmra.mrb[8].mxu1 %vm513_vm3, %v470_v0  ;;  %v966_v0 = vld [vmem:[#allocation12 + $0x1a0] sm:$0xff] }
 0x270   :  { %3446 = vmatpush3.bf16.msra.mxu1 %v4195_v16  ;;  %596 = vmatprep.mubr.f32.mxu1 %v3974_v60 }
 0x271   :  { %3448 = vmatprep.subr.bf16.mxu1 %v4199_v22  ;;  %v3248_v8 = vpop.f32.mrb[6].mxu1 }
 0x272   :  { %v480_v10 = vpop.f32.mrb[7].mxu1 }
 0x273   :  { %3026 = vmatmul.mubr.msk.f32.gmra.mrb[10].mxu1 %vm513_vm3, %v3245_v63  ;;  %v969_v63 = vld [vmem:[#allocation12 + $0x1b8] sm:$0xff] }
 0x274   :  { %3450 = vmatpush3.bf16.msra.mxu1 %v4199_v22  ;;  %602 = vmatprep.mubr.f32.mxu1 %v3974_v60  ;;  %v3487_v7 = vpack.c.bf16 %v969_v63, %v967_v59  ;;  %v3515_v59 = vpack.c.bf16 %v1299_v58, %v1297_v57  ;;  %v168_v63 = vshrl.u32 %v167_v62, 7 }
 0x275   :  { %3452 = vmatprep.subr.bf16.mxu1 %v3451_v9 }
 0x276   :  { %3488 = vmatprep.subr.bf16.mxu0 %v3487_v7  ;;  %v173_v7 = vsub.s32 1, %v168_v63 }
 0x277   :  { %3027 = vmatmul.mubr.msk.f32.gmra.mrb[12].mxu1 %vm513_vm3, %v480_v10 }
 0x278   :  { %608 = vmatprep.mubr.f32.mxu1 %v3974_v60 }
 0x27b   :  { %3028 = vmatmul.mubr.msk.f32.gmra.mrb[14].mxu1 %vm513_vm3, %v3248_v8  ;;  %v3489_v8 = vpack.c.bf16 %v968_v6, %v966_v0  ;;  %v169_v0 = vsub.s32 0, %v168_v63  ;;  %v165_v6 = vld [vmem:[#allocation16] sm:$0x3] }
 0x27c   :  { %3257 = vmatprep.mubr.msk.f32.mxu1 %vm391_vm2, %v4241_v11 }
 0x27d   :  { %3490 = vmatpush1.bf16.msra.mxu0 %v3489_v8  ;;  %v170_v8 = vrot.slane %v165_v6, %v169_v0 }
 0x27f   :  { %3258 = vmatmul.mubr.msk.f32.vlgmr.msra.gmra.mrb[16].mxu1 %vm391_vm2, %v4246_v17 }
 0x280   :  { %3454 = vmatpush1.bf16.msra.mxu1 %v3453_v18  ;;  %3260 = vmatprep.mubr.msk.f32.mxu1 %vm391_vm2, %v4248_v23  ;;  %v4281_v18 = vld [vmem:[#allocation2 + $0x90] sm:$0xff] }
 0x281   :  { %3456 = vmatprep.subr.bf16.mxu1 %v3455_v19  ;;  %v971_v19 = vld [vmem:[#allocation12 + $0x1c8] sm:$0xff] }
 0x282   :  { %v3491_v21 = vpack.c.bf16 %v973_v20, %v971_v19 }
 0x283   :  { %3261 = vmatmul.mubr.msk.f32.gmra.mrb[18].mxu1 %vm391_vm2, %v4254_v27 }
 0x284   :  { %3458 = vmatpush1.bf16.msra.mxu1 %v3457_v26  ;;  %826 = vmatprep.mubr.f32.mxu1 %v3974_v60  ;;  %v269_v26 = vpop.f32.mrb[2].mxu0 }
 0x285   :  { %3460 = vmatprep.subr.bf16.mxu1 %v3459_v29  ;;  %v3493_v29 = vpack.c.bf16 %v972_v25, %v970_v24  ;;  %3492 = vmatprep.subr.bf16.mxu0 %v3491_v21  ;;  %v271_v30 = vpop.f32.mrb[3].mxu0  ;;  %v270_v20 = vadd.f32 %v269_v26, %v170_v8 }
 0x286   :  { %v275_v38 = vpop.f32.mrb[4].mxu0 }
 0x287   :  { %3494 = vmatpush1.bf16.msra.mxu0 %v3493_v29  ;;  %v277_v40 = vpop.f32.mrb[5].mxu0  ;;  %v276_v32 = vadd.f32 %v275_v38, %v170_v8 }
 0x288   :  { %3462 = vmatpush1.bf16.msra.mxu1 %v3461_v35  ;;  %v974_v35 = vld [vmem:[#allocation12 + $0x1e0] sm:$0xff]  ;;  %3496 = vmatprep.subr.bf16.mxu0 %v3495_v34  ;;  %v281_v46 = vpop.f32.mrb[6].mxu0 }
 0x289   :  { %3464 = vmatprep.subr.bf16.mxu1 %v3463_v36  ;;  %v976_v36 = vld [vmem:[#allocation12 + $0x1f0] sm:$0xff] }
 0x28a   :  { %v3497_v39 = vpack.c.bf16 %v976_v36, %v974_v35 }
 0x28c   :  { %3466 = vmatpush1.bf16.msra.mxu1 %v3465_v42  ;;  %3498 = vmatpush1.bf16.msra.mxu0 %v3497_v39  ;;  %v981_v42 = vld [vmem:[#allocation12 + $0x218] sm:$0xff]  ;;  %v282_v39 = vadd.f32 %v281_v46, %v170_v8 }
 0x28d   :  { %3468 = vmatprep.subr.bf16.mxu1 %v3467_v43  ;;  %v3499_v43 = vpack.c.bf16 %v981_v42, %v979_v41 }
 0x28f   :  { %3500 = vmatprep.subr.bf16.mxu0 %v3499_v43  ;;  %v1296_v43 = vld [vmem:[#allocation13] sm:$0xff] }
 0x290   :  { %3470 = vmatpush1.bf16.msra.mxu1 %v3469_v48  ;;  %v283_v48 = vpop.f32.mrb[7].mxu0  ;;  %3502 = vmatpush1.bf16.msra.mxu0 %v3501_v47  ;;  %v3517_v38 = vpack.c.bf16 %v1298_v44, %v1296_v43 }
 0x291   :  { %3472 = vmatprep.subr.bf16.mxu1 %v3471_v49  ;;  %v983_v49 = vld [vmem:[#allocation12 + $0x228] sm:$0xff] }
 0x292   :  { %v3503_v51 = vpack.c.bf16 %v985_v50, %v983_v49 }
 0x294   :  { %3474 = vmatpush1.bf16.msra.mxu1 %v3473_v52  ;;  %v982_v52 = vld [vmem:[#allocation12 + $0x220] sm:$0xff]  ;;  %3504 = vmatprep.subr.bf16.mxu0 %v3503_v51 }
 0x295   :  { %3476 = vmatprep.subr.bf16.mxu1 %v4195_v16  ;;  %v3505_v54 = vpack.c.bf16 %v984_v53, %v982_v52 }
 0x297   :  { %3506 = vmatpush1.bf16.msra.mxu0 %v3505_v54 }
 0x298   :  { %3516 = vmatprep.subr.bf16.mxu0 %v3515_v59 }
 0x352   :  { %v3259_v9 = vpop.f32.mrb[16].mxu1 }
 0x353   :  { %v706_v10 = vpop.f32.mrb[17].mxu1 }
 0x354   :  { %3033 = vmatmul.mubr.msk.f32.vlgmr.msra.gmra.mrb[8].mxu1 %vm513_vm3, %v706_v10  ;;  %v264_v10 = vadd.f32 %v4260_v56, %v170_v8 }
 0x355   :  { %3478 = vmatpush3.bf16.msra.mxu1 %v4195_v16  ;;  %832 = vmatprep.mubr.f32.mxu1 %v3974_v60  ;;  %v4274_v16 = vld [vmem:[#allocation2 + $0x80] sm:$0xff] }
 0x356   :  { %3480 = vmatprep.subr.bf16.mxu1 %v4199_v22  ;;  %v3262_v12 = vpop.f32.mrb[18].mxu1 }
 0x357   :  { %v716_v13 = vpop.f32.mrb[19].mxu1 }
 0x358   :  { %3034 = vmatmul.mubr.msk.f32.gmra.mrb[10].mxu1 %vm513_vm3, %v3259_v9  ;;  %v174_v9 = vrot.slane %v165_v6, %v173_v7 }
 0x359   :  { %3482 = vmatpush3.bf16.msra.mxu1 %v4199_v22  ;;  %838 = vmatprep.mubr.f32.mxu1 %v3974_v60  ;;  %v4288_v22 = vld [vmem:[#allocation2 + $0x98] sm:$0xff] }
 0x35a   :  { %3277 = vmatprep.subr.msk.mxu1 %vm192_vm0, %v1095_v14  ;;  %v272_v24 = vadd.f32 %v271_v30, %v174_v9  ;;  %v278_v35 = vadd.f32 %v277_v40, %v174_v9  ;;  %v284_v42 = vadd.f32 %v283_v48, %v174_v9  ;;  %v3045_v48 = vld [vmem:[#allocation10] ss:$0 sm:$0xff] }
 0x35c   :  { %3035 = vmatmul.mubr.msk.f32.gmra.mrb[12].mxu1 %vm513_vm3, %v716_v13 }
 0x35d   :  { %844 = vmatprep.mubr.f32.mxu1 %v3974_v60 }
 0x360   :  { %3036 = vmatmul.mubr.msk.f32.gmra.mrb[14].mxu1 %vm513_vm3, %v3262_v12  ;;  %v266_v12 = vadd.f32 %v4262_v61, %v174_v9  ;;  %v1196_v9 = vld [vmem:[#allocation2 + $0x8] sm:$0xff] }
 0x361   :  { %3271 = vmatprep.mubr.msk.f32.mxu1 %vm391_vm2, %v4274_v16 }
 0x364   :  { %3272 = vmatmul.mubr.msk.f32.vlgmr.msra.gmra.mrb[20].mxu1 %vm391_vm2, %v4279_v15 }
 0x365   :  { %3278 = vmatpush3.msk.msra.mxu1 %vm192_vm0, %v1095_v14  ;;  %3274 = vmatprep.mubr.msk.f32.mxu1 %vm391_vm2, %v4281_v18 }
 0x368   :  { %3275 = vmatmul.mubr.msk.f32.gmra.mrb[22].mxu1 %vm391_vm2, %v4288_v22 }
 0x369   :  { %3279 = vmatprep.mubr.msk.f32.mxu1 %vm179_vm1, %v4164_v1 }
 0x36c   :  { %3280 = vmatmul.mubr.msk.f32.vlgmr.msra.gmra.mrb[24].mxu1 %vm179_vm1, %v4169_v2 }
 0x36d   :  { %3282 = vmatprep.mubr.msk.f32.mxu1 %vm179_vm1, %v4177_v3 }
 0x370   :  { %3283 = vmatmul.mubr.msk.f32.gmra.mrb[26].mxu1 %vm179_vm1, %v4187_v4 }
 0x371   :  { %3293 = vmatprep.mubr.msk.f32.mxu1 %vm391_vm2, %v1195_v55 }
 0x427   :  { %v828_v13 = vpop.f32.mrb[8].mxu1 }
 0x428   :  { %v4303_v14 = vadd.f32 %v828_v13, %v264_v10  ;;  %v830_v19 = vpop.f32.mrb[9].mxu1  ;;  %v1197_v10 = vld [vmem:[#allocation2 + $0x10] sm:$0xff]  ;;  %v1411_v13 = vld [vmem:[#allocation2 + $0x20] sm:$0xff] }
 0x429   :  { %v4305_v21 = vadd.f32 %v830_v19, %v266_v12  ;;  %v1198_v12 = vld [vmem:[#allocation2 + $0x18] sm:$0xff]  ;;  %v1412_v19 = vld [vmem:[#allocation2 + $0x28] sm:$0xff] }
 0x42b   :  { %v834_v25 = vpop.f32.mrb[10].mxu1 }
 0x42c   :  { %v4307_v29 = vadd.f32 %v834_v25, %v270_v20  ;;  %v836_v31 = vpop.f32.mrb[11].mxu1  ;;  %v1413_v20 = vld [vmem:[#allocation2 + $0x30] sm:$0xff]  ;;  %v2659_v25 = vld [vmem:[#allocation2 + $0xf8] sm:$0xff] }
 0x42d   :  { %v4309_v34 = vadd.f32 %v836_v31, %v272_v24  ;;  %v1414_v24 = vld [vmem:[#allocation2 + $0x38] sm:$0xff]  ;;  %v2764_v31 = vld [vmem:[#allocation2 + $0x110] sm:$0xff] }
 0x42f   :  { %v840_v36 = vpop.f32.mrb[12].mxu1 }
 0x430   :  { %v4311_v56 = vadd.f32 %v840_v36, %v276_v32  ;;  %v842_v61 = vpop.f32.mrb[13].mxu1  ;;  %v2765_v32 = vld [vmem:[#allocation2 + $0x118] sm:$0xff]  ;;  %v1515_v36 = vld [vmem:[#allocation13 + $0x30] sm:$0xff] }
 0x431   :  { %v4313_v41 = vadd.f32 %v842_v61, %v278_v35  ;;  %v1513_v35 = vld [vmem:[#allocation13 + $0x20] sm:$0xff]  ;;  %v1713_v61 = vld [vmem:[#allocation13 + $0x48] sm:$0xff] }
 0x433   :  { %v846_v26 = vpop.f32.mrb[14].mxu1 }
 0x434   :  { %v4315_v30 = vadd.f32 %v846_v26, %v282_v39  ;;  %v848_v45 = vpop.f32.mrb[15].mxu1  ;;  %v1715_v39 = vld [vmem:[#allocation13 + $0x58] sm:$0xff] }
 0x435   :  { %v4317_v47 = vadd.f32 %v848_v45, %v284_v42  ;;  %v3529_v42 = vpack.c.bf16 %v1515_v36, %v1513_v35  ;;  %v3539_v43 = vpack.c.bf16 %v1715_v39, %v1713_v61  ;;  %v2328_v35 = vld [vmem:[#allocation13 + $0xb0] sm:$0xff]  ;;  %v2543_v36 = vld [vmem:[#allocation13 + $0xc8] sm:$0xff]  ;;  %v2545_v61 = vld [vmem:[#allocation13 + $0xd8] sm:$0xff] }
 0x437   :  { %v3273_v49 = vpop.f32.mrb[20].mxu1 }
 0x438   :  { %v942_v50 = vpop.f32.mrb[21].mxu1 }
 0x439   :  { %3041 = vmatmul.mubr.msk.f32.vlgmr.msra.gmra.mrb[8].mxu0 %vm513_vm3, %v942_v50 }
 0x43a   :  { %1068 = vmatprep.mubr.f32.mxu0 %v3974_v60  ;;  %3518 = vmatpush1.bf16.msra.mxu0 %v3517_v38 }
 0x43b   :  { %v3276_v40 = vpop.f32.mrb[22].mxu1 }
 0x43c   :  { %v952_v46 = vpop.f32.mrb[23].mxu1 }
 0x43d   :  { %3042 = vmatmul.mubr.msk.f32.gmra.mrb[10].mxu0 %vm513_vm3, %v3273_v49 }
 0x43e   :  { %1074 = vmatprep.mubr.f32.mxu0 %v3974_v60 }
 0x43f   :  { %v3281_v51 = vpop.f32.mrb[24].mxu1 }
 0x440   :  { %v1178_v52 = vadd.f32 %v3281_v51, %v3045_v48  ;;  %v1172_v53 = vpop.f32.mrb[25].mxu1 }
 0x441   :  { %v1173_v54 = vadd.f32 %v3045_v48, %v1172_v53  ;;  %3043 = vmatmul.mubr.msk.f32.gmra.mrb[12].mxu0 %vm513_vm3, %v952_v46  ;;  %v1714_v46 = vld [vmem:[#allocation13 + $0x50] sm:$0xff]  ;;  %v1914_v53 = vld [vmem:[#allocation13 + $0x78] sm:$0xff] }
 0x442   :  { %v1192_v55 = vmax.f32 %v1178_v52, 0.0  ;;  %1080 = vmatprep.mubr.f32.mxu0 %v3974_v60  ;;  %v1912_v52 = vld [vmem:[#allocation13 + $0x68] sm:$0xff] }
 0x443   :  { %v1191_v57 = vmax.f32 %v1173_v54, 0.0  ;;  %v3284_v58 = vpop.f32.mrb[26].mxu1 }
 0x444   :  { %v1188_v59 = vadd.f32 %v3284_v58, %v3045_v48  ;;  %v1182_v62 = vpop.f32.mrb[27].mxu1 }
 0x445   :  { %v4325_v63 = vpack.c.bf16 %v1192_v55, %v1191_v57  ;;  %v1183_v0 = vadd.f32 %v3045_v48, %v1182_v62  ;;  %3044 = vmatmul.mubr.msk.f32.gmra.mrb[14].mxu0 %vm513_vm3, %v3276_v40  ;;  %v1712_v40 = vld [vmem:[#allocation13 + $0x40] sm:$0xff]  ;;  %v3551_v57 = vpack.c.bf16 %v1914_v53, %v1912_v52 }
 0x446   :  { %v1194_v6 = vmax.f32 %v1188_v59, 0.0  ;;  %1377 = vmatprep.mubr.f32.mxu0 %v3974_v60  ;;  %v3541_v54 = vpack.c.bf16 %v1714_v46, %v1712_v40  ;;  %v3725_v52 = vld [vmem:[%s4519_s0 + $0x10] sm:$0xff] }
 0x447   :  { %v1193_v7 = vmax.f32 %v1183_v0, 0.0  ;;  %3508 = vmatprep.subr.bf16.mxu1 %v4325_v63 }
 0x448   :  { %3510 = vmatpush3.bf16.msra.mxu1 %v4325_v63 }
 0x449   :  { %v3511_v8 = vpack.c.bf16 %v1194_v6, %v1193_v7  ;;  %v1911_v6 = vld [vmem:[#allocation13 + $0x60] sm:$0xff]  ;;  %v1913_v7 = vld [vmem:[#allocation13 + $0x70] sm:$0xff] }
 0x44b   :  { %3512 = vmatprep.subr.bf16.mxu1 %v3511_v8 }
 0x44c   :  { %3514 = vmatpush3.bf16.msra.mxu1 %v3511_v8 }
 0x44d   :  { %3520 = vmatprep.subr.bf16.mxu1 %v4325_v63 }
 0x44f   :  { %3294 = vmatmul.mubr.msk.f32.vlgmr.msra.gmra.mrb[28].mxu1 %vm391_vm2, %v1196_v9  ;;  %v2111_v9 = vld [vmem:[#allocation13 + $0x88] sm:$0xff] }
 0x450   :  { %3522 = vmatpush3.bf16.msra.mxu1 %v4325_v63  ;;  %3296 = vmatprep.mubr.msk.f32.mxu1 %vm391_vm2, %v1197_v10  ;;  %v2113_v10 = vld [vmem:[#allocation13 + $0x98] sm:$0xff] }
 0x451   :  { %3524 = vmatprep.subr.bf16.mxu1 %v3511_v8 }
 0x453   :  { %3297 = vmatmul.mubr.msk.f32.gmra.mrb[30].mxu1 %vm391_vm2, %v1198_v12 }
 0x454   :  { %3526 = vmatpush3.bf16.msra.mxu1 %v3511_v8  ;;  %3307 = vmatprep.mubr.msk.f32.mxu1 %vm391_vm2, %v1411_v13  ;;  %v3553_v13 = vpack.c.bf16 %v1913_v7, %v1911_v6 }
 0x455   :  { %3532 = vmatprep.subr.bf16.mxu1 %v4325_v63 }
 0x457   :  { %3308 = vmatmul.mubr.msk.f32.vlgmr.msra.gmra.mrb[32].mxu1 %vm391_vm2, %v1412_v19  ;;  %v3563_v19 = vpack.c.bf16 %v2113_v10, %v2111_v9 }
 0x458   :  { %3534 = vmatpush3.bf16.msra.mxu1 %v4325_v63  ;;  %3310 = vmatprep.mubr.msk.f32.mxu1 %vm391_vm2, %v1413_v20 }
 0x459   :  { %3536 = vmatprep.subr.bf16.mxu1 %v3511_v8 }
 0x45b   :  { %3311 = vmatmul.mubr.msk.f32.gmra.mrb[34].mxu1 %vm391_vm2, %v1414_v24 }
 0x45c   :  { %3538 = vmatpush3.bf16.msra.mxu1 %v3511_v8  ;;  %3321 = vmatprep.mubr.msk.f32.mxu1 %vm391_vm2, %v4191_v5  ;;  %v2224_v5 = vld [vmem:[#allocation2 + $0xa0] sm:$0xff] }
 0x45d   :  { %3544 = vmatprep.subr.bf16.mxu1 %v4325_v63 }
 0x45f   :  { %3322 = vmatmul.mubr.msk.f32.vlgmr.msra.gmra.mrb[36].mxu1 %vm391_vm2, %v4203_v28  ;;  %v2225_v28 = vld [vmem:[#allocation2 + $0xa8] sm:$0xff] }
 0x460   :  { %3546 = vmatpush3.bf16.msra.mxu1 %v4325_v63  ;;  %3324 = vmatprep.mubr.msk.f32.mxu1 %vm391_vm2, %v4205_v33  ;;  %v2226_v33 = vld [vmem:[#allocation2 + $0xb0] sm:$0xff] }
 0x461   :  { %3548 = vmatprep.subr.bf16.mxu1 %v3511_v8 }
 0x463   :  { %3325 = vmatmul.mubr.msk.f32.gmra.mrb[38].mxu1 %vm391_vm2, %v4211_v37  ;;  %v2227_v37 = vld [vmem:[#allocation2 + $0xb8] sm:$0xff] }
 0x464   :  { %3550 = vmatpush3.bf16.msra.mxu1 %v3511_v8  ;;  %3335 = vmatprep.mubr.msk.f32.mxu1 %vm391_vm2, %v4241_v11  ;;  %v4379_v11 = vpack.c.bf16 %v4169_v2, %v4164_v1  ;;  %v2443_v1 = vld [vmem:[#allocation2 + $0xd8] sm:$0xff] }
 0x465   :  { %3556 = vmatprep.subr.bf16.mxu1 %v4325_v63  ;;  %v1514_v2 = vld [vmem:[#allocation13 + $0x28] sm:$0xff] }
 0x467   :  { %3336 = vmatmul.mubr.msk.f32.vlgmr.msra.gmra.mrb[40].mxu1 %vm391_vm2, %v4246_v17  ;;  %v2440_v17 = vld [vmem:[#allocation2 + $0xc0] sm:$0xff] }
 0x468   :  { %3558 = vmatpush3.bf16.msra.mxu1 %v4325_v63  ;;  %3338 = vmatprep.mubr.msk.f32.mxu1 %vm391_vm2, %v4248_v23  ;;  %v2441_v23 = vld [vmem:[#allocation2 + $0xc8] sm:$0xff] }
 0x469   :  { %3560 = vmatprep.subr.bf16.mxu1 %v3511_v8 }
 0x46b   :  { %3339 = vmatmul.mubr.msk.f32.gmra.mrb[42].mxu1 %vm391_vm2, %v4254_v27  ;;  %v4385_v27 = vpack.c.bf16 %v4187_v4, %v4177_v3  ;;  %v1516_v3 = vld [vmem:[#allocation13 + $0x38] sm:$0xff] }
 0x46c   :  { %3562 = vmatpush3.bf16.msra.mxu1 %v3511_v8  ;;  %3349 = vmatprep.mubr.msk.f32.mxu1 %vm391_vm2, %v4274_v16  ;;  %v2442_v16 = vld [vmem:[#allocation2 + $0xd0] sm:$0xff]  ;;  %v3527_v4 = vpack.c.bf16 %v1516_v3, %v1514_v2 }
 0x46d   :  { %3568 = vmatprep.subr.bf16.mxu1 %v4325_v63  ;;  %v2329_v2 = vld [vmem:[#allocation13 + $0xb8] sm:$0xff] }
 0x46e   :  { %3528 = vmatprep.subr.bf16.mxu0 %v3527_v4 }
 0x46f   :  { %3350 = vmatmul.mubr.msk.f32.vlgmr.msra.gmra.mrb[44].mxu1 %vm391_vm2, %v4279_v15  ;;  %v2656_v15 = vld [vmem:[#allocation2 + $0xe0] sm:$0xff] }
 0x470   :  { %3570 = vmatpush3.bf16.msra.mxu1 %v4325_v63  ;;  %3352 = vmatprep.mubr.msk.f32.mxu1 %vm391_vm2, %v4281_v18  ;;  %v2657_v18 = vld [vmem:[#allocation2 + $0xe8] sm:$0xff] }
 0x471   :  { %3572 = vmatprep.subr.bf16.mxu1 %v3511_v8 }
 0x473   :  { %3353 = vmatmul.mubr.msk.f32.gmra.mrb[46].mxu1 %vm391_vm2, %v4288_v22  ;;  %v2658_v22 = vld [vmem:[#allocation2 + $0xf0] sm:$0xff] }
 0x474   :  { %3574 = vmatpush3.bf16.msra.mxu1 %v3511_v8  ;;  %3363 = vmatprep.mubr.msk.f32.mxu1 %vm391_vm2, %v2224_v5 }
 0x475   :  { %3580 = vmatprep.subr.bf16.mxu1 %v4325_v63 }
 0x477   :  { %3364 = vmatmul.mubr.msk.f32.vlgmr.msra.gmra.mrb[48].mxu1 %vm391_vm2, %v2225_v28 }
 0x478   :  { %3582 = vmatpush3.bf16.msra.mxu1 %v4325_v63  ;;  %3366 = vmatprep.mubr.msk.f32.mxu1 %vm391_vm2, %v2226_v33 }
 0x479   :  { %3584 = vmatprep.subr.bf16.mxu1 %v3511_v8 }
 0x47b   :  { %3367 = vmatmul.mubr.msk.f32.gmra.mrb[50].mxu1 %vm391_vm2, %v2227_v37 }
 0x47c   :  { %3586 = vmatpush3.bf16.msra.mxu1 %v3511_v8  ;;  %3377 = vmatprep.mubr.msk.f32.mxu1 %vm391_vm2, %v2440_v17  ;;  %v2110_v17 = vld [vmem:[#allocation13 + $0x80] sm:$0xff] }
 0x47d   :  { %3592 = vmatprep.subr.bf16.mxu1 %v4379_v11 }
 0x47f   :  { %3378 = vmatmul.mubr.msk.f32.vlgmr.msra.gmra.mrb[52].mxu1 %vm391_vm2, %v2441_v23  ;;  %v2112_v23 = vld [vmem:[#allocation13 + $0x90] sm:$0xff] }
 0x480   :  { %3380 = vmatprep.mubr.msk.f32.mxu1 %vm391_vm2, %v2442_v16  ;;  %3594 = vmatpush3.bf16.msra.mxu1 %v4379_v11  ;;  %v3565_v4 = vpack.c.bf16 %v2112_v23, %v2110_v17 }
 0x481   :  { %3596 = vmatprep.subr.bf16.mxu1 %v4385_v27 }
 0x483   :  { %3381 = vmatmul.mubr.msk.f32.gmra.mrb[54].mxu1 %vm391_vm2, %v2443_v1  ;;  %v2327_v1 = vld [vmem:[#allocation13 + $0xa8] sm:$0xff] }
 0x484   :  { %3598 = vmatpush3.bf16.msra.mxu1 %v4385_v27  ;;  %3391 = vmatprep.mubr.msk.f32.mxu1 %vm391_vm2, %v2656_v15  ;;  %v3575_v15 = vpack.c.bf16 %v2329_v2, %v2327_v1 }
 0x485   :  { %3607 = vmatprep.subr.bf16.mxu1 %v4379_v11 }
 0x487   :  { %3392 = vmatmul.mubr.msk.f32.vlgmr.msra.gmra.mrb[56].mxu1 %vm391_vm2, %v2657_v18 }
 0x488   :  { %3609 = vmatpush3.bf16.msra.mxu1 %v4379_v11  ;;  %3394 = vmatprep.mubr.msk.f32.mxu1 %vm391_vm2, %v2658_v22 }
 0x489   :  { %3608 = vmatprep.subr.bf16.mxu1 %v4385_v27 }
 0x48b   :  { %3395 = vmatmul.mubr.msk.f32.gmra.mrb[58].mxu1 %vm391_vm2, %v2659_v25 }
 0x48c   :  { %3610 = vmatpush3.bf16.msra.mxu1 %v4385_v27  ;;  %3408 = vmatprep.mubr.msk.f32.mxu1 %vm391_vm2, %v2764_v31 }
 0x48f   :  { %3409 = vmatmul.mubr.msk.f32.vlgmr.msra.gmra.mrb[60].mxu1 %vm391_vm2, %v2765_v32  ;;  %v2326_v32 = vld [vmem:[#allocation13 + $0xa0] sm:$0xff] }
 0x490   :  { %v3577_v39 = vpack.c.bf16 %v2328_v35, %v2326_v32 }
 0x522   :  { %v3295_v26 = vpop.f32.mrb[28].mxu1 }
 0x523   :  { %v1277_v44 = vpop.f32.mrb[29].mxu1 }
 0x524   :  { %3055 = vmatmul.mubr.msk.f32.vlgmr.msra.gmra.mrb[8].mxu0 %vm1300_vm4, %v1277_v44 }
 0x525   :  { %3530 = vmatpush1.bf16.msra.mxu0 %v3529_v42  ;;  %1383 = vmatprep.mubr.f32.mxu0 %v3974_v60  ;;  %v3587_v42 = vpack.c.bf16 %v2545_v61, %v2543_v36 }
 0x526   :  { %v3298_v45 = vpop.f32.mrb[30].mxu1  ;;  %3540 = vmatprep.subr.bf16.mxu0 %v3539_v43  ;;  %v2544_v43 = vld [vmem:[#allocation13 + $0xd0] sm:$0xff] }
 0x527   :  { %v1287_v38 = vpop.f32.mrb[31].mxu1 }
 0x528   :  { %3056 = vmatmul.mubr.msk.f32.gmra.mrb[10].mxu0 %vm1300_vm4, %v3295_v26  ;;  %v2542_v26 = vld [vmem:[#allocation13 + $0xc0] sm:$0xff] }
 0x529   :  { %1389 = vmatprep.mubr.f32.mxu0 %v3974_v60  ;;  %v3589_v44 = vpack.c.bf16 %v2544_v43, %v2542_v26 }
 0x52a   :  { %v3309_v49 = vpop.f32.mrb[32].mxu1 }
 0x52b   :  { %v1493_v50 = vpop.f32.mrb[33].mxu1 }
 0x52c   :  { %3057 = vmatmul.mubr.msk.f32.gmra.mrb[12].mxu0 %vm1300_vm4, %v1287_v38 }
 0x52d   :  { %1395 = vmatprep.mubr.f32.mxu0 %v3974_v60 }
 0x52e   :  { %v3312_v48 = vpop.f32.mrb[34].mxu1 }
 0x52f   :  { %v1503_v51 = vpop.f32.mrb[35].mxu1 }
 0x530   :  { %3058 = vmatmul.mubr.msk.f32.gmra.mrb[14].mxu0 %vm1300_vm4, %v3298_v45  ;;  %v2762_v45 = vld [vmem:[#allocation2 + $0x100] sm:$0xff] }
 0x531   :  { %1593 = vmatprep.mubr.f32.mxu0 %v3974_v60 }
 0x532   :  { %v3323_v55 = vpop.f32.mrb[36].mxu1 }
 0x533   :  { %v1692_v58 = vpop.f32.mrb[37].mxu1 }
 0x534   :  { %3063 = vmatmul.mubr.msk.f32.vlgmr.msra.gmra.mrb[8].mxu0 %vm1300_vm4, %v1493_v50  ;;  %v2867_v50 = vld [vmem:[#allocation15] sm:$0xff] }
 0x535   :  { %3542 = vmatpush1.bf16.msra.mxu0 %v3541_v54  ;;  %1599 = vmatprep.mubr.f32.mxu0 %v3974_v60  ;;  %v2869_v40 = vcombine.high %v2867_v50, %v2867_v50 }
 0x536   :  { %3552 = vmatprep.subr.bf16.mxu0 %v3551_v57  ;;  %v3326_v59 = vpop.f32.mrb[38].mxu1 }
 0x537   :  { %v1702_v62 = vpop.f32.mrb[39].mxu1 }
 0x538   :  { %3064 = vmatmul.mubr.msk.f32.gmra.mrb[10].mxu0 %vm1300_vm4, %v3309_v49 }
 0x539   :  { %1605 = vmatprep.mubr.f32.mxu0 %v3974_v60 }
 0x53a   :  { %v3337_v63 = vpop.f32.mrb[40].mxu1 }
 0x53b   :  { %v1891_v0 = vpop.f32.mrb[41].mxu1 }
 0x53c   :  { %3065 = vmatmul.mubr.msk.f32.gmra.mrb[12].mxu0 %vm1300_vm4, %v1503_v51 }
 0x53d   :  { %1611 = vmatprep.mubr.f32.mxu0 %v3974_v60 }
 0x53e   :  { %v3340_v8 = vpop.f32.mrb[42].mxu1 }
 0x53f   :  { %v1901_v12 = vpop.f32.mrb[43].mxu1 }
 0x540   :  { %3066 = vmatmul.mubr.msk.f32.gmra.mrb[14].mxu0 %vm1300_vm4, %v3312_v48 }
 0x541   :  { %1792 = vmatprep.mubr.f32.mxu0 %v3974_v60 }
 0x542   :  { %v3351_v20 = vpop.f32.mrb[44].mxu1 }
 0x543   :  { %v2090_v24 = vpop.f32.mrb[45].mxu1 }
 0x544   :  { %3071 = vmatmul.mubr.msk.f32.vlgmr.msra.gmra.mrb[8].mxu0 %vm1300_vm4, %v1692_v58 }
 0x545   :  { %3554 = vmatpush1.bf16.msra.mxu0 %v3553_v13  ;;  %1798 = vmatprep.mubr.f32.mxu0 %v3974_v60 }
 0x546   :  { %3564 = vmatprep.subr.bf16.mxu0 %v3563_v19  ;;  %v3354_v5 = vpop.f32.mrb[46].mxu1 }
 0x547   :  { %v2100_v28 = vpop.f32.mrb[47].mxu1 }
 0x548   :  { %3072 = vmatmul.mubr.msk.f32.gmra.mrb[10].mxu0 %vm1300_vm4, %v3323_v55 }
 0x549   :  { %1804 = vmatprep.mubr.f32.mxu0 %v3974_v60 }
 0x54a   :  { %v3365_v33 = vpop.f32.mrb[48].mxu1 }
 0x54b   :  { %v2306_v37 = vpop.f32.mrb[49].mxu1 }
 0x54c   :  { %3073 = vmatmul.mubr.msk.f32.gmra.mrb[12].mxu0 %vm1300_vm4, %v1702_v62 }
 0x54d   :  { %1810 = vmatprep.mubr.f32.mxu0 %v3974_v60 }
 0x54e   :  { %v3368_v16 = vpop.f32.mrb[50].mxu1 }
 0x54f   :  { %v2316_v3 = vpop.f32.mrb[51].mxu1 }
 0x550   :  { %3074 = vmatmul.mubr.msk.f32.gmra.mrb[14].mxu0 %vm1300_vm4, %v3326_v59  ;;  %v3726_v59 = vld [vmem:[%s4519_s0 + $0x8] sm:$0xff] }
 0x551   :  { %1991 = vmatprep.mubr.f32.mxu0 %v3974_v60 }
 0x552   :  { %v3379_v18 = vpop.f32.mrb[52].mxu1 }
 0x553   :  { %v2522_v22 = vpop.f32.mrb[53].mxu1 }
 0x554   :  { %3079 = vmatmul.mubr.msk.f32.vlgmr.msra.gmra.mrb[8].mxu0 %vm1300_vm4, %v1891_v0 }
 0x555   :  { %3566 = vmatpush1.bf16.msra.mxu0 %v3565_v4  ;;  %1997 = vmatprep.mubr.f32.mxu0 %v3974_v60 }
 0x556   :  { %3576 = vmatprep.subr.bf16.mxu0 %v3575_v15  ;;  %v3382_v25 = vpop.f32.mrb[54].mxu1 }
 0x557   :  { %v2532_v31 = vpop.f32.mrb[55].mxu1 }
 0x558   :  { %3080 = vmatmul.mubr.msk.f32.gmra.mrb[10].mxu0 %vm1300_vm4, %v3337_v63  ;;  %v3727_v63 = vld [vmem:[%s4519_s0] sm:$0xff] }
 0x559   :  { %2003 = vmatprep.mubr.f32.mxu0 %v3974_v60 }
 0x55a   :  { %v3393_v38 = vpop.f32.mrb[56].mxu1 }
 0x55b   :  { %v2738_v49 = vpop.f32.mrb[57].mxu1  ;;  %v2758_v62 = vmax.f32 %v3726_v59, %v3393_v38 }
 0x55c   :  { %3081 = vmatmul.mubr.msk.f32.gmra.mrb[12].mxu0 %vm1300_vm4, %v1901_v12  ;;  %v2757_v0 = vmax.f32 %v3727_v63, %v2738_v49 }
 0x55d   :  { %2009 = vmatprep.mubr.f32.mxu0 %v3974_v60 }
 0x55e   :  { %v3396_v46 = vpop.f32.mrb[58].mxu1 }
 0x55f   :  { %v2748_v51 = vpop.f32.mrb[59].mxu1 }
 0x560   :  { %3082 = vmatmul.mubr.msk.f32.gmra.mrb[14].mxu0 %vm1300_vm4, %v3340_v8  ;;  %v2759_v53 = vmax.f32 %v3725_v52, %v2748_v51 }
 0x561   :  { %2190 = vmatprep.mubr.f32.mxu0 %v3974_v60 }
 0x562   :  { %v3410_v54 = vpop.f32.mrb[60].mxu1 }
 0x563   :  { %v2854_v57 = vpop.f32.mrb[61].mxu1 }
 0x564   :  { %3087 = vmatmul.mubr.msk.f32.vlgmr.msra.gmra.mrb[8].mxu0 %vm1300_vm4, %v2090_v24  ;;  %v2865_v58 = vmax.f32 %v2759_v53, %v2854_v57 }
 0x565   :  { %3578 = vmatpush1.bf16.msra.mxu0 %v3577_v39  ;;  %2196 = vmatprep.mubr.f32.mxu0 %v3974_v60 }
 0x566   :  { %3588 = vmatprep.subr.bf16.mxu0 %v3587_v42 }
 0x568   :  { %3088 = vmatmul.mubr.msk.f32.gmra.mrb[10].mxu0 %vm1300_vm4, %v3351_v20 }
 0x569   :  { %2202 = vmatprep.mubr.f32.mxu0 %v3974_v60 }
 0x56c   :  { %3089 = vmatmul.mubr.msk.f32.gmra.mrb[12].mxu0 %vm1300_vm4, %v2100_v28 }
 0x56d   :  { %2208 = vmatprep.mubr.f32.mxu0 %v3974_v60 }
 0x570   :  { %3090 = vmatmul.mubr.msk.f32.gmra.mrb[14].mxu0 %vm1300_vm4, %v3354_v5 }
 0x571   :  { %2406 = vmatprep.mubr.f32.mxu0 %v3974_v60 }
 0x574   :  { %3095 = vmatmul.mubr.msk.f32.vlgmr.msra.gmra.mrb[8].mxu0 %vm1300_vm4, %v2306_v37 }
 0x575   :  { %3590 = vmatpush1.bf16.msra.mxu0 %v3589_v44  ;;  %2412 = vmatprep.mubr.f32.mxu0 %v3974_v60 }
 0x576   :  { %3600 = vmatprep.subr.bf16.mxu0 %v4379_v11 }
 0x578   :  { %3096 = vmatmul.mubr.msk.f32.gmra.mrb[10].mxu0 %vm1300_vm4, %v3365_v33 }
 0x579   :  { %2418 = vmatprep.mubr.f32.mxu0 %v3974_v60 }
 0x57c   :  { %3097 = vmatmul.mubr.msk.f32.gmra.mrb[12].mxu0 %vm1300_vm4, %v2316_v3 }
 0x57d   :  { %2424 = vmatprep.mubr.f32.mxu0 %v3974_v60 }
 0x580   :  { %3098 = vmatmul.mubr.msk.f32.gmra.mrb[14].mxu0 %vm1300_vm4, %v3368_v16 }
 0x581   :  { %2622 = vmatprep.mubr.f32.mxu0 %v3974_v60 }
 0x584   :  { %3103 = vmatmul.mubr.msk.f32.vlgmr.msra.gmra.mrb[8].mxu0 %vm1300_vm4, %v2522_v22 }
 0x585   :  { %3602 = vmatpush3.bf16.msra.mxu0 %v4379_v11  ;;  %2628 = vmatprep.mubr.f32.mxu0 %v3974_v60  ;;  %v2763_v11 = vld [vmem:[#allocation2 + $0x108] sm:$0xff] }
 0x586   :  { %3604 = vmatprep.subr.bf16.mxu0 %v4385_v27 }
 0x588   :  { %3104 = vmatmul.mubr.msk.f32.gmra.mrb[10].mxu0 %vm1300_vm4, %v3379_v18 }
 0x589   :  { %2634 = vmatprep.mubr.f32.mxu0 %v3974_v60  ;;  %3606 = vmatpush3.bf16.msra.mxu0 %v4385_v27  ;;  %v3724_v27 = vld [vmem:[%s4519_s0 + $0x18] sm:$0xff] }
 0x58a   :  { %3115 = vmatprep.subr.msk.mxu0 %vm192_vm0, %v2869_v40  ;;  %v2760_v48 = vmax.f32 %v3724_v27, %v3396_v46 }
 0x58c   :  { %3105 = vmatmul.mubr.msk.f32.gmra.mrb[12].mxu0 %vm1300_vm4, %v2532_v31  ;;  %v2866_v55 = vmax.f32 %v2760_v48, %v3410_v54 }
 0x58d   :  { %2640 = vmatprep.mubr.f32.mxu0 %v3974_v60 }
 0x590   :  { %3106 = vmatmul.mubr.msk.f32.gmra.mrb[14].mxu0 %vm1300_vm4, %v3382_v25 }
 0x591   :  { %3405 = vmatprep.mubr.msk.f32.mxu0 %vm391_vm2, %v2762_v45 }
 0x594   :  { %3406 = vmatmul.mubr.msk.f32.vlgmr.msra.gmra.mrb[16].mxu0 %vm391_vm2, %v2763_v11 }
 0x595   :  { %2950 = vmatprep.mubr.f32.mxu0 %v3974_v60  ;;  %3116 = vmatpush1.msk.msra.mxu0 %vm192_vm0, %v2867_v50 }
 0x667   :  { %v3407_v6 = vpop.f32.mrb[16].mxu0 }
 0x668   :  { %v2864_v7 = vmax.f32 %v2758_v62, %v3407_v6  ;;  %v2844_v8 = vpop.f32.mrb[17].mxu0 }
 0x669   :  { %v2863_v9 = vmax.f32 %v2757_v0, %v2844_v8 }
 0x66b   :  { %3117 = vmatmul.mubr.msk.f32.vlgmr.msra.gmra.mrb[8].mxu0 %vm179_vm1, %v2863_v9 }
 0x66c   :  { %2956 = vmatprep.mubr.f32.mxu0 %v3974_v60 }
 0x66f   :  { %3118 = vmatmul.mubr.msk.f32.gmra.mrb[10].mxu0 %vm179_vm1, %v2864_v7 }
 0x670   :  { %2962 = vmatprep.mubr.f32.mxu0 %v3974_v60 }
 0x673   :  { %3119 = vmatmul.mubr.msk.f32.gmra.mrb[12].mxu0 %vm179_vm1, %v2865_v58 }
 0x674   :  { %2968 = vmatprep.mubr.f32.mxu0 %v3974_v60 }
 0x677   :  { %3120 = vmatmul.mubr.msk.f32.gmra.mrb[14].mxu0 %vm179_vm1, %v2866_v55 }
 0x73e   :  { %v2952_v10 = vpop.f32.mrb[8].mxu0 }
 0x73f   :  { %v3613_v12 = vadd.f32 %v4303_v14, %v2952_v10  ;;  %v2954_v13 = vpop.f32.mrb[9].mxu0 }
 0x740   :  { %v3616_v19 = vadd.f32 %v4305_v21, %v2954_v13 }
 0x741   :  { %v2983_v20 = vmax.f32 %v3613_v12, 0.0 }
 0x742   :  { %v2984_v24 = vmax.f32 %v3616_v19, 0.0  ;;  %v2958_v5 = vpop.f32.mrb[10].mxu0 }
 0x743   :  { %2991 = vst [vmem:[%s4530_s11] sm:$0xff] %v2983_v20  ;;  %v3619_v28 = vadd.f32 %v4307_v29, %v2958_v5  ;;  %v2960_v33 = vpop.f32.mrb[11].mxu0 }
 0x744   :  { %2992 = vst [vmem:[%s4530_s11 + $0x8] sm:$0xff] %v2984_v24  ;;  %v3622_v60 = vadd.f32 %v4309_v34, %v2960_v33 }
 0x745   :  { %v2985_v14 = vmax.f32 %v3619_v28, 0.0 }
 0x746   :  { %v2986_v37 = vmax.f32 %v3622_v60, 0.0  ;;  %v2964_v17 = vpop.f32.mrb[12].mxu0 }
 0x747   :  { %2993 = vst [vmem:[%s4530_s11 + $0x10] sm:$0xff] %v2985_v14  ;;  %v3625_v21 = vadd.f32 %v4311_v56, %v2964_v17  ;;  %v2966_v23 = vpop.f32.mrb[13].mxu0 }
 0x748   :  { %2994 = vst [vmem:[%s4530_s11 + $0x18] sm:$0xff] %v2986_v37  ;;  %v3628_v29 = vadd.f32 %v4313_v41, %v2966_v23 }
 0x749   :  { %v2987_v16 = vmax.f32 %v3625_v21, 0.0 }
 0x74a   :  { %v2988_v1 = vmax.f32 %v3628_v29, 0.0  ;;  %v2970_v2 = vpop.f32.mrb[14].mxu0 }
 0x74b   :  { %2995 = vst [vmem:[%s4530_s11 + $0x20] sm:$0xff] %v2987_v16  ;;  %v3631_v34 = vadd.f32 %v4315_v30, %v2970_v2  ;;  %v2972_v3 = vpop.f32.mrb[15].mxu0 }
 0x74c   :  { %2996 = vst [vmem:[%s4530_s11 + $0x28] sm:$0xff] %v2988_v1  ;;  %v3634_v56 = vadd.f32 %v4317_v47, %v2972_v3 }
 0x74d   :  { %v2989_v4 = vmax.f32 %v3631_v34, 0.0 }
 0x74e   :  { %v2990_v15 = vmax.f32 %v3634_v56, 0.0 }
 0x74f   :  { %2997 = vst [vmem:[%s4530_s11 + $0x30] sm:$0xff] %v2989_v4 }
 0x750   :  { %2998 = vst [vmem:[%s4530_s11 + $0x38] sm:$0xff] %v2990_v15 }
 0x751   :  { %3003 = vsyncpa [#allocation3], 1 }
 0x752   :  { %3004 = vsyncpa [#allocation5], 1 }
 0x753   :  { %3005 = vsyncpa [#allocation8], 1 }
 0x754   :  { %3006 = vsyncpa [#allocation11], 1 }
 0x755   :  { %3007 = vsyncpa [#allocation14], 1 }
 0x756   :  { %3008 = vsyncpa [#allocation17], 1 }

// kernel: forward.4
= control target key start
LH: loop header
LB: loop body
LE: loop exit
PB: predicated region body
PF: predicated region fallthrough
CT: control target
= control target key end

     0   :  { %18 = vsyncpa [#allocation3], 0  ;;  %s4923_s0 = inlined_call_operand.vmem [shape: f32[28,4], index: 0, kind: input, shape index: {}]   ;;  %s4924_s1 = inlined_call_operand.hbm [shape: f32[9,28,28], index: 1, kind: input, shape index: {}]   ;;  %s4925_s2 = inlined_call_operand.hbm [shape: f32[4,256], index: 2, kind: input, shape index: {}]   ;;  %s4926_s3 = inlined_call_operand.hbm [shape: f32[4,96], index: 3, kind: input, shape index: {}]   ;;  %s4927_s4 = inlined_call_operand.hbm [shape: f32[1,96], index: 4, kind: input, shape index: {}]   ;;  %s4928_s5 = inlined_call_operand.hbm [shape: f32[4,16], index: 5, kind: input, shape index: {}]   ;;  %s4929_s6 = inlined_call_operand.hbm [shape: f32[1,16], index: 6, kind: input, shape index: {}]   ;;  %s4930_s7 = inlined_call_operand.hbm [shape: f32[3,96,256], index: 7, kind: input, shape index: {}]   ;;  %s4931_s8 = inlined_call_operand.hbm [shape: f32[7,16,256], index: 8, kind: input, shape index: {}]   ;;  %s4932_s9 = inlined_call_operand.hbm [shape: f32[4,256], index: 9, kind: input, shape index: {}]   ;;  %s4933_s10 = inlined_call_operand.hbm [shape: f32[1,256], index: 10, kind: input, shape index: {}]   ;;  %s4934_s11 = inlined_call_operand.hbm [shape: f32[32,28], index: 11, kind: input, shape index: {}]   ;;  %s4935_s12 = inlined_call_operand.vmem [shape: f32[32,1], index: 12, kind: input, shape index: {}]   ;;  %s4936_s13 = inlined_call_operand.vmem [shape: f32[32,256], index: 13, kind: output, shape index: {}]  }
   0x1   :  { %19 = vsyncpa [#allocation5], 0 }
   0x2   :  { %20 = vsyncpa [#allocation8], 0 }
   0x3   :  { %21 = vsyncpa [#allocation11], 0 }
   0x4   :  { %22 = vsyncpa [#allocation14], 0 }
   0x5   :  { %23 = vsyncpa [#allocation17], 0  ;;  %s4205_s25 = smov [#allocation4]   ;;  %s4206_s27 = smov [#allocation7]  }
   0x6   :  { %s44_s26 = sshll.u32 %s4205_s25, 4  ;;  %s64_s28 = sshll.u32 %s4206_s27, 4  ;;  %s45_s26 = int_to_ptr.vmem [resolvable:$true] %s44_s26  ;;  %s65_s28 = int_to_ptr.vmem [resolvable:$true] %s64_s28 }
   0x7   :  { %s3951_s14 = scalar_lea.hbm %s4925_s2, 128 }
   0x8   :  { %p3952_p0 = scmp.ne.s32.totalorder %s4925_s2, %s3951_s14  ;;  %p3955_p1 = scmp.lt.u32.totalorder %s3951_s14, %s4925_s2 }
   0xa   :  { %p3957_p2 = pnand %p3955_p1, %p3952_p0 }
   0xc   :  { %3960 = shalt.err (!%p3957_p2)
}
   0xd   :  { %s3961_s19 = scalar_lea.vmem %s45_s26, 128  ;;  %p3966_p4 = scmp.lt.s32.totalorder %s45_s26, %s45_s26 }
   0xe   :  { %p3962_p3 = scmp.ne.s32.totalorder %s45_s26, %s3961_s19  ;;  %p3967_p5 = scmp.lt.s32.totalorder %s3961_s19, %s3961_s19 }
  0x10   :  { %p3968_p6 = por %p3967_p5, %p3966_p4 }
  0x12   :  { %p3969_p7 = pnand %p3968_p6, %p3962_p3 }
  0x14   :  { %3972 = shalt.err (!%p3969_p7)
}
  0x15   :  { %47 = dma.hbm_to_vmem [thread:$0]  %s4925_s2, 128, %s45_s26, [#allocation5]  }
  0x16   :  { %s3973_s24 = scalar_lea.hbm %s4927_s4, 16 }
  0x17   :  { %p3974_p8 = scmp.ne.s32.totalorder %s4927_s4, %s3973_s24  ;;  %p3977_p9 = scmp.lt.u32.totalorder %s3973_s24, %s4927_s4 }
  0x19   :  { %p3979_p10 = pnand %p3977_p9, %p3974_p8 }
  0x1b   :  { %3982 = shalt.err (!%p3979_p10)
}
  0x1c   :  { %s3983_s14 = scalar_lea.vmem %s65_s28, 16  ;;  %s3987_s15 = scalar_lea.vmem %s65_s28, 32 }
  0x1d   :  { %p3984_p11 = scmp.ne.s32.totalorder %s65_s28, %s3983_s14  ;;  %p3988_p12 = scmp.lt.s32.totalorder %s65_s28, %s65_s28 }
  0x1e   :  { %p3989_p13 = scmp.lt.s32.totalorder %s3987_s15, %s3983_s14 }
  0x20   :  { %p3990_p0 = por %p3989_p13, %p3988_p12 }
  0x22   :  { %p3991_p1 = pnand %p3990_p0, %p3984_p11 }
  0x24   :  { %3994 = shalt.err (!%p3991_p1)
}
  0x25   :  { %67 = dma.hbm_to_vmem [thread:$0]  %s4927_s4, 16, %s65_s28, [#allocation8]  }
  0x26   :  { %s4207_s16 = smov [#allocation10]   ;;  %s3995_s20 = scalar_lea.hbm %s4929_s6, 16 }
  0x27   :  { %s84_s17 = sshll.u32 %s4207_s16, 4  ;;  %p3996_p2 = scmp.ne.s32.totalorder %s4929_s6, %s3995_s20  ;;  %s85_s17 = int_to_ptr.vmem [resolvable:$true] %s84_s17 }
  0x28   :  { %p3999_p3 = scmp.lt.u32.totalorder %s3995_s20, %s4929_s6 }
  0x2a   :  { %p4001_p4 = pnand %p3999_p3, %p3996_p2 }
  0x2c   :  { %4004 = shalt.err (!%p4001_p4)
}
  0x2d   :  { %s4005_s25 = scalar_lea.vmem %s85_s17, 16  ;;  %s4009_s4 = scalar_lea.vmem %s85_s17, 32 }
  0x2e   :  { %p4006_p5 = scmp.ne.s32.totalorder %s85_s17, %s4005_s25  ;;  %p4010_p6 = scmp.lt.s32.totalorder %s85_s17, %s85_s17 }
  0x2f   :  { %p4011_p7 = scmp.lt.s32.totalorder %s4009_s4, %s4005_s25 }
  0x31   :  { %p4012_p8 = por %p4011_p7, %p4010_p6 }
  0x33   :  { %p4013_p9 = pnand %p4012_p8, %p4006_p5 }
  0x35   :  { %4016 = shalt.err (!%p4013_p9)
}
  0x36   :  { %87 = dma.hbm_to_vmem [thread:$0]  %s4929_s6, 16, %s85_s17, [#allocation11]  }
  0x37   :  { %s4208_s29 = smov [#allocation13]   ;;  %s4209_s14 = smov [#allocation16]  }
  0x38   :  { %s105_s30 = sshll.u32 %s4208_s29, 4  ;;  %s128_s15 = sshll.u32 %s4209_s14, 4  ;;  %s106_s30 = int_to_ptr.vmem [resolvable:$true] %s105_s30  ;;  %s129_s15 = int_to_ptr.vmem [resolvable:$true] %s128_s15 }
  0x39   :  { %s4017_s16 = scalar_lea.hbm %s4931_s8, 3584 }
  0x3a   :  { %p4018_p10 = scmp.ne.s32.totalorder %s4931_s8, %s4017_s16  ;;  %p4021_p11 = scmp.lt.u32.totalorder %s4017_s16, %s4931_s8 }
  0x3c   :  { %p4023_p12 = pnand %p4021_p11, %p4018_p10 }
  0x3e   :  { %4026 = shalt.err (!%p4023_p12)
}
  0x3f   :  { %s4027_s6 = scalar_lea.vmem %s106_s30, 3584  ;;  %p4032_p0 = scmp.lt.s32.totalorder %s106_s30, %s106_s30 }
  0x40   :  { %p4028_p13 = scmp.ne.s32.totalorder %s106_s30, %s4027_s6  ;;  %p4033_p1 = scmp.lt.s32.totalorder %s4027_s6, %s4027_s6 }
  0x42   :  { %p4034_p2 = por %p4033_p1, %p4032_p0 }
  0x44   :  { %p4035_p3 = pnand %p4034_p2, %p4028_p13 }
  0x46   :  { %4038 = shalt.err (!%p4035_p3)
}
  0x47   :  { %s4210_s17 = smov 256   ;;  %s4211_s22 = smov 16  }
  0x48   :  { %111 = dma.hbm_to_vmem [thread:$0]  %s4931_s8, 3584, %s106_s30, [#allocation14], %s4210_s17, %s4210_s17, %s4211_s22  }
  0x49   :  { %s4039_s28 = scalar_lea.hbm %s4933_s10, 32 }
  0x4a   :  { %p4040_p4 = scmp.ne.s32.totalorder %s4933_s10, %s4039_s28  ;;  %p4043_p5 = scmp.lt.u32.totalorder %s4039_s28, %s4933_s10 }
  0x4c   :  { %p4045_p6 = pnand %p4043_p5, %p4040_p4 }
  0x4e   :  { %4048 = shalt.err (!%p4045_p6)
}
  0x4f   :  { %s4049_s26 = scalar_lea.vmem %s129_s15, 32  ;;  %p4054_p8 = scmp.lt.s32.totalorder %s129_s15, %s129_s15 }
  0x50   :  { %p4050_p7 = scmp.ne.s32.totalorder %s129_s15, %s4049_s26  ;;  %p4055_p9 = scmp.lt.s32.totalorder %s4049_s26, %s4049_s26 }
  0x52   :  { %p4056_p10 = por %p4055_p9, %p4054_p8 }
  0x54   :  { %p4057_p11 = pnand %p4056_p10, %p4050_p7 }
  0x56   :  { %4060 = shalt.err (!%p4057_p11)
}
  0x57   :  { %131 = dma.hbm_to_vmem [thread:$0]  %s4933_s10, 32, %s129_s15, [#allocation17]  }
  0x58   :  { %s4212_s16 = smov [#allocation2]   ;;  %s4061_s21 = scalar_lea.hbm %s4924_s1, 4608 }
  0x59   :  { %s31_s18 = sshll.u32 %s4212_s16, 4  ;;  %p4062_p12 = scmp.ne.s32.totalorder %s4924_s1, %s4061_s21  ;;  %s32_s18 = int_to_ptr.vmem [resolvable:$true] %s31_s18 }
  0x5a   :  { %p4065_p13 = scmp.lt.u32.totalorder %s4061_s21, %s4924_s1 }
  0x5c   :  { %p4067_p0 = pnand %p4065_p13, %p4062_p12 }
  0x5e   :  { %4070 = shalt.err (!%p4067_p0)
}
  0x5f   :  { %s4071_s4 = scalar_lea.vmem %s32_s18, 4608  ;;  %p4076_p2 = scmp.lt.s32.totalorder %s32_s18, %s32_s18 }
  0x60   :  { %p4072_p1 = scmp.ne.s32.totalorder %s32_s18, %s4071_s4  ;;  %p4077_p3 = scmp.lt.s32.totalorder %s4071_s4, %s4071_s4 }
  0x62   :  { %p4078_p4 = por %p4077_p3, %p4076_p2 }
  0x64   :  { %p4079_p5 = pnand %p4078_p4, %p4072_p1 }
  0x66   :  { %4082 = shalt.err (!%p4079_p5)
}
  0x67   :  { %s4213_s10 = smov 128   ;;  %s4214_s15 = smov 8  }
  0x68   :  { %37 = dma.hbm_to_vmem [thread:$0]  %s4924_s1, 4608, %s32_s18, [#allocation3], %s4213_s10, %s4213_s10, %s4214_s15  }
  0x69   :  { %s4215_s29 = smov [#allocation6]   ;;  %s4216_s2 = smov [#allocation9]  }
  0x6a   :  { %s54_s14 = sshll.u32 %s4215_s29, 4  ;;  %s74_s26 = sshll.u32 %s4216_s2, 4  ;;  %s55_s14 = int_to_ptr.vmem [resolvable:$true] %s54_s14  ;;  %s75_s26 = int_to_ptr.vmem [resolvable:$true] %s74_s26 }
  0x6b   :  { %s4083_s16 = scalar_lea.hbm %s4926_s3, 64 }
  0x6c   :  { %p4084_p6 = scmp.ne.s32.totalorder %s4926_s3, %s4083_s16  ;;  %p4087_p7 = scmp.lt.u32.totalorder %s4083_s16, %s4926_s3 }
  0x6e   :  { %p4089_p8 = pnand %p4087_p7, %p4084_p6 }
  0x70   :  { %4092 = shalt.err (!%p4089_p8)
}
  0x71   :  { %s4093_s1 = scalar_lea.vmem %s55_s14, 64  ;;  %p4098_p10 = scmp.lt.s32.totalorder %s55_s14, %s55_s14 }
  0x72   :  { %p4094_p9 = scmp.ne.s32.totalorder %s55_s14, %s4093_s1  ;;  %p4099_p11 = scmp.lt.s32.totalorder %s4093_s1, %s4093_s1 }
  0x74   :  { %p4100_p12 = por %p4099_p11, %p4098_p10 }
  0x76   :  { %p4101_p13 = pnand %p4100_p12, %p4094_p9 }
  0x78   :  { %4104 = shalt.err (!%p4101_p13)
}
  0x79   :  { %57 = dma.hbm_to_vmem [thread:$0]  %s4926_s3, 64, %s55_s14, [#allocation5]  }
  0x7a   :  { %s4105_s4 = scalar_lea.hbm %s4928_s5, 64 }
  0x7b   :  { %p4106_p0 = scmp.ne.s32.totalorder %s4928_s5, %s4105_s4  ;;  %p4109_p1 = scmp.lt.u32.totalorder %s4105_s4, %s4928_s5 }
  0x7d   :  { %p4111_p2 = pnand %p4109_p1, %p4106_p0 }
  0x7f   :  { %4114 = shalt.err (!%p4111_p2)
}
  0x80   :  { %s4115_s8 = scalar_lea.vmem %s75_s26, 64  ;;  %p4120_p4 = scmp.lt.s32.totalorder %s75_s26, %s75_s26 }
  0x81   :  { %p4116_p3 = scmp.ne.s32.totalorder %s75_s26, %s4115_s8  ;;  %p4121_p5 = scmp.lt.s32.totalorder %s4115_s8, %s4115_s8 }
  0x83   :  { %p4122_p6 = por %p4121_p5, %p4120_p4 }
  0x85   :  { %p4123_p7 = pnand %p4122_p6, %p4116_p3 }
  0x87   :  { %4126 = shalt.err (!%p4123_p7)
}
  0x88   :  { %77 = dma.hbm_to_vmem [thread:$0]  %s4928_s5, 64, %s75_s26, [#allocation8]  }
  0x89   :  { %s4217_s30 = smov [#allocation12]   ;;  %s4218_s19 = smov [#allocation15]  }
  0x8a   :  { %s93_s16 = sshll.u32 %s4217_s30, 4  ;;  %s118_s20 = sshll.u32 %s4218_s19, 4  ;;  %s94_s16 = int_to_ptr.vmem [resolvable:$true] %s93_s16  ;;  %s119_s20 = int_to_ptr.vmem [resolvable:$true] %s118_s20 }
  0x8b   :  { %s4127_s1 = scalar_lea.hbm %s4930_s7, 9216 }
  0x8c   :  { %p4128_p8 = scmp.ne.s32.totalorder %s4930_s7, %s4127_s1  ;;  %p4131_p9 = scmp.lt.u32.totalorder %s4127_s1, %s4930_s7 }
  0x8e   :  { %p4133_p10 = pnand %p4131_p9, %p4128_p8 }
  0x90   :  { %4136 = shalt.err (!%p4133_p10)
}
  0x91   :  { %s4137_s5 = scalar_lea.vmem %s94_s16, 9216  ;;  %p4142_p12 = scmp.lt.s32.totalorder %s94_s16, %s94_s16 }
  0x92   :  { %p4138_p11 = scmp.ne.s32.totalorder %s94_s16, %s4137_s5  ;;  %p4143_p13 = scmp.lt.s32.totalorder %s4137_s5, %s4137_s5 }
  0x94   :  { %p4144_p0 = por %p4143_p13, %p4142_p12 }
  0x96   :  { %p4145_p1 = pnand %p4144_p0, %p4138_p11 }
  0x98   :  { %4148 = shalt.err (!%p4145_p1)
}
  0x99   :  { %99 = dma.hbm_to_vmem [thread:$0]  %s4930_s7, 9216, %s94_s16, [#allocation11], %s4210_s17, %s4210_s17, %s4211_s22  }
  0x9a   :  { %s4149_s29 = scalar_lea.hbm %s4932_s9, 128 }
  0x9b   :  { %p4150_p2 = scmp.ne.s32.totalorder %s4932_s9, %s4149_s29  ;;  %p4153_p3 = scmp.lt.u32.totalorder %s4149_s29, %s4932_s9 }
  0x9d   :  { %p4155_p4 = pnand %p4153_p3, %p4150_p2 }
  0x9f   :  { %4158 = shalt.err (!%p4155_p4)
}
  0xa0   :  { %s4159_s30 = scalar_lea.vmem %s119_s20, 128  ;;  %p4164_p6 = scmp.lt.s32.totalorder %s119_s20, %s119_s20 }
  0xa1   :  { %p4160_p5 = scmp.ne.s32.totalorder %s119_s20, %s4159_s30  ;;  %p4165_p7 = scmp.lt.s32.totalorder %s4159_s30, %s4159_s30 }
  0xa3   :  { %p4166_p8 = por %p4165_p7, %p4164_p6 }
  0xa5   :  { %p4167_p9 = pnand %p4166_p8, %p4160_p5 }
  0xa7   :  { %4170 = shalt.err (!%p4167_p9)
}
  0xa8   :  { %121 = dma.hbm_to_vmem [thread:$0]  %s4932_s9, 128, %s119_s20, [#allocation14]  }
  0xa9   :  { %s4219_s22 = smov [#allocation18]   ;;  %s4171_s6 = scalar_lea.hbm %s4934_s11, 512 }
  0xaa   :  { %s137_s16 = sshll.u32 %s4219_s22, 4  ;;  %p4172_p10 = scmp.ne.s32.totalorder %s4934_s11, %s4171_s6  ;;  %s138_s16 = int_to_ptr.vmem [resolvable:$true] %s137_s16 }
  0xab   :  { %p4175_p11 = scmp.lt.u32.totalorder %s4171_s6, %s4934_s11 }
  0xad   :  { %p4177_p12 = pnand %p4175_p11, %p4172_p10 }
  0xaf   :  { %4180 = shalt.err (!%p4177_p12)
}
  0xb0   :  { %s4181_s25 = scalar_lea.vmem %s138_s16, 512  ;;  %p4186_p0 = scmp.lt.s32.totalorder %s138_s16, %s138_s16 }
  0xb1   :  { %p4182_p13 = scmp.ne.s32.totalorder %s138_s16, %s4181_s25  ;;  %p4187_p1 = scmp.lt.s32.totalorder %s4181_s25, %s4181_s25 }
  0xb3   :  { %p4188_p2 = por %p4187_p1, %p4186_p0 }
  0xb5   :  { %p4189_p3 = pnand %p4188_p2, %p4182_p13 }
  0xb7   :  { %4192 = shalt.err (!%p4189_p3)
}
  0xb8   :  { %143 = dma.hbm_to_vmem [thread:$0]  %s4934_s11, 512, %s138_s16, [#allocation17], %s4213_s10, %s4213_s10, %s4214_s15  }
  0xb9   :  { %4193 = dma.done.wait [#allocation3], 4608  }
  0xba   :  { %4194 = vsyncadd [#allocation3], 4294962688 }
  0xbb   :  { %4195 = dma.done.wait [#allocation5], 192  }
  0xbc   :  { %4196 = vsyncadd [#allocation5], 4294967104 }
  0xbd   :  { %4197 = dma.done.wait [#allocation8], 80  }
  0xbe   :  { %4198 = vsyncadd [#allocation8], 4294967216 }
  0xbf   :  { %4199 = dma.done.wait [#allocation11], 9232  }
  0xc0   :  { %4200 = vsyncadd [#allocation11], 4294958064 }
  0xc1   :  { %4201 = dma.done.wait [#allocation14], 3712  }
  0xc2   :  { %4202 = vsyncadd [#allocation14], 4294963584 }
  0xc3   :  { %4203 = dma.done.wait [#allocation17], 544  }
  0xc4   :  { %4204 = vsyncadd [#allocation17], 4294966752  ;;  %vm211_vm0 = vcmask 1043456   ;;  %vm198_vm1 = vcmask 31744   ;;  %v305_v0 = vld [vmem:[#allocation6] sm:$0xf] }
  0xc5   :  { %v4440_v1 = vld [vmem:[%s4923_s0] sm:$0xff]  ;;  %v4445_v2 = vld [vmem:[%s4923_s0 + $0x8] sm:$0xff]  ;;  %3415 = vmatprep.subr.msk.mxu1 %vm211_vm0, %v305_v0  ;;  %v4453_v3 = vld [vmem:[%s4923_s0 + $0x10] sm:$0xff]  ;;  %vm410_vm2 = vcmask 228352   ;;  %v4220_v8 = vmov 0.0   ;;  %vm4221_vm3 = vmmov 1  }
  0xc6   :  { %3417 = vmatprep.mubr.msk.f32.mxu1 %vm198_vm1, %v4440_v1  ;;  %3416 = vmatpush3.msk.msra.mxu1 %vm211_vm0, %v305_v0  ;;  %v4463_v4 = vld [vmem:[%s4923_s0 + $0x18] sm:$0xf]  ;;  %v4467_v5 = vld [vmem:[#allocation2 + $0x40] sm:$0xff]  ;;  %v3185_v9 = vld [vmem:[#allocation7] ss:$0 sm:$0xff]  ;;  %vm535_vm5 = vcmask 785408  }
  0xc7   :  { %3418 = vmatmul.mubr.msk.f32.vlgmr.msra.gmra.mrb[0].mxu1 %vm198_vm1, %v4445_v2  ;;  %v183_v6 = vld [vmem:[#allocation4] sm:$0xff]  ;;  %280 = vmatprep.mubr.f32.mxu0 %v4220_v8  ;;  %v514_v23 = vld [vmem:[#allocation12 + $0x18] sm:$0xff]  ;;  %vm4490_vm4 = vmpackc.low %vm211_vm0, %vm4221_vm3  ;;  %vm1325_vm6 = vcmask 130048  }
  0xc8   :  { %3420 = vmatprep.mubr.msk.f32.mxu1 %vm198_vm1, %v4453_v3  ;;  %v197_v7 = vcombine.high %v183_v6, %v183_v6  ;;  %v512_v22 = vld [vmem:[#allocation12 + $0x8] sm:$0xff]  ;;  %v511_v28 = vld [vmem:[#allocation12] sm:$0xff]  ;;  %v513_v29 = vld [vmem:[#allocation12 + $0x10] sm:$0xff] }
  0xc9   :  { %v3609_v27 = vpack.c.bf16 %v514_v23, %v512_v22  ;;  %v516_v30 = vld [vmem:[#allocation12 + $0x28] sm:$0xff]  ;;  %v518_v31 = vld [vmem:[#allocation12 + $0x38] sm:$0xff]  ;;  %v3611_v33 = vpack.c.bf16 %v513_v29, %v511_v28  ;;  %v515_v35 = vld [vmem:[#allocation12 + $0x20] sm:$0xff] }
  0xca   :  { %3179 = vmatprep.subr.msk.mxu0 %vm211_vm0, %v197_v7  ;;  %v4503_v32 = vld [vmem:[#allocation2 + $0x48] sm:$0xff]  ;;  %v3613_v34 = vpack.c.bf16 %v518_v31, %v516_v30  ;;  %v4505_v37 = vld [vmem:[#allocation2 + $0x50] sm:$0xff]  ;;  %v520_v38 = vld [vmem:[#allocation12 + $0x48] sm:$0xff] }
  0xcb   :  { %3421 = vmatmul.mubr.msk.f32.gmra.mrb[2].mxu1 %vm198_vm1, %v4463_v4  ;;  %3180 = vmatpush1.msk.msra.mxu0 %vm211_vm0, %v183_v6  ;;  %v517_v36 = vld [vmem:[#allocation12 + $0x30] sm:$0xff]  ;;  %v522_v39 = vld [vmem:[#allocation12 + $0x58] sm:$0xff]  ;;  %v4511_v41 = vld [vmem:[#allocation2 + $0x58] sm:$0xf] }
  0xcc   :  { %3431 = vmatprep.mubr.msk.f32.mxu1 %vm410_vm2, %v4467_v5  ;;  %3181 = vmatmul.mubr.msk.f32.vlgmr.msra.gmra.mrb[0].mxu0 %vm198_vm1, %v4440_v1  ;;  %v3615_v40 = vpack.c.bf16 %v517_v36, %v515_v35  ;;  %v3617_v42 = vpack.c.bf16 %v522_v39, %v520_v38  ;;  %v519_v43 = vld [vmem:[#allocation12 + $0x40] sm:$0xff]  ;;  %v521_v44 = vld [vmem:[#allocation12 + $0x50] sm:$0xff]  ;;  %v524_v45 = vld [vmem:[#allocation12 + $0x68] sm:$0xff] }
  0xcd   :  { %286 = vmatprep.mubr.f32.mxu0 %v4220_v8  ;;  %v526_v46 = vld [vmem:[#allocation12 + $0x78] sm:$0xff]  ;;  %v3619_v47 = vpack.c.bf16 %v521_v44, %v519_v43  ;;  %v523_v49 = vld [vmem:[#allocation12 + $0x60] sm:$0xff]  ;;  %v525_v50 = vld [vmem:[#allocation12 + $0x70] sm:$0xff] }
  0xce   :  { %v3621_v48 = vpack.c.bf16 %v526_v46, %v524_v45  ;;  %v528_v51 = vld [vmem:[#allocation12 + $0x88] sm:$0xff]  ;;  %v530_v52 = vld [vmem:[#allocation12 + $0x98] sm:$0xff]  ;;  %v3623_v53 = vpack.c.bf16 %v525_v50, %v523_v49  ;;  %v527_v55 = vld [vmem:[#allocation12 + $0x80] sm:$0xff] }
  0xcf   :  { %v3625_v54 = vpack.c.bf16 %v530_v52, %v528_v51  ;;  %v529_v56 = vld [vmem:[#allocation12 + $0x90] sm:$0xff]  ;;  %v532_v57 = vld [vmem:[#allocation12 + $0xa8] sm:$0xff]  ;;  %v534_v58 = vld [vmem:[#allocation12 + $0xb8] sm:$0xff] }
  0xd0   :  { %3182 = vmatmul.mubr.msk.f32.gmra.mrb[2].mxu0 %vm198_vm1, %v4445_v2  ;;  %v3627_v59 = vpack.c.bf16 %v529_v56, %v527_v55  ;;  %v3629_v60 = vpack.c.bf16 %v534_v58, %v532_v57  ;;  %v531_v61 = vld [vmem:[#allocation12 + $0xa0] sm:$0xff]  ;;  %v533_v62 = vld [vmem:[#allocation12 + $0xb0] sm:$0xff]  ;;  %v749_v0 = vld [vmem:[#allocation12 + $0xc8] sm:$0xff] }
  0xd1   :  { %292 = vmatprep.mubr.f32.mxu0 %v4220_v8  ;;  %v3631_v63 = vpack.c.bf16 %v533_v62, %v531_v61  ;;  %v751_v6 = vld [vmem:[#allocation12 + $0xd8] sm:$0xff]  ;;  %v748_v7 = vld [vmem:[#allocation12 + $0xc0] sm:$0xff]  ;;  %v4554_v31 = vld [vmem:[#allocation2 + $0x80] sm:$0xff] }
  0xd2   :  { %v4540_v28 = vld [vmem:[#allocation2 + $0x68] sm:$0xff]  ;;  %v4542_v29 = vld [vmem:[#allocation2 + $0x70] sm:$0xff]  ;;  %v4549_v30 = vld [vmem:[#allocation2 + $0x78] sm:$0xf] }
  0xd3   :  { %v4573_v35 = vld [vmem:[#allocation2 + $0x98] sm:$0xf]  ;;  %v759_v36 = vld [vmem:[#allocation12 + $0x118] sm:$0xff]  ;;  %v761_v45 = vld [vmem:[#allocation12 + $0x128] sm:$0xff] }
  0xd4   :  { %3183 = vmatmul.mubr.msk.f32.gmra.mrb[4].mxu0 %vm198_vm1, %v4453_v3  ;;  %v756_v39 = vld [vmem:[#allocation12 + $0x100] sm:$0xff]  ;;  %v763_v46 = vld [vmem:[#allocation12 + $0x138] sm:$0xff]  ;;  %v762_v49 = vld [vmem:[#allocation12 + $0x130] sm:$0xff] }
  0xd5   :  { %298 = vmatprep.mubr.f32.mxu0 %v4220_v8  ;;  %v764_v56 = vld [vmem:[#allocation12 + $0x140] sm:$0xff]  ;;  %v766_v57 = vld [vmem:[#allocation12 + $0x150] sm:$0xff]  ;;  %v769_v61 = vld [vmem:[#allocation12 + $0x168] sm:$0xff] }
  0xd6   :  { %v3661_v58 = vpack.c.bf16 %v766_v57, %v764_v56  ;;  %v771_v62 = vld [vmem:[#allocation12 + $0x178] sm:$0xff]  ;;  %v984_v56 = vld [vmem:[#allocation12 + $0x180] sm:$0xff]  ;;  %v986_v57 = vld [vmem:[#allocation12 + $0x190] sm:$0xff] }
  0xd8   :  { %3184 = vmatmul.mubr.msk.f32.gmra.mrb[6].mxu0 %vm198_vm1, %v4463_v4 }
  0xd9   :  { %848 = vmatprep.mubr.f32.mxu0 %v4220_v8 }
 0x19a   :  { %v3419_v10 = vpop.f32.mrb[0].mxu1 }
 0x19b   :  { %v388_v11 = vadd.f32 %v3419_v10, %v3185_v9  ;;  %v382_v12 = vpop.f32.mrb[1].mxu1  ;;  %v3643_v10 = vpack.c.bf16 %v751_v6, %v749_v0  ;;  %v768_v0 = vld [vmem:[#allocation12 + $0x160] sm:$0xff]  ;;  %v770_v6 = vld [vmem:[#allocation12 + $0x170] sm:$0xff] }
 0x19c   :  { %v383_v13 = vadd.f32 %v3185_v9, %v382_v12  ;;  %v753_v12 = vld [vmem:[#allocation12 + $0xe8] sm:$0xff] }
 0x19d   :  { %v402_v14 = vmax.f32 %v388_v11, 0.0  ;;  %v750_v11 = vld [vmem:[#allocation12 + $0xd0] sm:$0xff]  ;;  %3644 = vmatprep.subr.bf16.mxu0 %v3643_v10  ;;  %v985_v10 = vld [vmem:[#allocation12 + $0x188] sm:$0xff] }
 0x19e   :  { %v401_v15 = vmax.f32 %v383_v13, 0.0  ;;  %v3422_v16 = vpop.f32.mrb[2].mxu1  ;;  %v755_v13 = vld [vmem:[#allocation12 + $0xf8] sm:$0xff] }
 0x19f   :  { %v398_v17 = vadd.f32 %v3422_v16, %v3185_v9  ;;  %v392_v18 = vpop.f32.mrb[3].mxu1  ;;  %v3647_v16 = vpack.c.bf16 %v755_v13, %v753_v12  ;;  %v1217_v13 = vld [vmem:[#allocation2] sm:$0xff] }
 0x1a0   :  { %v4486_v19 = vpack.c.bf16 %v402_v14, %v401_v15  ;;  %v393_v20 = vadd.f32 %v3185_v9, %v392_v18  ;;  %v4517_v9 = vpop.f32.mrb[0].mxu0  ;;  %v3645_v15 = vpack.c.bf16 %v750_v11, %v748_v7  ;;  %v754_v18 = vld [vmem:[#allocation12 + $0xf0] sm:$0xff]  ;;  %v3665_v7 = vpack.c.bf16 %v770_v6, %v768_v0  ;;  %v987_v11 = vld [vmem:[#allocation12 + $0x198] sm:$0xff]  ;;  %v988_v6 = vld [vmem:[#allocation12 + $0x1a0] sm:$0xff] }
 0x1a1   :  { %v404_v21 = vmax.f32 %v398_v17, 0.0  ;;  %v4519_v14 = vpop.f32.mrb[1].mxu0  ;;  %v752_v17 = vld [vmem:[#allocation12 + $0xe0] sm:$0xff]  ;;  %v3677_v12 = vpack.c.bf16 %v987_v11, %v985_v10  ;;  %v995_v11 = vld [vmem:[#allocation12 + $0x1d8] sm:$0xff] }
 0x1a2   :  { %v403_v24 = vmax.f32 %v393_v20, 0.0  ;;  %3600 = vmatprep.subr.bf16.mxu1 %v4486_v19  ;;  %3646 = vmatpush1.bf16.msra.mxu0 %v3645_v15  ;;  %v3649_v20 = vpack.c.bf16 %v754_v18, %v752_v17  ;;  %v186_v15 = vlaneseq  ;;  %v184_v18 = vld [vmem:[#allocation16] sm:$0x3] }
 0x1a3   :  { %3602 = vmatpush3.bf16.msra.mxu1 %v4486_v19  ;;  %3648 = vmatprep.subr.bf16.mxu0 %v3647_v16  ;;  %v288_v43 = vpop.f32.mrb[2].mxu0 }
 0x1a4   :  { %v4495_v26 = vpack.c.bf16 %v404_v21, %v403_v24  ;;  %v290_v44 = vpop.f32.mrb[3].mxu0  ;;  %v187_v16 = vshrl.u32 %v186_v15, 7  ;;  %v992_v15 = vld [vmem:[#allocation12 + $0x1c0] sm:$0xff] }
 0x1a6   :  { %3605 = vmatprep.subr.msk.bf16.mxu1 %vm4490_vm4, %v4495_v26  ;;  %3650 = vmatpush1.bf16.msra.mxu0 %v3649_v20  ;;  %v188_v17 = vsub.s32 0, %v187_v16  ;;  %v192_v20 = vsub.s32 1, %v187_v16  ;;  %v994_v16 = vld [vmem:[#allocation12 + $0x1d0] sm:$0xff] }
 0x1a7   :  { %3608 = vmatpush3.bf16.msk.msra.mxu1 %vm4490_vm4, %v4495_v26  ;;  %v294_v51 = vpop.f32.mrb[4].mxu0 }
 0x1a8   :  { %3610 = vmatprep.subr.bf16.mxu1 %v3609_v27  ;;  %v4535_v27 = vld [vmem:[#allocation2 + $0x60] sm:$0xff]  ;;  %v296_v52 = vpop.f32.mrb[5].mxu0 }
 0x1aa   :  { %3432 = vmatmul.mubr.msk.f32.vlgmr.msra.gmra.mrb[4].mxu1 %vm410_vm2, %v4503_v32 }
 0x1ab   :  { %3612 = vmatpush1.bf16.msra.mxu1 %v3611_v33  ;;  %3434 = vmatprep.mubr.msk.f32.mxu1 %vm410_vm2, %v4505_v37  ;;  %v1117_v33 = vld [vmem:[#allocation9] sm:$0xf] }
 0x1ac   :  { %3614 = vmatprep.subr.bf16.mxu1 %v3613_v34  ;;  %v4566_v34 = vld [vmem:[#allocation2 + $0x90] sm:$0xff] }
 0x1ae   :  { %3435 = vmatmul.mubr.msk.f32.gmra.mrb[6].mxu1 %vm410_vm2, %v4511_v41 }
 0x1af   :  { %3616 = vmatpush1.bf16.msra.mxu1 %v3615_v40  ;;  %612 = vmatprep.mubr.f32.mxu1 %v4220_v8  ;;  %v758_v40 = vld [vmem:[#allocation12 + $0x110] sm:$0xff] }
 0x1b0   :  { %3618 = vmatprep.subr.bf16.mxu1 %v3617_v42  ;;  %v3653_v42 = vpack.c.bf16 %v758_v40, %v756_v39 }
 0x1b3   :  { %3620 = vmatpush1.bf16.msra.mxu1 %v3619_v47  ;;  %v3655_v47 = vpack.c.bf16 %v763_v46, %v761_v45 }
 0x1b4   :  { %3622 = vmatprep.subr.bf16.mxu1 %v3621_v48  ;;  %v760_v48 = vld [vmem:[#allocation12 + $0x120] sm:$0xff] }
 0x1b5   :  { %v3657_v50 = vpack.c.bf16 %v762_v49, %v760_v48 }
 0x1b7   :  { %3624 = vmatpush1.bf16.msra.mxu1 %v3623_v53  ;;  %v765_v53 = vld [vmem:[#allocation12 + $0x148] sm:$0xff] }
 0x1b8   :  { %3626 = vmatprep.subr.bf16.mxu1 %v3625_v54  ;;  %v767_v54 = vld [vmem:[#allocation12 + $0x158] sm:$0xff] }
 0x1b9   :  { %v3659_v55 = vpack.c.bf16 %v767_v54, %v765_v53 }
 0x1bb   :  { %3628 = vmatpush1.bf16.msra.mxu1 %v3627_v59  ;;  %v300_v59 = vpop.f32.mrb[6].mxu0 }
 0x1bc   :  { %3630 = vmatprep.subr.bf16.mxu1 %v3629_v60  ;;  %v302_v60 = vpop.f32.mrb[7].mxu0 }
 0x1bf   :  { %3632 = vmatpush1.bf16.msra.mxu1 %v3631_v63  ;;  %v3663_v63 = vpack.c.bf16 %v771_v62, %v769_v61  ;;  %v989_v61 = vld [vmem:[#allocation12 + $0x1a8] sm:$0xff]  ;;  %v991_v62 = vld [vmem:[#allocation12 + $0x1b8] sm:$0xff] }
 0x1c0   :  { %3634 = vmatprep.subr.bf16.mxu1 %v4486_v19  ;;  %v3681_v0 = vpack.c.bf16 %v991_v62, %v989_v61  ;;  %v1004_v61 = vld [vmem:[#allocation12 + $0x220] sm:$0xff]  ;;  %v1006_v62 = vld [vmem:[#allocation12 + $0x230] sm:$0xff] }
 0x27d   :  { %v3433_v21 = vpop.f32.mrb[4].mxu1 }
 0x27e   :  { %v492_v22 = vpop.f32.mrb[5].mxu1 }
 0x27f   :  { %3196 = vmatmul.mubr.msk.f32.vlgmr.msra.gmra.mrb[8].mxu1 %vm535_vm5, %v492_v22  ;;  %v193_v22 = vrot.slane %v184_v18, %v192_v20  ;;  %v999_v20 = vld [vmem:[#allocation12 + $0x1f8] sm:$0xff] }
 0x280   :  { %3636 = vmatpush3.bf16.msra.mxu1 %v4486_v19  ;;  %618 = vmatprep.mubr.f32.mxu1 %v4220_v8 }
 0x281   :  { %3639 = vmatprep.subr.msk.bf16.mxu1 %vm4490_vm4, %v4495_v26  ;;  %v3436_v23 = vpop.f32.mrb[6].mxu1  ;;  %v291_v40 = vadd.f32 %v290_v44, %v193_v22  ;;  %v297_v49 = vadd.f32 %v296_v52, %v193_v22 }
 0x282   :  { %v502_v24 = vpop.f32.mrb[7].mxu1 }
 0x283   :  { %3197 = vmatmul.mubr.msk.f32.gmra.mrb[10].mxu1 %vm535_vm5, %v3433_v21  ;;  %v189_v21 = vrot.slane %v184_v18, %v188_v17  ;;  %v997_v18 = vld [vmem:[#allocation12 + $0x1e8] sm:$0xff] }
 0x284   :  { %3642 = vmatpush3.bf16.msk.msra.mxu1 %vm4490_vm4, %v4495_v26  ;;  %624 = vmatprep.mubr.f32.mxu1 %v4220_v8 }
 0x285   :  { %3668 = vmatprep.subr.bf16.mxu1 %v4486_v19  ;;  %v301_v53 = vadd.f32 %v300_v59, %v189_v21  ;;  %v993_v59 = vld [vmem:[#allocation12 + $0x1c8] sm:$0xff] }
 0x287   :  { %3198 = vmatmul.mubr.msk.f32.gmra.mrb[12].mxu1 %vm535_vm5, %v502_v24  ;;  %v285_v24 = vadd.f32 %v4519_v14, %v193_v22 }
 0x288   :  { %630 = vmatprep.mubr.f32.mxu1 %v4220_v8 }
 0x28b   :  { %3199 = vmatmul.mubr.msk.f32.gmra.mrb[14].mxu1 %vm535_vm5, %v3436_v23  ;;  %v283_v23 = vadd.f32 %v4517_v9, %v189_v21 }
 0x28c   :  { %3445 = vmatprep.mubr.msk.f32.mxu1 %vm410_vm2, %v4535_v27 }
 0x28f   :  { %3446 = vmatmul.mubr.msk.f32.vlgmr.msra.gmra.mrb[16].mxu1 %vm410_vm2, %v4540_v28 }
 0x290   :  { %3670 = vmatpush3.bf16.msra.mxu1 %v4486_v19  ;;  %3448 = vmatprep.mubr.msk.f32.mxu1 %vm410_vm2, %v4542_v29  ;;  %v4563_v19 = vld [vmem:[#allocation2 + $0x88] sm:$0xff] }
 0x291   :  { %3673 = vmatprep.subr.msk.bf16.mxu1 %vm4490_vm4, %v4495_v26 }
 0x293   :  { %3449 = vmatmul.mubr.msk.f32.gmra.mrb[18].mxu1 %vm410_vm2, %v4549_v30 }
 0x294   :  { %3676 = vmatpush3.bf16.msk.msra.mxu1 %vm4490_vm4, %v4495_v26  ;;  %3459 = vmatprep.mubr.msk.f32.mxu1 %vm410_vm2, %v4554_v31  ;;  %v757_v26 = vld [vmem:[#allocation12 + $0x108] sm:$0xff] }
 0x295   :  { %3465 = vmatprep.subr.msk.mxu1 %vm211_vm0, %v1117_v33  ;;  %v3651_v38 = vpack.c.bf16 %v759_v36, %v757_v26 }
 0x297   :  { %3460 = vmatmul.mubr.msk.f32.vlgmr.msra.gmra.mrb[20].mxu1 %vm410_vm2, %v4563_v19  ;;  %3652 = vmatprep.subr.bf16.mxu0 %v3651_v38  ;;  %v289_v38 = vadd.f32 %v288_v43, %v189_v21 }
 0x298   :  { %3466 = vmatpush3.msk.msra.mxu1 %vm211_vm0, %v1117_v33  ;;  %3462 = vmatprep.mubr.msk.f32.mxu1 %vm410_vm2, %v4566_v34 }
 0x299   :  { %3654 = vmatpush1.bf16.msra.mxu0 %v3653_v42 }
 0x29a   :  { %3656 = vmatprep.subr.bf16.mxu0 %v3655_v47  ;;  %v295_v47 = vadd.f32 %v294_v51, %v189_v21  ;;  %v3687_v21 = vpack.c.bf16 %v994_v16, %v992_v15  ;;  %v1322_v16 = vld [vmem:[#allocation13 + $0x8] sm:$0xff] }
 0x29b   :  { %3463 = vmatmul.mubr.msk.f32.gmra.mrb[22].mxu1 %vm410_vm2, %v4573_v35 }
 0x29c   :  { %3467 = vmatprep.mubr.msk.f32.mxu1 %vm198_vm1, %v4440_v1 }
 0x29d   :  { %3658 = vmatpush1.bf16.msra.mxu0 %v3657_v50 }
 0x29e   :  { %3660 = vmatprep.subr.bf16.mxu0 %v3659_v55  ;;  %v303_v55 = vadd.f32 %v302_v60, %v193_v22 }
 0x29f   :  { %3468 = vmatmul.mubr.msk.f32.vlgmr.msra.gmra.mrb[24].mxu1 %vm198_vm1, %v4445_v2 }
 0x2a0   :  { %3470 = vmatprep.mubr.msk.f32.mxu1 %vm198_vm1, %v4453_v3 }
 0x2a1   :  { %3662 = vmatpush1.bf16.msra.mxu0 %v3661_v58 }
 0x2a2   :  { %3664 = vmatprep.subr.bf16.mxu0 %v3663_v63  ;;  %v3679_v63 = vpack.c.bf16 %v986_v57, %v984_v56 }
 0x2a3   :  { %3471 = vmatmul.mubr.msk.f32.gmra.mrb[26].mxu1 %vm198_vm1, %v4463_v4 }
 0x2a4   :  { %3481 = vmatprep.mubr.msk.f32.mxu1 %vm410_vm2, %v1217_v13  ;;  %v3685_v13 = vpack.c.bf16 %v995_v11, %v993_v59 }
 0x2a5   :  { %3666 = vmatpush1.bf16.msra.mxu0 %v3665_v7  ;;  %v990_v7 = vld [vmem:[#allocation12 + $0x1b0] sm:$0xff] }
 0x2a6   :  { %3678 = vmatprep.subr.bf16.mxu0 %v3677_v12  ;;  %v3683_v60 = vpack.c.bf16 %v990_v7, %v988_v6  ;;  %v3699_v7 = vpack.c.bf16 %v1006_v62, %v1004_v61  ;;  %v1436_v62 = vld [vmem:[#allocation2 + $0x20] sm:$0xff] }
 0x352   :  { %v614_v33 = vpop.f32.mrb[8].mxu1 }
 0x353   :  { %v4588_v26 = vadd.f32 %v614_v33, %v283_v23  ;;  %v616_v36 = vpop.f32.mrb[9].mxu1  ;;  %v3689_v23 = vpack.c.bf16 %v999_v20, %v997_v18  ;;  %v998_v33 = vld [vmem:[#allocation12 + $0x1f0] sm:$0xff] }
 0x354   :  { %v4590_v39 = vadd.f32 %v616_v36, %v285_v24  ;;  %v996_v24 = vld [vmem:[#allocation12 + $0x1e0] sm:$0xff] }
 0x356   :  { %v620_v42 = vpop.f32.mrb[10].mxu1 }
 0x357   :  { %v4592_v45 = vadd.f32 %v620_v42, %v289_v38  ;;  %v622_v46 = vpop.f32.mrb[11].mxu1  ;;  %v1001_v38 = vld [vmem:[#allocation12 + $0x208] sm:$0xff]  ;;  %v3691_v42 = vpack.c.bf16 %v998_v33, %v996_v24  ;;  %v1323_v24 = vld [vmem:[#allocation13 + $0x10] sm:$0xff] }
 0x358   :  { %v4594_v48 = vadd.f32 %v622_v46, %v291_v40  ;;  %v1003_v40 = vld [vmem:[#allocation12 + $0x218] sm:$0xff] }
 0x359   :  { %v1218_v33 = vld [vmem:[#allocation2 + $0x8] sm:$0xff] }
 0x35a   :  { %v626_v50 = vpop.f32.mrb[12].mxu1 }
 0x35b   :  { %v4596_v9 = vadd.f32 %v626_v50, %v295_v47  ;;  %v628_v14 = vpop.f32.mrb[13].mxu1  ;;  %v3693_v47 = vpack.c.bf16 %v1003_v40, %v1001_v38  ;;  %v1002_v50 = vld [vmem:[#allocation12 + $0x210] sm:$0xff]  ;;  %v1219_v40 = vld [vmem:[#allocation2 + $0x10] sm:$0xff] }
 0x35c   :  { %v4598_v54 = vadd.f32 %v628_v14, %v297_v49  ;;  %v1000_v49 = vld [vmem:[#allocation12 + $0x200] sm:$0xff] }
 0x35d   :  { %v3695_v56 = vpack.c.bf16 %v1002_v50, %v1000_v49 }
 0x35e   :  { %v632_v43 = vpop.f32.mrb[14].mxu1 }
 0x35f   :  { %v4600_v44 = vadd.f32 %v632_v43, %v301_v53  ;;  %v634_v58 = vpop.f32.mrb[15].mxu1  ;;  %v1005_v53 = vld [vmem:[#allocation12 + $0x228] sm:$0xff]  ;;  %v3218_v43 = vld [vmem:[#allocation10] ss:$0 sm:$0xff] }
 0x360   :  { %v4602_v51 = vadd.f32 %v634_v58, %v303_v55  ;;  %v1007_v55 = vld [vmem:[#allocation12 + $0x238] sm:$0xff] }
 0x361   :  { %v3697_v58 = vpack.c.bf16 %v1007_v55, %v1005_v53 }
 0x362   :  { %v3447_v52 = vpop.f32.mrb[16].mxu1 }
 0x363   :  { %v728_v10 = vpop.f32.mrb[17].mxu1 }
 0x364   :  { %3205 = vmatmul.mubr.msk.f32.vlgmr.msra.gmra.mrb[8].mxu0 %vm535_vm5, %v728_v10 }
 0x365   :  { %3680 = vmatpush1.bf16.msra.mxu0 %v3679_v63  ;;  %854 = vmatprep.mubr.f32.mxu0 %v4220_v8 }
 0x366   :  { %v3450_v12 = vpop.f32.mrb[18].mxu1  ;;  %3682 = vmatprep.subr.bf16.mxu0 %v3681_v0 }
 0x367   :  { %v738_v17 = vpop.f32.mrb[19].mxu1 }
 0x368   :  { %3206 = vmatmul.mubr.msk.f32.gmra.mrb[10].mxu0 %vm535_vm5, %v3447_v52 }
 0x369   :  { %3684 = vmatpush1.bf16.msra.mxu0 %v3683_v60  ;;  %860 = vmatprep.mubr.f32.mxu0 %v4220_v8 }
 0x36a   :  { %v3461_v22 = vpop.f32.mrb[20].mxu1  ;;  %3686 = vmatprep.subr.bf16.mxu0 %v3685_v13 }
 0x36b   :  { %v964_v36 = vpop.f32.mrb[21].mxu1 }
 0x36c   :  { %3207 = vmatmul.mubr.msk.f32.gmra.mrb[12].mxu0 %vm535_vm5, %v738_v17  ;;  %v1324_v17 = vld [vmem:[#allocation13 + $0x18] sm:$0xff] }
 0x36d   :  { %3688 = vmatpush1.bf16.msra.mxu0 %v3687_v21  ;;  %866 = vmatprep.mubr.f32.mxu0 %v4220_v8  ;;  %v3711_v21 = vpack.c.bf16 %v1324_v17, %v1322_v16 }
 0x36e   :  { %v3464_v46 = vpop.f32.mrb[22].mxu1  ;;  %3690 = vmatprep.subr.bf16.mxu0 %v3689_v23  ;;  %v1321_v23 = vld [vmem:[#allocation13] sm:$0xff] }
 0x36f   :  { %v974_v14 = vpop.f32.mrb[23].mxu1  ;;  %v3713_v38 = vpack.c.bf16 %v1323_v24, %v1321_v23 }
 0x370   :  { %3208 = vmatmul.mubr.msk.f32.gmra.mrb[14].mxu0 %vm535_vm5, %v3450_v12 }
 0x371   :  { %3692 = vmatpush1.bf16.msra.mxu0 %v3691_v42  ;;  %1084 = vmatprep.mubr.f32.mxu0 %v4220_v8 }
 0x372   :  { %v3469_v57 = vpop.f32.mrb[24].mxu1  ;;  %3694 = vmatprep.subr.bf16.mxu0 %v3693_v47 }
 0x373   :  { %v1200_v63 = vadd.f32 %v3469_v57, %v3218_v43  ;;  %v1194_v52 = vpop.f32.mrb[25].mxu1 }
 0x374   :  { %v1195_v0 = vadd.f32 %v3218_v43, %v1194_v52  ;;  %v2791_v52 = vld [vmem:[#allocation2 + $0x110] sm:$0xff] }
 0x375   :  { %v1214_v6 = vmax.f32 %v1200_v63, 0.0  ;;  %3696 = vmatpush1.bf16.msra.mxu0 %v3695_v56  ;;  %v1438_v63 = vld [vmem:[#allocation2 + $0x30] sm:$0xff] }
 0x376   :  { %v1213_v10 = vmax.f32 %v1195_v0, 0.0  ;;  %v3472_v59 = vpop.f32.mrb[26].mxu1  ;;  %3698 = vmatprep.subr.bf16.mxu0 %v3697_v58  ;;  %v2792_v0 = vld [vmem:[#allocation2 + $0x118] sm:$0xf] }
 0x377   :  { %v1210_v11 = vadd.f32 %v3472_v59, %v3218_v43  ;;  %v1204_v60 = vpop.f32.mrb[27].mxu1 }
 0x378   :  { %v4612_v12 = vpack.c.bf16 %v1214_v6, %v1213_v10  ;;  %v1205_v13 = vadd.f32 %v3218_v43, %v1204_v60  ;;  %v1539_v6 = vld [vmem:[#allocation13 + $0x28] sm:$0xff]  ;;  %v1538_v10 = vld [vmem:[#allocation13 + $0x20] sm:$0xff] }
 0x379   :  { %v1216_v15 = vmax.f32 %v1210_v11, 0.0  ;;  %3700 = vmatpush1.bf16.msra.mxu0 %v3699_v7  ;;  %v1541_v7 = vld [vmem:[#allocation13 + $0x38] sm:$0xff]  ;;  %v1540_v11 = vld [vmem:[#allocation13 + $0x30] sm:$0xff] }
 0x37a   :  { %v1215_v18 = vmax.f32 %v1205_v13, 0.0  ;;  %3702 = vmatprep.subr.bf16.mxu1 %v4612_v12  ;;  %v3725_v59 = vpack.c.bf16 %v1541_v7, %v1539_v6  ;;  %v3727_v60 = vpack.c.bf16 %v1540_v11, %v1538_v10  ;;  %v1740_v13 = vld [vmem:[#allocation13 + $0x58] sm:$0xff]  ;;  %v2353_v11 = vld [vmem:[#allocation13 + $0xb0] sm:$0xff] }
 0x37b   :  { %3704 = vmatpush3.bf16.msra.mxu1 %v4612_v12 }
 0x37c   :  { %v4616_v20 = vpack.c.bf16 %v1216_v15, %v1215_v18  ;;  %3214 = vmatmul.mubr.msk.f32.vlgmr.msra.gmra.mrb[8].mxu0 %vm535_vm5, %v964_v36  ;;  %v1220_v36 = vld [vmem:[#allocation2 + $0x18] sm:$0xf]  ;;  %3726 = vmatprep.subr.bf16.mxu0 %v3725_v59 }
 0x37d   :  { %1090 = vmatprep.mubr.f32.mxu0 %v4220_v8  ;;  %3728 = vmatpush1.bf16.msra.mxu0 %v3727_v60  ;;  %v2351_v59 = vld [vmem:[#allocation13 + $0xa0] sm:$0xff] }
 0x37e   :  { %3707 = vmatprep.subr.msk.bf16.mxu1 %vm4490_vm4, %v4616_v20 }
 0x37f   :  { %3710 = vmatpush3.bf16.msk.msra.mxu1 %vm4490_vm4, %v4616_v20 }
 0x380   :  { %3215 = vmatmul.mubr.msk.f32.gmra.mrb[10].mxu0 %vm535_vm5, %v3461_v22  ;;  %3712 = vmatprep.subr.bf16.mxu1 %v3711_v21 }
 0x381   :  { %1096 = vmatprep.mubr.f32.mxu0 %v4220_v8 }
 0x382   :  { %3482 = vmatmul.mubr.msk.f32.vlgmr.msra.gmra.mrb[28].mxu1 %vm410_vm2, %v1218_v33 }
 0x383   :  { %3714 = vmatpush1.bf16.msra.mxu1 %v3713_v38  ;;  %3484 = vmatprep.mubr.msk.f32.mxu1 %vm410_vm2, %v1219_v40 }
 0x384   :  { %3216 = vmatmul.mubr.msk.f32.gmra.mrb[12].mxu0 %vm535_vm5, %v974_v14  ;;  %3716 = vmatprep.subr.bf16.mxu1 %v4612_v12 }
 0x385   :  { %1102 = vmatprep.mubr.f32.mxu0 %v4220_v8 }
 0x386   :  { %3485 = vmatmul.mubr.msk.f32.gmra.mrb[30].mxu1 %vm410_vm2, %v1220_v36 }
 0x387   :  { %1402 = vmatprep.mubr.f32.mxu1 %v4220_v8 }
 0x388   :  { %3217 = vmatmul.mubr.msk.f32.gmra.mrb[14].mxu0 %vm535_vm5, %v3464_v46 }
 0x389   :  { %1618 = vmatprep.mubr.f32.mxu0 %v4220_v8 }
 0x44f   :  { %v1086_v22 = vpop.f32.mrb[8].mxu0 }
 0x450   :  { %v4638_v42 = vadd.f32 %v1086_v22, %v4588_v26  ;;  %v1088_v47 = vpop.f32.mrb[9].mxu0 }
 0x451   :  { %v4641_v49 = vadd.f32 %v1088_v47, %v4590_v39  ;;  %v1737_v47 = vld [vmem:[#allocation13 + $0x40] sm:$0xff] }
 0x453   :  { %v1092_v50 = vpop.f32.mrb[10].mxu0 }
 0x454   :  { %v4644_v14 = vadd.f32 %v1092_v50, %v4592_v45  ;;  %v1094_v53 = vpop.f32.mrb[11].mxu0 }
 0x455   :  { %v4647_v55 = vadd.f32 %v1094_v53, %v4594_v48  ;;  %v3483_v46 = vpop.f32.mrb[28].mxu1  ;;  %v1937_v53 = vld [vmem:[#allocation13 + $0x68] sm:$0xff] }
 0x456   :  { %v1302_v43 = vpop.f32.mrb[29].mxu1 }
 0x457   :  { %v1098_v56 = vpop.f32.mrb[12].mxu0  ;;  %3229 = vmatmul.mubr.msk.f32.vlgmr.msra.gmra.mrb[32].mxu1 %vm1325_vm6, %v1302_v43 }
 0x458   :  { %v4651_v26 = vadd.f32 %v1098_v56, %v4596_v9  ;;  %v1100_v57 = vpop.f32.mrb[13].mxu0  ;;  %3718 = vmatpush3.bf16.msra.mxu1 %v4612_v12  ;;  %1408 = vmatprep.mubr.f32.mxu1 %v4220_v8 }
 0x459   :  { %v4656_v39 = vadd.f32 %v1100_v57, %v4598_v54  ;;  %3721 = vmatprep.subr.msk.bf16.mxu1 %vm4490_vm4, %v4616_v20  ;;  %v3486_v45 = vpop.f32.mrb[30].mxu1 }
 0x45a   :  { %v1312_v48 = vpop.f32.mrb[31].mxu1 }
 0x45b   :  { %v1104_v58 = vpop.f32.mrb[14].mxu0  ;;  %3230 = vmatmul.mubr.msk.f32.gmra.mrb[34].mxu1 %vm1325_vm6, %v3483_v46  ;;  %v1939_v46 = vld [vmem:[#allocation13 + $0x78] sm:$0xff] }
 0x45c   :  { %v4663_v9 = vadd.f32 %v1104_v58, %v4600_v44  ;;  %v1106_v61 = vpop.f32.mrb[15].mxu0  ;;  %3724 = vmatpush3.bf16.msk.msra.mxu1 %vm4490_vm4, %v4616_v20  ;;  %1414 = vmatprep.mubr.f32.mxu1 %v4220_v8  ;;  %v1437_v44 = vld [vmem:[#allocation2 + $0x28] sm:$0xff] }
 0x45d   :  { %v4670_v54 = vadd.f32 %v1106_v61, %v4602_v51  ;;  %3730 = vmatprep.subr.bf16.mxu1 %v4612_v12  ;;  %v1439_v51 = vld [vmem:[#allocation2 + $0x38] sm:$0xf]  ;;  %v1938_v61 = vld [vmem:[#allocation13 + $0x70] sm:$0xff] }
 0x45f   :  { %3231 = vmatmul.mubr.msk.f32.gmra.mrb[36].mxu1 %vm1325_vm6, %v1312_v48 }
 0x460   :  { %1420 = vmatprep.mubr.f32.mxu1 %v4220_v8 }
 0x463   :  { %3232 = vmatmul.mubr.msk.f32.gmra.mrb[38].mxu1 %vm1325_vm6, %v3486_v45 }
 0x464   :  { %3495 = vmatprep.mubr.msk.f32.mxu1 %vm410_vm2, %v1436_v62 }
 0x467   :  { %3496 = vmatmul.mubr.msk.f32.vlgmr.msra.gmra.mrb[40].mxu1 %vm410_vm2, %v1437_v44  ;;  %v2136_v44 = vld [vmem:[#allocation13 + $0x88] sm:$0xff] }
 0x468   :  { %3732 = vmatpush3.bf16.msra.mxu1 %v4612_v12  ;;  %3498 = vmatprep.mubr.msk.f32.mxu1 %vm410_vm2, %v1438_v63  ;;  %v2138_v63 = vld [vmem:[#allocation13 + $0x98] sm:$0xff] }
 0x469   :  { %3735 = vmatprep.subr.msk.bf16.mxu1 %vm4490_vm4, %v4616_v20 }
 0x46b   :  { %3499 = vmatmul.mubr.msk.f32.gmra.mrb[42].mxu1 %vm410_vm2, %v1439_v51 }
 0x46c   :  { %3738 = vmatpush3.bf16.msk.msra.mxu1 %vm4490_vm4, %v4616_v20  ;;  %3509 = vmatprep.mubr.msk.f32.mxu1 %vm410_vm2, %v4467_v5  ;;  %v2249_v5 = vld [vmem:[#allocation2 + $0xa0] sm:$0xff] }
 0x46d   :  { %3744 = vmatprep.subr.bf16.mxu1 %v4612_v12 }
 0x46f   :  { %3510 = vmatmul.mubr.msk.f32.vlgmr.msra.gmra.mrb[44].mxu1 %vm410_vm2, %v4503_v32  ;;  %v2250_v32 = vld [vmem:[#allocation2 + $0xa8] sm:$0xff] }
 0x470   :  { %3746 = vmatpush3.bf16.msra.mxu1 %v4612_v12  ;;  %3512 = vmatprep.mubr.msk.f32.mxu1 %vm410_vm2, %v4505_v37  ;;  %v2251_v37 = vld [vmem:[#allocation2 + $0xb0] sm:$0xff] }
 0x471   :  { %3749 = vmatprep.subr.msk.bf16.mxu1 %vm4490_vm4, %v4616_v20 }
 0x473   :  { %3513 = vmatmul.mubr.msk.f32.gmra.mrb[46].mxu1 %vm410_vm2, %v4511_v41  ;;  %v2252_v41 = vld [vmem:[#allocation2 + $0xb8] sm:$0xf] }
 0x474   :  { %3752 = vmatpush3.bf16.msk.msra.mxu1 %vm4490_vm4, %v4616_v20  ;;  %3523 = vmatprep.mubr.msk.f32.mxu1 %vm410_vm2, %v4535_v27  ;;  %v2465_v27 = vld [vmem:[#allocation2 + $0xc0] sm:$0xff] }
 0x475   :  { %3758 = vmatprep.subr.bf16.mxu1 %v4612_v12 }
 0x477   :  { %3524 = vmatmul.mubr.msk.f32.vlgmr.msra.gmra.mrb[48].mxu1 %vm410_vm2, %v4540_v28  ;;  %v3799_v28 = vpack.c.bf16 %v4445_v2, %v4440_v1  ;;  %v2468_v1 = vld [vmem:[#allocation2 + $0xd8] sm:$0xf]  ;;  %v2681_v2 = vld [vmem:[#allocation2 + $0xe0] sm:$0xff] }
 0x478   :  { %3760 = vmatpush3.bf16.msra.mxu1 %v4612_v12  ;;  %3526 = vmatprep.mubr.msk.f32.mxu1 %vm410_vm2, %v4542_v29  ;;  %v2466_v29 = vld [vmem:[#allocation2 + $0xc8] sm:$0xff] }
 0x479   :  { %3763 = vmatprep.subr.msk.bf16.mxu1 %vm4490_vm4, %v4616_v20 }
 0x47b   :  { %3527 = vmatmul.mubr.msk.f32.gmra.mrb[50].mxu1 %vm410_vm2, %v4549_v30  ;;  %v2467_v30 = vld [vmem:[#allocation2 + $0xd0] sm:$0xff] }
 0x47c   :  { %3766 = vmatpush3.bf16.msk.msra.mxu1 %vm4490_vm4, %v4616_v20  ;;  %3537 = vmatprep.mubr.msk.f32.mxu1 %vm410_vm2, %v4554_v31  ;;  %v3803_v31 = vpack.c.bf16 %v4463_v4, %v4453_v3  ;;  %v2683_v3 = vld [vmem:[#allocation2 + $0xf0] sm:$0xff]  ;;  %v2684_v4 = vld [vmem:[#allocation2 + $0xf8] sm:$0xf] }
 0x47d   :  { %3772 = vmatprep.subr.bf16.mxu1 %v4612_v12 }
 0x47f   :  { %3538 = vmatmul.mubr.msk.f32.vlgmr.msra.gmra.mrb[52].mxu1 %vm410_vm2, %v4563_v19  ;;  %v2682_v19 = vld [vmem:[#allocation2 + $0xe8] sm:$0xff] }
 0x480   :  { %3774 = vmatpush3.bf16.msra.mxu1 %v4612_v12  ;;  %3540 = vmatprep.mubr.msk.f32.mxu1 %vm410_vm2, %v4566_v34  ;;  %v2789_v34 = vld [vmem:[#allocation2 + $0x100] sm:$0xff] }
 0x481   :  { %3777 = vmatprep.subr.msk.bf16.mxu1 %vm4490_vm4, %v4616_v20 }
 0x483   :  { %3541 = vmatmul.mubr.msk.f32.gmra.mrb[54].mxu1 %vm410_vm2, %v4573_v35  ;;  %v2790_v35 = vld [vmem:[#allocation2 + $0x108] sm:$0xff] }
 0x484   :  { %3780 = vmatpush3.bf16.msk.msra.mxu1 %vm4490_vm4, %v4616_v20  ;;  %3551 = vmatprep.mubr.msk.f32.mxu1 %vm410_vm2, %v2249_v5 }
 0x485   :  { %3786 = vmatprep.subr.bf16.mxu1 %v4612_v12 }
 0x487   :  { %3552 = vmatmul.mubr.msk.f32.vlgmr.msra.gmra.mrb[56].mxu1 %vm410_vm2, %v2250_v32  ;;  %v3767_v32 = vpack.c.bf16 %v2138_v63, %v2136_v44 }
 0x488   :  { %3788 = vmatpush3.bf16.msra.mxu1 %v4612_v12  ;;  %3554 = vmatprep.mubr.msk.f32.mxu1 %vm410_vm2, %v2251_v37  ;;  %v1738_v12 = vld [vmem:[#allocation13 + $0x48] sm:$0xff] }
 0x489   :  { %3791 = vmatprep.subr.msk.bf16.mxu1 %vm4490_vm4, %v4616_v20  ;;  %v3739_v15 = vpack.c.bf16 %v1740_v13, %v1738_v12  ;;  %v2568_v12 = vld [vmem:[#allocation13 + $0xc8] sm:$0xff]  ;;  %v2570_v13 = vld [vmem:[#allocation13 + $0xd8] sm:$0xff] }
 0x48b   :  { %3555 = vmatmul.mubr.msk.f32.gmra.mrb[58].mxu1 %vm410_vm2, %v2252_v41  ;;  %3740 = vmatprep.subr.bf16.mxu0 %v3739_v15 }
 0x48c   :  { %3794 = vmatpush3.bf16.msk.msra.mxu1 %vm4490_vm4, %v4616_v20  ;;  %3565 = vmatprep.mubr.msk.f32.mxu1 %vm410_vm2, %v2465_v27 }
 0x48d   :  { %3800 = vmatprep.subr.bf16.mxu1 %v3799_v28 }
 0x48f   :  { %3566 = vmatmul.mubr.msk.f32.vlgmr.msra.gmra.mrb[60].mxu1 %vm410_vm2, %v2466_v29 }
 0x490   :  { %3802 = vmatpush3.bf16.msra.mxu1 %v3799_v28  ;;  %3568 = vmatprep.mubr.msk.f32.mxu1 %vm410_vm2, %v2467_v30  ;;  %v2135_v30 = vld [vmem:[#allocation13 + $0x80] sm:$0xff] }
 0x491   :  { %3805 = vmatprep.subr.msk.bf16.mxu1 %vm4490_vm4, %v3803_v31 }
 0x493   :  { %3569 = vmatmul.mubr.msk.f32.gmra.mrb[62].mxu1 %vm410_vm2, %v2468_v1 }
 0x494   :  { %3808 = vmatpush3.bf16.msk.msra.mxu1 %vm4490_vm4, %v3803_v31  ;;  %3579 = vmatprep.mubr.msk.f32.mxu1 %vm410_vm2, %v2681_v2  ;;  %v2352_v2 = vld [vmem:[#allocation13 + $0xa8] sm:$0xff] }
 0x495   :  { %3810 = vmatprep.subr.bf16.mxu1 %v3799_v28 }
 0x497   :  { %3580 = vmatmul.mubr.msk.f32.vlgmr.msra.gmra.mrb[64].mxu1 %vm410_vm2, %v2682_v19  ;;  %v2354_v19 = vld [vmem:[#allocation13 + $0xb8] sm:$0xff] }
 0x498   :  { %3812 = vmatpush3.bf16.msra.mxu1 %v3799_v28  ;;  %3582 = vmatprep.mubr.msk.f32.mxu1 %vm410_vm2, %v2683_v3 }
 0x499   :  { %3815 = vmatprep.subr.msk.bf16.mxu1 %vm4490_vm4, %v3803_v31 }
 0x49b   :  { %3583 = vmatmul.mubr.msk.f32.gmra.mrb[66].mxu1 %vm410_vm2, %v2684_v4 }
 0x49c   :  { %3818 = vmatpush3.bf16.msk.msra.mxu1 %vm4490_vm4, %v3803_v31  ;;  %3593 = vmatprep.mubr.msk.f32.mxu1 %vm410_vm2, %v2789_v34  ;;  %v2137_v31 = vld [vmem:[#allocation13 + $0x90] sm:$0xff]  ;;  %v3781_v34 = vpack.c.bf16 %v2354_v19, %v2352_v2 }
 0x49d   :  { %v3769_v4 = vpack.c.bf16 %v2137_v31, %v2135_v30 }
 0x49f   :  { %3594 = vmatmul.mubr.msk.f32.vlgmr.msra.gmra.mrb[68].mxu1 %vm410_vm2, %v2790_v35 }
 0x4a0   :  { %3596 = vmatprep.mubr.msk.f32.mxu1 %vm410_vm2, %v2791_v52 }
 0x4a3   :  { %3597 = vmatmul.mubr.msk.f32.gmra.mrb[70].mxu1 %vm410_vm2, %v2792_v0 }
 0x4a4   :  { %3128 = vmatprep.mubr.f32.mxu1 %v4220_v8 }
 0x52a   :  { %v1404_v16 = vpop.f32.mrb[32].mxu1 }
 0x52b   :  { %v4773_v17 = vadd.f32 %v4638_v42, %v1404_v16  ;;  %v1406_v18 = vpop.f32.mrb[33].mxu1  ;;  %v3783_v16 = vpack.c.bf16 %v2353_v11, %v2351_v59 }
 0x52c   :  { %v4776_v20 = vadd.f32 %v4641_v49, %v1406_v18  ;;  %v1739_v49 = vld [vmem:[#allocation13 + $0x50] sm:$0xff]  ;;  %v3795_v18 = vpack.c.bf16 %v2570_v13, %v2568_v12 }
 0x52d   :  { %v3741_v43 = vpack.c.bf16 %v1739_v49, %v1737_v47  ;;  %v3948_v49 = vld [vmem:[%s4923_s0] sm:$0xff] }
 0x52e   :  { %v1410_v21 = vpop.f32.mrb[34].mxu1 }
 0x52f   :  { %v4779_v23 = vadd.f32 %v4644_v14, %v1410_v21  ;;  %v1412_v24 = vpop.f32.mrb[35].mxu1 }
 0x530   :  { %v4782_v33 = vadd.f32 %v4647_v55, %v1412_v24 }
 0x532   :  { %v1416_v38 = vpop.f32.mrb[36].mxu1 }
 0x533   :  { %v4785_v40 = vadd.f32 %v4651_v26, %v1416_v38  ;;  %v1418_v36 = vpop.f32.mrb[37].mxu1  ;;  %v3753_v26 = vpack.c.bf16 %v1939_v46, %v1937_v53  ;;  %v3949_v46 = vld [vmem:[%s4923_s0 + $0x18] sm:$0xf] }
 0x534   :  { %v4788_v22 = vadd.f32 %v4656_v39, %v1418_v36  ;;  %v3947_v36 = vld [vmem:[%s4923_s0 + $0x8] sm:$0xff] }
 0x536   :  { %v1422_v42 = vpop.f32.mrb[38].mxu1 }
 0x537   :  { %v4791_v50 = vadd.f32 %v4663_v9, %v1422_v42  ;;  %v1424_v14 = vpop.f32.mrb[39].mxu1  ;;  %v1936_v9 = vld [vmem:[#allocation13 + $0x60] sm:$0xff] }
 0x538   :  { %v4794_v55 = vadd.f32 %v4670_v54, %v1424_v14  ;;  %v3755_v51 = vpack.c.bf16 %v1938_v61, %v1936_v9  ;;  %v2894_v61 = vld [vmem:[#allocation15] sm:$0xff] }
 0x53a   :  { %v3497_v56 = vpop.f32.mrb[40].mxu1 }
 0x53b   :  { %v1518_v57 = vpop.f32.mrb[41].mxu1 }
 0x53c   :  { %3238 = vmatmul.mubr.msk.f32.vlgmr.msra.gmra.mrb[16].mxu0 %vm1325_vm6, %v1518_v57  ;;  %v3950_v57 = vld [vmem:[%s4923_s0 + $0x10] sm:$0xff] }
 0x53d   :  { %3742 = vmatpush1.bf16.msra.mxu0 %v3741_v43  ;;  %1624 = vmatprep.mubr.f32.mxu0 %v4220_v8 }
 0x53e   :  { %v3500_v39 = vpop.f32.mrb[42].mxu1  ;;  %3754 = vmatprep.subr.bf16.mxu0 %v3753_v26 }
 0x53f   :  { %v1528_v45 = vpop.f32.mrb[43].mxu1 }
 0x540   :  { %3239 = vmatmul.mubr.msk.f32.gmra.mrb[18].mxu0 %vm1325_vm6, %v3497_v56 }
 0x541   :  { %1630 = vmatprep.mubr.f32.mxu0 %v4220_v8 }
 0x542   :  { %v3511_v48 = vpop.f32.mrb[44].mxu1 }
 0x543   :  { %v1717_v58 = vpop.f32.mrb[45].mxu1 }
 0x544   :  { %3240 = vmatmul.mubr.msk.f32.gmra.mrb[20].mxu0 %vm1325_vm6, %v1528_v45 }
 0x545   :  { %1636 = vmatprep.mubr.f32.mxu0 %v4220_v8 }
 0x546   :  { %v3514_v54 = vpop.f32.mrb[46].mxu1 }
 0x547   :  { %v1727_v62 = vpop.f32.mrb[47].mxu1 }
 0x548   :  { %3241 = vmatmul.mubr.msk.f32.gmra.mrb[22].mxu0 %vm1325_vm6, %v3500_v39 }
 0x549   :  { %1817 = vmatprep.mubr.f32.mxu0 %v4220_v8 }
 0x54a   :  { %v3525_v5 = vpop.f32.mrb[48].mxu1 }
 0x54b   :  { %v1916_v37 = vpop.f32.mrb[49].mxu1 }
 0x54c   :  { %3247 = vmatmul.mubr.msk.f32.vlgmr.msra.gmra.mrb[16].mxu0 %vm1325_vm6, %v1717_v58  ;;  %v2569_v58 = vld [vmem:[#allocation13 + $0xd0] sm:$0xff] }
 0x54d   :  { %3756 = vmatpush1.bf16.msra.mxu0 %v3755_v51  ;;  %1823 = vmatprep.mubr.f32.mxu0 %v4220_v8  ;;  %v2896_v51 = vcombine.high %v2894_v61, %v2894_v61 }
 0x54e   :  { %3768 = vmatprep.subr.bf16.mxu0 %v3767_v32  ;;  %v3528_v41 = vpop.f32.mrb[50].mxu1  ;;  %v3024_v32 = vld [vmem:[%s4935_s12 + $0x10] sm:$0xff] }
 0x54f   :  { %v1926_v27 = vpop.f32.mrb[51].mxu1 }
 0x550   :  { %3248 = vmatmul.mubr.msk.f32.gmra.mrb[18].mxu0 %vm1325_vm6, %v3511_v48  ;;  %v2567_v48 = vld [vmem:[#allocation13 + $0xc0] sm:$0xff] }
 0x551   :  { %1829 = vmatprep.mubr.f32.mxu0 %v4220_v8  ;;  %v3797_v63 = vpack.c.bf16 %v2569_v58, %v2567_v48 }
 0x552   :  { %v3539_v28 = vpop.f32.mrb[52].mxu1 }
 0x553   :  { %v2115_v29 = vpop.f32.mrb[53].mxu1 }
 0x554   :  { %3249 = vmatmul.mubr.msk.f32.gmra.mrb[20].mxu0 %vm1325_vm6, %v1727_v62 }
 0x555   :  { %1835 = vmatprep.mubr.f32.mxu0 %v4220_v8 }
 0x556   :  { %v3542_v1 = vpop.f32.mrb[54].mxu1 }
 0x557   :  { %v2125_v3 = vpop.f32.mrb[55].mxu1 }
 0x558   :  { %3250 = vmatmul.mubr.msk.f32.gmra.mrb[22].mxu0 %vm1325_vm6, %v3514_v54 }
 0x559   :  { %2016 = vmatprep.mubr.f32.mxu0 %v4220_v8 }
 0x55a   :  { %v4812_v35 = vpop.f32.mrb[56].mxu1 }
 0x55b   :  { %v2331_v52 = vpop.f32.mrb[57].mxu1 }
 0x55c   :  { %3256 = vmatmul.mubr.msk.f32.vlgmr.msra.gmra.mrb[16].mxu0 %vm1325_vm6, %v1916_v37  ;;  %v4222_v37 = vmov 0  }
 0x55d   :  { %3770 = vmatpush1.bf16.msra.mxu0 %v3769_v4  ;;  %2022 = vmatprep.mubr.f32.mxu0 %v4220_v8 }
 0x55e   :  { %3782 = vmatprep.subr.bf16.mxu0 %v3781_v34  ;;  %v3556_v0 = vpop.f32.mrb[58].mxu1  ;;  %3943 = vset.pattern.permute.xlu0 %v4222_v37 }
 0x55f   :  { %v2341_v6 = vpop.f32.mrb[59].mxu1  ;;  %3944 = vset.pattern.permute.xlu1 %v4222_v37 }
 0x560   :  { %3257 = vmatmul.mubr.msk.f32.gmra.mrb[18].mxu0 %vm1325_vm6, %v3525_v5  ;;  %v3022_v5 = vld [vmem:[%s4935_s12] sm:$0xff]  ;;  %3038 = vperm.xlu1 %3944, %v3024_v32  }
 0x561   :  { %2028 = vmatprep.mubr.f32.mxu0 %v4220_v8  ;;  %3028 = vperm.xlu0 %3943, %v3022_v5  }
 0x562   :  { %v3567_v7 = vpop.f32.mrb[60].mxu1 }
 0x563   :  { %v2547_v10 = vpop.f32.mrb[61].mxu1 }
 0x564   :  { %3258 = vmatmul.mubr.msk.f32.gmra.mrb[20].mxu0 %vm1325_vm6, %v1926_v27  ;;  %v3025_v27 = vld [vmem:[%s4935_s12 + $0x18] sm:$0xff] }
 0x565   :  { %2034 = vmatprep.mubr.f32.mxu0 %v4220_v8  ;;  %3043 = vperm.xlu1 %3944, %v3025_v27  }
 0x566   :  { %v3570_v60 = vpop.f32.mrb[62].mxu1 }
 0x567   :  { %v2557_v15 = vpop.f32.mrb[63].mxu1 }
 0x568   :  { %3259 = vmatmul.mubr.msk.f32.gmra.mrb[22].mxu0 %vm1325_vm6, %v3528_v41  ;;  %v3023_v41 = vld [vmem:[%s4935_s12 + $0x8] sm:$0xff] }
 0x569   :  { %2215 = vmatprep.mubr.f32.mxu0 %v4220_v8  ;;  %3033 = vperm.xlu0 %3943, %v3023_v41  }
 0x56a   :  { %v3581_v21 = vpop.f32.mrb[64].mxu1 }
 0x56b   :  { %v2765_v24 = vpop.f32.mrb[65].mxu1  ;;  %v2785_v42 = vmax.f32 %v3947_v36, %v3581_v21 }
 0x56c   :  { %3265 = vmatmul.mubr.msk.f32.vlgmr.msra.gmra.mrb[16].mxu0 %vm1325_vm6, %v2115_v29  ;;  %v2784_v14 = vmax.f32 %v3948_v49, %v2765_v24 }
 0x56d   :  { %3784 = vmatpush1.bf16.msra.mxu0 %v3783_v16  ;;  %2221 = vmatprep.mubr.f32.mxu0 %v4220_v8 }
 0x56e   :  { %3796 = vmatprep.subr.bf16.mxu0 %v3795_v18  ;;  %v3584_v38 = vpop.f32.mrb[66].mxu1 }
 0x56f   :  { %v2775_v47 = vpop.f32.mrb[67].mxu1  ;;  %v2787_v43 = vmax.f32 %v3949_v46, %v3584_v38 }
 0x570   :  { %3266 = vmatmul.mubr.msk.f32.gmra.mrb[18].mxu0 %vm1325_vm6, %v3539_v28  ;;  %v2786_v39 = vmax.f32 %v3950_v57, %v2775_v47 }
 0x571   :  { %2227 = vmatprep.mubr.f32.mxu0 %v4220_v8 }
 0x572   :  { %v3595_v53 = vpop.f32.mrb[68].mxu1 }
 0x573   :  { %v2891_v56 = vmax.f32 %v2785_v42, %v3595_v53  ;;  %v2871_v26 = vpop.f32.mrb[69].mxu1 }
 0x574   :  { %3267 = vmatmul.mubr.msk.f32.gmra.mrb[20].mxu0 %vm1325_vm6, %v2125_v3  ;;  %v2890_v45 = vmax.f32 %v2784_v14, %v2871_v26 }
 0x575   :  { %2233 = vmatprep.mubr.f32.mxu0 %v4220_v8 }
 0x576   :  { %v3598_v9 = vpop.f32.mrb[70].mxu1 }
 0x577   :  { %v2893_v54 = vmax.f32 %v2787_v43, %v3598_v9  ;;  %v2881_v62 = vpop.f32.mrb[71].mxu1 }
 0x578   :  { %3268 = vmatmul.mubr.msk.f32.gmra.mrb[22].mxu0 %vm1325_vm6, %v3542_v1  ;;  %v2892_v44 = vmax.f32 %v2786_v39, %v2881_v62 }
 0x579   :  { %2431 = vmatprep.mubr.f32.mxu0 %v4220_v8 }
 0x57c   :  { %3274 = vmatmul.mubr.msk.f32.vlgmr.msra.gmra.mrb[16].mxu0 %vm1325_vm6, %v2331_v52 }
 0x57d   :  { %3798 = vmatpush1.bf16.msra.mxu0 %v3797_v63  ;;  %2437 = vmatprep.mubr.f32.mxu0 %v4220_v8 }
 0x57e   :  { %3297 = vmatprep.subr.msk.mxu0 %vm211_vm0, %v2896_v51 }
 0x580   :  { %3275 = vmatmul.mubr.msk.f32.gmra.mrb[18].mxu0 %vm1325_vm6, %v4812_v35 }
 0x581   :  { %2443 = vmatprep.mubr.f32.mxu0 %v4220_v8 }
 0x584   :  { %3276 = vmatmul.mubr.msk.f32.gmra.mrb[20].mxu0 %vm1325_vm6, %v2341_v6 }
 0x585   :  { %2449 = vmatprep.mubr.f32.mxu0 %v4220_v8 }
 0x588   :  { %3277 = vmatmul.mubr.msk.f32.gmra.mrb[22].mxu0 %vm1325_vm6, %v3556_v0 }
 0x589   :  { %2647 = vmatprep.mubr.f32.mxu0 %v4220_v8 }
 0x58c   :  { %3283 = vmatmul.mubr.msk.f32.vlgmr.msra.gmra.mrb[16].mxu0 %vm1325_vm6, %v2547_v10 }
 0x58d   :  { %3298 = vmatpush1.msk.msra.mxu0 %vm211_vm0, %v2894_v61  ;;  %2653 = vmatprep.mubr.f32.mxu0 %v4220_v8 }
 0x590   :  { %3284 = vmatmul.mubr.msk.f32.gmra.mrb[18].mxu0 %vm1325_vm6, %v3567_v7 }
 0x591   :  { %2659 = vmatprep.mubr.f32.mxu0 %v4220_v8 }
 0x594   :  { %3285 = vmatmul.mubr.msk.f32.gmra.mrb[20].mxu0 %vm1325_vm6, %v2557_v15 }
 0x595   :  { %2665 = vmatprep.mubr.f32.mxu0 %v4220_v8 }
 0x598   :  { %3286 = vmatmul.mubr.msk.f32.gmra.mrb[22].mxu0 %vm1325_vm6, %v3570_v60 }
 0x599   :  { %2977 = vmatprep.mubr.f32.mxu0 %v4220_v8 }
 0x59c   :  { %3299 = vmatmul.mubr.msk.f32.vlgmr.msra.gmra.mrb[16].mxu0 %vm198_vm1, %v2890_v45 }
 0x59d   :  { %2983 = vmatprep.mubr.f32.mxu0 %v4220_v8 }
 0x5a0   :  { %3300 = vmatmul.mubr.msk.f32.gmra.mrb[18].mxu0 %vm198_vm1, %v2891_v56 }
 0x5a1   :  { %2989 = vmatprep.mubr.f32.mxu0 %v4220_v8 }
 0x5a4   :  { %3301 = vmatmul.mubr.msk.f32.gmra.mrb[20].mxu0 %vm198_vm1, %v2892_v44 }
 0x5a5   :  { %2995 = vmatprep.mubr.f32.mxu0 %v4220_v8 }
 0x5a8   :  { %3302 = vmatmul.mubr.msk.f32.gmra.mrb[22].mxu0 %vm198_vm1, %v2893_v54 }
 0x5df   :  { %v3039_v43 = vpop.permute.xlu1 %3038 }
 0x5e0   :  { %v3029_v25 = vpop.permute.xlu0 %3028 }
 0x5e4   :  { %v3044_v61 = vpop.permute.xlu1 %3043 }
 0x5e8   :  { %v3034_v42 = vpop.permute.xlu0 %3033 }
 0x66f   :  { %v2979_v28 = vpop.f32.mrb[16].mxu0 }
 0x670   :  { %v3833_v29 = vadd.f32 %v4773_v17, %v2979_v28  ;;  %v2981_v30 = vpop.f32.mrb[17].mxu0 }
 0x671   :  { %v3838_v31 = vadd.f32 %v4776_v20, %v2981_v30 }
 0x672   :  { %v3010_v4 = vmax.f32 %v3833_v29, 0.0 }
 0x673   :  { %v2985_v1 = vpop.f32.mrb[18].mxu0  ;;  %v3011_v35 = vmax.f32 %v3838_v31, 0.0 }
 0x674   :  { %v3843_v2 = vadd.f32 %v4779_v23, %v2985_v1  ;;  %v2987_v19 = vpop.f32.mrb[19].mxu0 }
 0x675   :  { %v3848_v3 = vadd.f32 %v4782_v33, %v2987_v19 }
 0x676   :  { %v3012_v34 = vmax.f32 %v3843_v2, 0.0 }
 0x677   :  { %v3013_v52 = vmax.f32 %v3848_v3, 0.0  ;;  %v2991_v0 = vpop.f32.mrb[20].mxu0 }
 0x678   :  { %v3821_v6 = vpack.c.bf16 %v3012_v34, %v3010_v4  ;;  %v3853_v7 = vadd.f32 %v4785_v40, %v2991_v0  ;;  %v2993_v10 = vpop.f32.mrb[21].mxu0  ;;  %v3018_v40 = vld [vmem:[#allocation18] sm:$0xff] }
 0x679   :  { %v3819_v59 = vpack.c.bf16 %v3013_v52, %v3011_v35  ;;  %v3858_v17 = vadd.f32 %v4788_v22, %v2993_v10  ;;  %v3019_v22 = vld [vmem:[#allocation18 + $0x8] sm:$0xff] }
 0x67a   :  { %v3014_v60 = vmax.f32 %v3853_v7, 0.0 }
 0x67b   :  { %v2997_v11 = vpop.f32.mrb[22].mxu0  ;;  %3820 = vmatprep.subr.bf16.mxu1 %v3819_v59  ;;  %v3015_v13 = vmax.f32 %v3858_v17, 0.0 }
 0x67c   :  { %v3863_v20 = vadd.f32 %v4791_v50, %v2997_v11  ;;  %v2999_v23 = vpop.f32.mrb[23].mxu0  ;;  %3822 = vmatpush1.bf16.msra.mxu1 %v3821_v6  ;;  %v3020_v50 = vld [vmem:[#allocation18 + $0x10] sm:$0xff] }
 0x67d   :  { %v3868_v33 = vadd.f32 %v4794_v55, %v2999_v23  ;;  %v3021_v55 = vld [vmem:[#allocation18 + $0x18] sm:$0xff] }
 0x67e   :  { %v3016_v12 = vmax.f32 %v3863_v20, 0.0 }
 0x67f   :  { %v3017_v15 = vmax.f32 %v3868_v33, 0.0 }
 0x680   :  { %v3826_v16 = vpack.c.bf16 %v3016_v12, %v3014_v60 }
 0x681   :  { %v3823_v18 = vpack.c.bf16 %v3017_v15, %v3015_v13 }
 0x683   :  { %3825 = vmatprep.subr.msk.bf16.mxu1 %vm4490_vm4, %v3823_v18 }
 0x684   :  { %3828 = vmatpush1.bf16.msk.msra.mxu1 %vm4490_vm4, %v3826_v16 }
 0x687   :  { %3305 = vmatmul.mubr.msk.f32.vlgmr.msra.gmra.mrb[72].mxu1 %vm410_vm2, %v3018_v40 }
 0x688   :  { %3134 = vmatprep.mubr.f32.mxu1 %v4220_v8 }
 0x68b   :  { %3306 = vmatmul.mubr.msk.f32.gmra.mrb[74].mxu1 %vm410_vm2, %v3019_v22 }
 0x68c   :  { %3140 = vmatprep.mubr.f32.mxu1 %v4220_v8 }
 0x68f   :  { %3307 = vmatmul.mubr.msk.f32.gmra.mrb[76].mxu1 %vm410_vm2, %v3020_v50 }
 0x690   :  { %3146 = vmatprep.mubr.f32.mxu1 %v4220_v8 }
 0x693   :  { %3308 = vmatmul.mubr.msk.f32.gmra.mrb[78].mxu1 %vm410_vm2, %v3021_v55 }
 0x75a   :  { %v3130_v21 = vpop.f32.mrb[72].mxu1 }
 0x75b   :  { %v3131_v24 = vadd.f32 %v3130_v21, %v3029_v25  ;;  %v3132_v38 = vpop.f32.mrb[73].mxu1 }
 0x75c   :  { %v3133_v36 = vadd.f32 %v3132_v38, %v3029_v25 }
 0x75d   :  { %v3153_v47 = vmax.f32 %v3131_v24, 0.0 }
 0x75e   :  { %v3154_v49 = vmax.f32 %v3133_v36, 0.0  ;;  %v3136_v14 = vpop.f32.mrb[74].mxu1 }
 0x75f   :  { %3161 = vst [vmem:[%s4936_s13] sm:$0xff] %v3153_v47  ;;  %v3137_v53 = vadd.f32 %v3136_v14, %v3034_v42  ;;  %v3138_v46 = vpop.f32.mrb[75].mxu1 }
 0x760   :  { %3162 = vst [vmem:[%s4936_s13 + $0x8] sm:$0xff] %v3154_v49  ;;  %v3139_v8 = vadd.f32 %v3138_v46, %v3034_v42 }
 0x761   :  { %v3155_v56 = vmax.f32 %v3137_v53, 0.0 }
 0x762   :  { %v3156_v26 = vmax.f32 %v3139_v8, 0.0  ;;  %v3142_v57 = vpop.f32.mrb[76].mxu1 }
 0x763   :  { %3163 = vst [vmem:[%s4936_s13 + $0x10] sm:$0xff] %v3155_v56  ;;  %v3143_v39 = vadd.f32 %v3142_v57, %v3039_v43  ;;  %v3144_v45 = vpop.f32.mrb[77].mxu1 }
 0x764   :  { %3164 = vst [vmem:[%s4936_s13 + $0x18] sm:$0xff] %v3156_v26  ;;  %v3145_v48 = vadd.f32 %v3144_v45, %v3039_v43 }
 0x765   :  { %v3157_v58 = vmax.f32 %v3143_v39, 0.0 }
 0x766   :  { %v3158_v9 = vmax.f32 %v3145_v48, 0.0  ;;  %v3148_v54 = vpop.f32.mrb[78].mxu1 }
 0x767   :  { %3165 = vst [vmem:[%s4936_s13 + $0x20] sm:$0xff] %v3157_v58  ;;  %v3149_v62 = vadd.f32 %v3148_v54, %v3044_v61  ;;  %v3150_v44 = vpop.f32.mrb[79].mxu1 }
 0x768   :  { %3166 = vst [vmem:[%s4936_s13 + $0x28] sm:$0xff] %v3158_v9  ;;  %v3151_v63 = vadd.f32 %v3150_v44, %v3044_v61 }
 0x769   :  { %v3159_v51 = vmax.f32 %v3149_v62, 0.0 }
 0x76a   :  { %v3160_v5 = vmax.f32 %v3151_v63, 0.0 }
 0x76b   :  { %3167 = vst [vmem:[%s4936_s13 + $0x30] sm:$0xff] %v3159_v51 }
 0x76c   :  { %3168 = vst [vmem:[%s4936_s13 + $0x38] sm:$0xff] %v3160_v5 }
 0x76d   :  { %3173 = vsyncpa [#allocation3], 1 }
 0x76e   :  { %3174 = vsyncpa [#allocation5], 1 }
 0x76f   :  { %3175 = vsyncpa [#allocation8], 1 }
 0x770   :  { %3176 = vsyncpa [#allocation11], 1 }
 0x771   :  { %3177 = vsyncpa [#allocation14], 1 }
 0x772   :  { %3178 = vsyncpa [#allocation17], 1 }

// kernel: forward.5
= control target key start
LH: loop header
LB: loop body
LE: loop exit
PB: predicated region body
PF: predicated region fallthrough
CT: control target
= control target key end

     0   :  { %10 = vsyncpa [#allocation4], 0  ;;  %s5320_s0 = inlined_call_operand.vmem [shape: bf16[2,8448], index: 0, kind: input, shape index: {}]   ;;  %s5321_s1 = inlined_call_operand.hbm [shape: bf16[8448,256], index: 1, kind: input, shape index: {}]   ;;  %s5322_s2 = inlined_call_operand.hbm [shape: f32[1,256], index: 2, kind: input, shape index: {}]   ;;  %s5323_s3 = inlined_call_operand.vmem [shape: f32[256,4], index: 3, kind: input, shape index: {}]   ;;  %s5324_s4 = inlined_call_operand.hbm [shape: f32[1,4], index: 4, kind: input, shape index: {}]   ;;  %s5325_s5 = inlined_call_operand.hbm [shape: f32[2,4], index: 5, kind: output, shape index: {}]  }
   0x1   :  { %12 = vsyncpa [#allocation4 + $0x1], 0 }
   0x2   :  { %13 = vsyncpa [#allocation7], 0 }
   0x3   :  { %14 = vsyncpa [#allocation5], 0  ;;  %s4542_s18 = smov 0   ;;  %s4544_s19 = smov 0  }
   0x4   :  { %s4546_s20 = smov 0   ;;  %s4548_s21 = smov 0  }
   0x5 LB: > { %s4561_s22 = sadd.s32 4294967295, %s4501_s21   ;;  %s4564_s23 = sadd.s32 1, %s4501_s21   ;;  %s4501_s21 = sphi %s4548_s21, %s5344_s21   ;;  %s4497_s20 = sphi %s4546_s20, %s5343_s20   ;;  %s4493_s19 = sphi %s4544_s19, %s5342_s19   ;;  %s4489_s18 = sphi %s4542_s18, %s5341_s18  }
   0x6   : > { %s50_s24 = ssub.s32 %s4501_s21, %s4564_s23  ;;  %s53_s25 = sadd.s32 1, %s4497_s20 }
   0x7   : > { %p51_p0 = scmp.eq.s32.totalorder %s50_s24, 0  ;;  %p60_p1 = scmp.ne.s32.totalorder %s4497_s20, %s4493_s19 }
   0x8   : > { %p61_p2 = scmp.eq.s32.totalorder %s4501_s21, 0  ;;  %p66_p3 = scmp.ne.s32.totalorder %s4493_s19, %s4489_s18 }
   0x9   : > { %s4574_s26 = scalar_select %p51_p0, %s4497_s20, %s53_s25  }
   0xa   : > { %p4576_p4 = por %p61_p2, %p60_p1  ;;  %p5326_p5 = scmp.eq.s32.totalorder %s4561_s22, 0 }
   0xb   : > { %p3266_p6 = scmp.ge.s32.totalorder %s4501_s21, 1  ;;  %p161_p7 = scmp.lt.s32.totalorder %s4501_s21, 4 }
   0xc   : > { %p4585_p8 = por %p5326_p5, %p66_p3  ;;  %s4503_s30 = smov [#allocation6]  }
   0xd   : > { %p4590_p10 = pnand %p3266_p6, %p161_p7  ;;  %s174_s6 = sshll.u32 %s4503_s30, 4  ;;  %s175_s6 = int_to_ptr.vmem [resolvable:$true] %s174_s6 }
   0xe   : > { %s5331_s28 = scalar_select %p4585_p8, 1, 0 }
   0xf   : > { %s5332_s29 = scalar_select %p4590_p10, 1, 0 }
  0x10   : > { %p3758_p11 = pneg %p4590_p10  ;;  %p3771_p12 = scmp.lt.s32.totalorder %s4501_s21, 3 }
  0x11   : > { %s4504_s8 = smov [#allocation8]   ;;  %s207_s11 = sand.u32 1, %s4497_s20  }
  0x12   : > { %p4599_p13 = pnand %p3758_p11, %p5326_p5  ;;  %s188_s9 = sshll.u32 %s4504_s8, 4  ;;  %s4609_s9 = int_to_ptr.vmem [resolvable:$true] %s188_s9 }
  0x13   : > { %p4605_p0 = pnand %p3771_p12, %p4576_p4  ;;  %s4347_s14 = scalar_lea.hbm %s5322_s2, 32 }
  0x14   : > { %p4348_p1 = scmp.ne.s32.totalorder %s5322_s2, %s4347_s14  ;;  %p4349_p2 = pneg %p4599_p13 }
  0x15   : > { %s5334_s10 = scalar_select %p4605_p0, 1, 0 }
  0x16   : > { %p4350_p3 = pnand %p4349_p2, %p4348_p1  ;;  %p4354_p6 = scmp.lt.u32.totalorder %s4347_s14, %s5322_s2 }
  0x18   : > { %p4351_p4 = pneg %p4350_p3 }
  0x1a   : > { %p4356_p7 = pnand %p4354_p6, %p4351_p4 }
  0x1c   : > { %4359 = shalt.err (!%p4356_p7)
}
  0x1d   : > { %s4360_s24 = scalar_lea.vmem %s175_s6, 32  ;;  %p4368_p5 = scmp.lt.s32.totalorder %s175_s6, %s175_s6 }
  0x1e   : > { %p4361_p11 = scmp.ne.s32.totalorder %s175_s6, %s4360_s24  ;;  %p4369_p8 = scmp.lt.s32.totalorder %s4360_s24, %s4360_s24 }
  0x20   : > { %p4363_p12 = pnand %p4361_p11, %p4349_p2  ;;  %p4370_p10 = por %p4369_p8, %p4368_p5 }
  0x22   : > { %p4364_p9 = pneg %p4363_p12 }
  0x24   : > { %p4371_p0 = pnand %p4370_p10, %p4364_p9 }
  0x26   : > { %4374 = shalt.err (!%p4371_p0)
}
  0x27   : > { %3761 = dma.hbm_to_vmem [thread:$0]  (!%p4599_p13), %s5322_s2, 32, %s175_s6, [#allocation7]  }
  0x28   : > { %s4375_s12 = scalar_lea.hbm %s5324_s4, 16 }
  0x29   : > { %p4376_p1 = scmp.ne.s32.totalorder %s5324_s4, %s4375_s12  ;;  %p4382_p9 = scmp.lt.u32.totalorder %s4375_s12, %s5324_s4 }
  0x2b   : > { %p4378_p5 = pnand %p4376_p1, %p4349_p2 }
  0x2d   : > { %p4379_p8 = pneg %p4378_p5 }
  0x2f   : > { %p4384_p10 = pnand %p4382_p9, %p4379_p8 }
  0x31   : > { %4387 = shalt.err (!%p4384_p10)
}
  0x32   : > { %s4388_s6 = scalar_lea.vmem %s4609_s9, 16  ;;  %s4395_s17 = scalar_lea.vmem %s4609_s9, 32 }
  0x33   : > { %p4389_p0 = scmp.ne.s32.totalorder %s4609_s9, %s4388_s6  ;;  %p4396_p6 = scmp.lt.s32.totalorder %s4609_s9, %s4609_s9 }
  0x34   : > { %p4397_p7 = scmp.lt.s32.totalorder %s4395_s17, %s4388_s6 }
  0x35   : > { %p4391_p3 = pnand %p4389_p0, %p4349_p2 }
  0x36   : > { %p4398_p11 = por %p4397_p7, %p4396_p6 }
  0x37   : > { %p4392_p4 = pneg %p4391_p3 }
  0x39   : > { %p4399_p12 = pnand %p4398_p11, %p4392_p4 }
  0x3b   : > { %4402 = shalt.err (!%p4399_p12)
}
  0x3c   : > { %3764 = dma.hbm_to_vmem [thread:$0]  (!%p4599_p13), %s5324_s4, 16, %s4609_s9, [#allocation7]  }
  0x3d   : > { %s3742_s25 = smul.u32 2816, %s207_s11  ;;  %s4672_s14 = scalar_lea.sflag [#allocation4], %s207_s11 }
  0x3e   : > { %s3636_s27 = smul.u32 45056, %s4501_s21  ;;  %p5335_p2 = scmp.ne.s32.totalorder %s5334_s10, 0 }
  0x3f   : > { %s211_s7 = scalar_lea.vmem [#allocation3], %s3742_s25  ;;  %s4408_s16 = scalar_lea.hbm %s5321_s1, 135168 }
  0x40   : > { %s4666_s12 = scalar_lea.hbm %s5321_s1, %s3636_s27  ;;  %s219_s13 = sshll.u32 %s211_s7, 4  ;;  %s4668_s13 = int_to_ptr.vmem [resolvable:$true] %s219_s13 }
  0x41   : > { %s4403_s9 = scalar_lea.hbm %s4666_s12, 45056  ;;  %p4405_p1 = pneg %p5335_p2 }
  0x42   : > { %p4404_p13 = scmp.ne.s32.totalorder %s4666_s12, %s4403_s9  ;;  %p4409_p9 = scmp.lt.u32.totalorder %s4666_s12, %s5321_s1 }
  0x43   : > { %p4410_p10 = scmp.lt.u32.totalorder %s4408_s16, %s4403_s9  ;;  %p4412_p3 = scmp.lt.u32.totalorder %s4403_s9, %s4666_s12 }
  0x44   : > { %p4406_p5 = pnand %p4405_p1, %p4404_p13 }
  0x45   : > { %p4411_p0 = por %p4410_p10, %p4409_p9 }
  0x46   : > { %p4407_p8 = pneg %p4406_p5 }
  0x47   : > { %p4413_p4 = por %p4412_p3, %p4411_p0 }
  0x49   : > { %p4414_p6 = pnand %p4413_p4, %p4407_p8 }
  0x4b   : > { %4417 = shalt.err (!%p4414_p6)
}
  0x4c   : > { %s4418_s11 = scalar_lea.vmem %s4668_s13, 45056  ;;  %s4505_s18 = smov [#allocation3]  }
  0x4d   : > { %p4419_p7 = scmp.ne.s32.totalorder %s4668_s13, %s4418_s11  ;;  %s4423_s24 = sshll.u32 %s4505_s18, 4  ;;  %s4424_s24 = int_to_ptr.vmem [resolvable:$false] %s4423_s24 }
  0x4e   : > { %s4425_s25 = scalar_lea.vmem %s4424_s24, 90112  ;;  %p4426_p13 = scmp.lt.s32.totalorder %s4668_s13, %s4424_s24 }
  0x4f   : > { %p4421_p11 = pnand %p4419_p7, %p4405_p1  ;;  %p4427_p5 = scmp.lt.s32.totalorder %s4425_s25, %s4418_s11 }
  0x51   : > { %p4422_p12 = pneg %p4421_p11  ;;  %p4428_p9 = por %p4427_p5, %p4426_p13 }
  0x53   : > { %p4429_p10 = pnand %p4428_p9, %p4422_p12 }
  0x55   : > { %4432 = shalt.err (!%p4429_p10)
}
  0x56   : > { %s4506_s27 = smov 128   ;;  %s4507_s30 = smov 8  }
  0x57   : > { %3768 = dma.hbm_to_vmem [thread:$0]  (!%p5335_p2), %s4666_s12, 45056, %s4668_s13, %s4672_s14, %s4506_s27, %s4506_s27, %s4507_s30  }
  0x58   : > { %p5336_p1 = scmp.ne.s32.totalorder %s5332_s29, 0 }
  0x59   : > { %s233_s8 = sand.u32 (!%p5336_p1), 1, %s4493_s19   ;;  %p5337_p8 = scmp.ne.s32.totalorder (!%p5336_p1), %s5331_s28, 0 }
  0x5a   : > { %231 = sbr.rel (%p5336_p1) target bundleno = 977 (0x3d1), region = 40  ;;  %s234_s9 = scalar_lea.sflag (!%p5336_p1), [#allocation4], %s233_s8 }
  0x5b   : > { %s3743_s7 = smul.u32 (!%p5336_p1), 2816, %s233_s8 }
  0x5d   : > { %s4703_s21 = scalar_lea.vmem (!%p5336_p1), [#allocation3], %s3743_s7 }
  0x61   : > { %4476 = dma.done.wait (%p5337_p8), %s234_s9, 45056  }
  0x62   : > { %4478 = vsyncadd (%p5337_p8), %s234_s9, 4294922240  ;;  %p5338_p0 = scmp.eq.s32.totalorder %s4561_s22, 0 }
  0x64   : > { %4480 = dma.done.wait (%p5338_p0), [#allocation7], 48   ;;  %p5339_p2 = pmov %p5338_p0 }
  0x65   : > { %s271_s29 = smul.u32 22, %s4561_s22  ;;  %p5340_p4 = scmp.ne.s32.totalorder %s4561_s22, 0 }
  0x66   : > { %4482 = vsyncadd (%p5339_p2), [#allocation7], 4294967248  ;;  %v4508_v0 = vmov (!%p5340_p4), 0.0  }
  0x67   : > { %p272_p3 = scmp.lt.s32.totalorder %s271_s29, 65  ;;  %280 = sbr.rel (%p5340_p4) target bundleno = 110 (0x6e), region = 56  ;;  %281 = vst [vmem:[#allocation2] sm:$0xf] (!%p5340_p4), %v4508_v0 }
  0x69   : > { %s5346_s29 = smov (!%p272_p3, %s271_s29), 65 }
  0x6a   : > { %s4717_s13 = scalar_lea.vmem %s5320_s0, %s5346_s29 }
  0x6e PF: > { %v3816_v1 = vld [vmem:[%s4703_s21 + $0x4] ss:$8 sps:$4 sm:$0xff]   ;;  %v3820_v3 = vld [vmem:[%s4703_s21] ss:$8 sps:$4 sm:$0xff]   ;;  %v3822_v5 = vld [vmem:[%s4703_s21 + $0x14] ss:$8 sps:$4 sm:$0xff]   ;;  %v645_v41 = vlaneseq }
  0x6f   : > { %v3818_v2 = vld [vmem:[%s4703_s21 + $0x504] ss:$8 sps:$4 sm:$0xff]   ;;  %2568 = vmatprep.subr.bf16.mxu1 %v3816_v1  ;;  %v3821_v4 = vld [vmem:[%s4703_s21 + $0x500] ss:$8 sps:$4 sm:$0xff]   ;;  %v3824_v6 = vld [vmem:[%s4703_s21 + $0x514] ss:$8 sps:$4 sm:$0xff]  }
  0x70   : > { %2773 = vmatprep.subr.bf16.mxu0 %v3818_v2  ;;  %2569 = vmatpush1.bf16.msra.mxu1 %v3820_v3  ;;  %v3826_v7 = vld [vmem:[%s4703_s21 + $0x10] ss:$8 sps:$4 sm:$0xff]   ;;  %v3828_v9 = vld [vmem:[%s4703_s21 + $0x24] ss:$8 sps:$4 sm:$0xff]   ;;  %v3832_v11 = vld [vmem:[%s4703_s21 + $0x20] ss:$8 sps:$4 sm:$0xff]  }
  0x71   : > { %2774 = vmatpush1.bf16.msra.mxu0 %v3821_v4  ;;  %2570 = vmatprep.subr.bf16.mxu1 %v3822_v5  ;;  %v3827_v8 = vld [vmem:[%s4703_s21 + $0x510] ss:$8 sps:$4 sm:$0xff]   ;;  %v3830_v10 = vld [vmem:[%s4703_s21 + $0x524] ss:$8 sps:$4 sm:$0xff]   ;;  %v3833_v12 = vld [vmem:[%s4703_s21 + $0x520] ss:$8 sps:$4 sm:$0xff]  }
  0x72   : > { %2775 = vmatprep.subr.bf16.mxu0 %v3824_v6  ;;  %v3834_v13 = vld [vmem:[%s4703_s21 + $0x34] ss:$8 sps:$4 sm:$0xff]   ;;  %v3838_v15 = vld [vmem:[%s4703_s21 + $0x30] ss:$8 sps:$4 sm:$0xff]   ;;  %v3840_v17 = vld [vmem:[%s4703_s21 + $0x44] ss:$8 sps:$4 sm:$0xff]  }
  0x73   : > { %v3836_v14 = vld [vmem:[%s4703_s21 + $0x534] ss:$8 sps:$4 sm:$0xff]   ;;  %v3839_v16 = vld [vmem:[%s4703_s21 + $0x530] ss:$8 sps:$4 sm:$0xff]   ;;  %v3842_v18 = vld [vmem:[%s4703_s21 + $0x544] ss:$8 sps:$4 sm:$0xff]  }
  0x74   : > { %2571 = vmatpush1.bf16.msra.mxu1 %v3826_v7  ;;  %v3844_v19 = vld [vmem:[%s4703_s21 + $0x40] ss:$8 sps:$4 sm:$0xff]   ;;  %v3846_v21 = vld [vmem:[%s4703_s21 + $0x54] ss:$8 sps:$4 sm:$0xff]   ;;  %v3850_v23 = vld [vmem:[%s4703_s21 + $0x50] ss:$8 sps:$4 sm:$0xff]  }
  0x75   : > { %2776 = vmatpush1.bf16.msra.mxu0 %v3827_v8  ;;  %2572 = vmatprep.subr.bf16.mxu1 %v3828_v9  ;;  %v3845_v20 = vld [vmem:[%s4703_s21 + $0x540] ss:$8 sps:$4 sm:$0xff]   ;;  %v3848_v22 = vld [vmem:[%s4703_s21 + $0x554] ss:$8 sps:$4 sm:$0xff]   ;;  %v3851_v24 = vld [vmem:[%s4703_s21 + $0x550] ss:$8 sps:$4 sm:$0xff]  }
  0x76   : > { %2777 = vmatprep.subr.bf16.mxu0 %v3830_v10  ;;  %v3852_v25 = vld [vmem:[%s4703_s21 + $0x64] ss:$8 sps:$4 sm:$0xff]   ;;  %v3856_v27 = vld [vmem:[%s4703_s21 + $0x60] ss:$8 sps:$4 sm:$0xff]   ;;  %v3858_v29 = vld [vmem:[%s4703_s21 + $0x74] ss:$8 sps:$4 sm:$0xff]  }
  0x77   : > { %v3854_v26 = vld [vmem:[%s4703_s21 + $0x564] ss:$8 sps:$4 sm:$0xff]   ;;  %v3857_v28 = vld [vmem:[%s4703_s21 + $0x560] ss:$8 sps:$4 sm:$0xff]   ;;  %v3860_v30 = vld [vmem:[%s4703_s21 + $0x574] ss:$8 sps:$4 sm:$0xff]  }
  0x78   : > { %2573 = vmatpush1.bf16.msra.mxu1 %v3832_v11  ;;  %v3862_v31 = vld [vmem:[%s4703_s21 + $0x70] ss:$8 sps:$4 sm:$0xff]   ;;  %v3864_v33 = vld [vmem:[%s4703_s21 + $0x84] ss:$8 sps:$4 sm:$0xff]   ;;  %v3868_v35 = vld [vmem:[%s4703_s21 + $0x80] ss:$8 sps:$4 sm:$0xff]  }
  0x79   : > { %2778 = vmatpush1.bf16.msra.mxu0 %v3833_v12  ;;  %2574 = vmatprep.subr.bf16.mxu1 %v3834_v13  ;;  %v3863_v32 = vld [vmem:[%s4703_s21 + $0x570] ss:$8 sps:$4 sm:$0xff]   ;;  %v3866_v34 = vld [vmem:[%s4703_s21 + $0x584] ss:$8 sps:$4 sm:$0xff]   ;;  %v3869_v36 = vld [vmem:[%s4703_s21 + $0x580] ss:$8 sps:$4 sm:$0xff]  }
  0x7a   : > { %2779 = vmatprep.subr.bf16.mxu0 %v3836_v14  ;;  %v3870_v37 = vld [vmem:[%s4703_s21 + $0x94] ss:$8 sps:$4 sm:$0xff]   ;;  %v4509_v39 = vmov 1966171168   ;;  %v3874_v42 = vld [vmem:[%s4703_s21 + $0x90] ss:$8 sps:$4 sm:$0xff]  }
  0x7b   : > { %v3872_v38 = vld [vmem:[%s4703_s21 + $0x594] ss:$8 sps:$4 sm:$0xff]   ;;  %v643_v40 = vunpack.c.l.s4 %v4509_v39  ;;  %v3875_v43 = vld [vmem:[%s4703_s21 + $0x590] ss:$8 sps:$4 sm:$0xff]   ;;  %v3876_v44 = vld [vmem:[%s4703_s21 + $0xa4] ss:$8 sps:$4 sm:$0xff]  }
  0x7c   : > { %2575 = vmatpush1.bf16.msra.mxu1 %v3838_v15  ;;  %v3878_v45 = vld [vmem:[%s4703_s21 + $0x5a4] ss:$8 sps:$4 sm:$0xff]   ;;  %v4763_v47 = vshrl.u32 %v645_v41, 7  ;;  %v3880_v48 = vld [vmem:[%s4703_s21 + $0xa0] ss:$8 sps:$4 sm:$0xff]   ;;  %p3628_p6 = scmp.ne.s32.totalorder %s4561_s22, 2 }
  0x7d   : > { %2780 = vmatpush1.bf16.msra.mxu0 %v3839_v16  ;;  %2576 = vmatprep.subr.bf16.mxu1 %v3840_v17  ;;  %v644_v46 = vunpack.c.0.s8 %v643_v40  ;;  %v3881_v49 = vld [vmem:[%s4703_s21 + $0x5a0] ss:$8 sps:$4 sm:$0xff]   ;;  %v3882_v50 = vld [vmem:[%s4703_s21 + $0xb4] ss:$8 sps:$4 sm:$0xff]   ;;  %v3886_v54 = vld [vmem:[%s4703_s21 + $0xb0] ss:$8 sps:$4 sm:$0xff]  }
  0x7e   : > { %2781 = vmatprep.subr.bf16.mxu0 %v3842_v18  ;;  %v3884_v51 = vld [vmem:[%s4703_s21 + $0x5b4] ss:$8 sps:$4 sm:$0xff]   ;;  %v3887_v56 = vld [vmem:[%s4703_s21 + $0x5b0] ss:$8 sps:$4 sm:$0xff]   ;;  %v284_v57 = vld [vmem:[%s4717_s13 + $0x8] sm:$0xff]  ;;  %vm3178_vm0 = vcmask (!%p3628_p6), 25600  }
  0x7f   : > { %v4770_v52 = vsub.s32 %v644_v46, %v4763_v47  ;;  %v4773_v53 = vld [vmem:[%s4717_s13] sm:$0xff]  ;;  %v3888_v58 = vld [vmem:[%s4703_s21 + $0xc4] ss:$8 sps:$4 sm:$0xff]   ;;  %v3898_v6 = vld [vmem:[%s4703_s21 + $0xd0] ss:$8 sps:$4 sm:$0xff]   ;;  %v690_v10 = vcombine.high %v284_v57, %v284_v57 }
  0x80   : > { %2577 = vmatpush1.bf16.msra.mxu1 %v3844_v19  ;;  %v3890_v59 = vld [vmem:[%s4703_s21 + $0x5c4] ss:$8 sps:$4 sm:$0xff]   ;;  %v3892_v0 = vld [vmem:[%s4703_s21 + $0xc0] ss:$8 sps:$4 sm:$0xff]   ;;  %v3894_v2 = vld [vmem:[%s4703_s21 + $0xd4] ss:$8 sps:$4 sm:$0xff]  }
  0x81   : > { %2782 = vmatpush1.bf16.msra.mxu0 %v3845_v20  ;;  %2578 = vmatprep.subr.bf16.mxu1 %v3846_v21  ;;  %v648_v55 = vrot.slane %v4773_v53, %v4770_v52  ;;  %v697_v61 = vrot.slane %v284_v57, %v4770_v52  ;;  %v3893_v1 = vld [vmem:[%s4703_s21 + $0x5c0] ss:$8 sps:$4 sm:$0xff]   ;;  %v3896_v3 = vld [vmem:[%s4703_s21 + $0x5d4] ss:$8 sps:$4 sm:$0xff]   ;;  %v3899_v7 = vld [vmem:[%s4703_s21 + $0x5d0] ss:$8 sps:$4 sm:$0xff]   ;;  %v4805_v15 = vrot.slane %v690_v10, %v4770_v52 }
  0x82   : > { %2783 = vmatprep.subr.bf16.mxu0 %v3848_v22  ;;  %v3900_v8 = vld [vmem:[%s4703_s21 + $0xe4] ss:$8 sps:$4 sm:$0xff]   ;;  %v3904_v11 = vld [vmem:[%s4703_s21 + $0xe0] ss:$8 sps:$4 sm:$0xff]   ;;  %v3906_v13 = vld [vmem:[%s4703_s21 + $0xf4] ss:$8 sps:$4 sm:$0xff]  }
  0x83   : > { %v656_v60 = vcombine.high %v648_v55, %v648_v55  ;;  %v705_v63 = vcombine.high %v697_v61, %v697_v61  ;;  %v3902_v9 = vld [vmem:[%s4703_s21 + $0x5e4] ss:$8 sps:$4 sm:$0xff]   ;;  %v3905_v12 = vld [vmem:[%s4703_s21 + $0x5e0] ss:$8 sps:$4 sm:$0xff]   ;;  %v3908_v14 = vld [vmem:[%s4703_s21 + $0x5f4] ss:$8 sps:$4 sm:$0xff]   ;;  %v4808_v16 = vrot.slane %v697_v61, %v4770_v52  ;;  %v706_v21 = vcombine.high %v4805_v15, %v4805_v15 }
  0x84   : > { %2579 = vmatpush1.bf16.msra.mxu1 %v3850_v23  ;;  %v3910_v17 = vld [vmem:[%s4703_s21 + $0xf0] ss:$8 sps:$4 sm:$0xff]   ;;  %v3915_v19 = vld [vmem:[%s4703_s21 + $0x104] ss:$8 sps:$4 sm:$0xff]   ;;  %v4817_v22 = vrot.slane %v648_v55, %v4770_v52  ;;  %v3958_v55 = vld [vmem:[%s4703_s21 + $0x174] ss:$8 sps:$4 sm:$0xff]  }
  0x85   : > { %2784 = vmatpush1.bf16.msra.mxu0 %v3851_v24  ;;  %2580 = vmatprep.subr.bf16.mxu1 %v3852_v25  ;;  %v4784_v62 = vrot.slane %v656_v60, %v4770_v52  ;;  %v4791_v4 = vrot.slane %v705_v63, %v4770_v52  ;;  %v3911_v18 = vld [vmem:[%s4703_s21 + $0x5f0] ss:$8 sps:$4 sm:$0xff]   ;;  %v3919_v20 = vld [vmem:[%s4703_s21 + $0x604] ss:$8 sps:$4 sm:$0xff]   ;;  %v735_v23 = vcombine.high %v4808_v16, %v4808_v16  ;;  %v3913_v24 = vld [vmem:[%s4703_s21 + $0x100] ss:$8 sps:$4 sm:$0xff]  }
  0x86   : > { %2785 = vmatprep.subr.bf16.mxu0 %v3854_v26  ;;  %v3917_v25 = vld [vmem:[%s4703_s21 + $0x600] ss:$8 sps:$4 sm:$0xff]   ;;  %v3922_v26 = vld [vmem:[%s4703_s21 + $0x114] ss:$8 sps:$4 sm:$0xff]   ;;  %v3935_v39 = vld [vmem:[%s4703_s21 + $0x630] ss:$8 sps:$4 sm:$0xff]  }
  0x87   : > { %2600 = vmatprep.mubr.bf16.mxu1 %v4784_v62  ;;  %v737_v5 = vcombine.high %v4791_v4, %v4791_v4  ;;  %v3940_v40 = vld [vmem:[%s4703_s21 + $0x144] ss:$8 sps:$4 sm:$0xff]   ;;  %v3944_v46 = vld [vmem:[%s4703_s21 + $0x150] ss:$8 sps:$4 sm:$0xff]   ;;  %v3962_v61 = vld [vmem:[%s4703_s21 + $0x180] ss:$8 sps:$4 sm:$0xff]  }
  0x88   : > { %2581 = vmatpush1.bf16.msra.mxu1 %v3856_v27  ;;  %v3925_v27 = vld [vmem:[%s4703_s21 + $0x614] ss:$8 sps:$4 sm:$0xff]   ;;  %v3943_v41 = vld [vmem:[%s4703_s21 + $0x644] ss:$8 sps:$4 sm:$0xff]   ;;  %v3956_v57 = vld [vmem:[%s4703_s21 + $0x170] ss:$8 sps:$4 sm:$0xff]  }
  0x89   : > { %2786 = vmatpush1.bf16.msra.mxu0 %v3857_v28  ;;  %2582 = vmatprep.subr.bf16.mxu1 %v3858_v29  ;;  %v688_v28 = vcombine.high %v4784_v62, %v4784_v62  ;;  %v4828_v29 = vrot.slane %v706_v21, %v4770_v52  ;;  %v3967_v60 = vld [vmem:[%s4703_s21 + $0x684] ss:$8 sps:$4 sm:$0xff]   ;;  %v3965_v62 = vld [vmem:[%s4703_s21 + $0x680] ss:$8 sps:$4 sm:$0xff]   ;;  %v3970_v63 = vld [vmem:[%s4703_s21 + $0x194] ss:$8 sps:$4 sm:$0xff]  }
  0x8a   : > { %2787 = vmatprep.subr.bf16.mxu0 %v3860_v30  ;;  %2805 = vmatprep.mubr.bf16.mxu0 %v737_v5  ;;  %v3920_v30 = vld [vmem:[%s4703_s21 + $0x110] ss:$8 sps:$4 sm:$0xff]   ;;  %v3979_v5 = vld [vmem:[%s4703_s21 + $0x6a4] ss:$8 sps:$4 sm:$0xff]  }
  0x8b   : > { %v3980_v10 = vld [vmem:[%s4703_s21 + $0x1b0] ss:$8 sps:$4 sm:$0xff]  }
  0x8c   : > { %2583 = vmatpush1.bf16.msra.mxu1 %v3862_v31  ;;  %v3923_v31 = vld [vmem:[%s4703_s21 + $0x610] ss:$8 sps:$4 sm:$0xff]  }
  0x8d   : > { %2788 = vmatpush1.bf16.msra.mxu0 %v3863_v32  ;;  %2584 = vmatprep.subr.bf16.mxu1 %v3864_v33  ;;  %v3928_v32 = vld [vmem:[%s4703_s21 + $0x124] ss:$8 sps:$4 sm:$0xff]   ;;  %v3995_v21 = vld [vmem:[%s4703_s21 + $0x6d0] ss:$8 sps:$4 sm:$0xff]  }
  0x8e   : > { %2789 = vmatprep.subr.bf16.mxu0 %v3866_v34  ;;  %v3931_v33 = vld [vmem:[%s4703_s21 + $0x624] ss:$8 sps:$4 sm:$0xff]   ;;  %v3926_v34 = vld [vmem:[%s4703_s21 + $0x120] ss:$8 sps:$4 sm:$0xff]  }
  0x90   : > { %2585 = vmatpush1.bf16.msra.mxu1 %v3868_v35  ;;  %v3929_v35 = vld [vmem:[%s4703_s21 + $0x620] ss:$8 sps:$4 sm:$0xff]  }
  0x91   : > { %2790 = vmatpush1.bf16.msra.mxu0 %v3869_v36  ;;  %2586 = vmatprep.subr.bf16.mxu1 %v3870_v37  ;;  %v3934_v36 = vld [vmem:[%s4703_s21 + $0x134] ss:$8 sps:$4 sm:$0xff]  }
  0x92   : > { %2791 = vmatprep.subr.bf16.mxu0 %v3872_v38  ;;  %v3937_v37 = vld [vmem:[%s4703_s21 + $0x634] ss:$8 sps:$4 sm:$0xff]   ;;  %v3932_v38 = vld [vmem:[%s4703_s21 + $0x130] ss:$8 sps:$4 sm:$0xff]  }
  0x94   : > { %2587 = vmatpush1.bf16.msra.mxu1 %v3874_v42  ;;  %v3938_v42 = vld [vmem:[%s4703_s21 + $0x140] ss:$8 sps:$4 sm:$0xff]  }
  0x95   : > { %2792 = vmatpush1.bf16.msra.mxu0 %v3875_v43  ;;  %2588 = vmatprep.subr.bf16.mxu1 %v3876_v44  ;;  %v3941_v43 = vld [vmem:[%s4703_s21 + $0x640] ss:$8 sps:$4 sm:$0xff]   ;;  %v3946_v44 = vld [vmem:[%s4703_s21 + $0x154] ss:$8 sps:$4 sm:$0xff]  }
  0x96   : > { %2793 = vmatprep.subr.bf16.mxu0 %v3878_v45  ;;  %v3949_v45 = vld [vmem:[%s4703_s21 + $0x654] ss:$8 sps:$4 sm:$0xff]  }
  0x98   : > { %2589 = vmatpush1.bf16.msra.mxu1 %v3880_v48  ;;  %v3947_v48 = vld [vmem:[%s4703_s21 + $0x650] ss:$8 sps:$4 sm:$0xff]  }
  0x99   : > { %2794 = vmatpush1.bf16.msra.mxu0 %v3881_v49  ;;  %2590 = vmatprep.subr.bf16.mxu1 %v3882_v50  ;;  %v3952_v49 = vld [vmem:[%s4703_s21 + $0x164] ss:$8 sps:$4 sm:$0xff]  }
  0x9a   : > { %2795 = vmatprep.subr.bf16.mxu0 %v3884_v51  ;;  %v3955_v50 = vld [vmem:[%s4703_s21 + $0x664] ss:$8 sps:$4 sm:$0xff]   ;;  %v3950_v51 = vld [vmem:[%s4703_s21 + $0x160] ss:$8 sps:$4 sm:$0xff]  }
  0x9c   : > { %2591 = vmatpush1.bf16.msra.mxu1 %v3886_v54  ;;  %v3953_v54 = vld [vmem:[%s4703_s21 + $0x660] ss:$8 sps:$4 sm:$0xff]  }
  0x9d   : > { %2796 = vmatpush1.bf16.msra.mxu0 %v3887_v56  ;;  %2592 = vmatprep.subr.bf16.mxu1 %v3888_v58  ;;  %v3961_v56 = vld [vmem:[%s4703_s21 + $0x674] ss:$8 sps:$4 sm:$0xff]   ;;  %v3959_v58 = vld [vmem:[%s4703_s21 + $0x670] ss:$8 sps:$4 sm:$0xff]  }
  0x9e   : > { %2797 = vmatprep.subr.bf16.mxu0 %v3890_v59  ;;  %v3964_v59 = vld [vmem:[%s4703_s21 + $0x184] ss:$8 sps:$4 sm:$0xff]  }
  0xa0   : > { %2593 = vmatpush1.bf16.msra.mxu1 %v3892_v0  ;;  %v3973_v0 = vld [vmem:[%s4703_s21 + $0x694] ss:$8 sps:$4 sm:$0xff]  }
  0xa1   : > { %2798 = vmatpush1.bf16.msra.mxu0 %v3893_v1  ;;  %2594 = vmatprep.subr.bf16.mxu1 %v3894_v2  ;;  %v3968_v1 = vld [vmem:[%s4703_s21 + $0x190] ss:$8 sps:$4 sm:$0xff]  }
  0xa2   : > { %2799 = vmatprep.subr.bf16.mxu0 %v3896_v3  ;;  %v3971_v2 = vld [vmem:[%s4703_s21 + $0x690] ss:$8 sps:$4 sm:$0xff]   ;;  %v3976_v3 = vld [vmem:[%s4703_s21 + $0x1a4] ss:$8 sps:$4 sm:$0xff]  }
  0xa4   : > { %2595 = vmatpush1.bf16.msra.mxu1 %v3898_v6  ;;  %v3974_v6 = vld [vmem:[%s4703_s21 + $0x1a0] ss:$8 sps:$4 sm:$0xff]  }
  0xa5   : > { %2800 = vmatpush1.bf16.msra.mxu0 %v3899_v7  ;;  %2596 = vmatprep.subr.bf16.mxu1 %v3900_v8  ;;  %v3977_v7 = vld [vmem:[%s4703_s21 + $0x6a0] ss:$8 sps:$4 sm:$0xff]   ;;  %v3982_v8 = vld [vmem:[%s4703_s21 + $0x1b4] ss:$8 sps:$4 sm:$0xff]  }
  0xa6   : > { %2801 = vmatprep.subr.bf16.mxu0 %v3902_v9  ;;  %v3985_v9 = vld [vmem:[%s4703_s21 + $0x6b4] ss:$8 sps:$4 sm:$0xff]  }
  0xa8   : > { %2597 = vmatpush1.bf16.msra.mxu1 %v3904_v11  ;;  %v3983_v11 = vld [vmem:[%s4703_s21 + $0x6b0] ss:$8 sps:$4 sm:$0xff]  }
  0xa9   : > { %2802 = vmatpush1.bf16.msra.mxu0 %v3905_v12  ;;  %2598 = vmatprep.subr.bf16.mxu1 %v3906_v13  ;;  %v3988_v12 = vld [vmem:[%s4703_s21 + $0x1c4] ss:$8 sps:$4 sm:$0xff]  }
  0xaa   : > { %2803 = vmatprep.subr.bf16.mxu0 %v3908_v14  ;;  %v3991_v13 = vld [vmem:[%s4703_s21 + $0x6c4] ss:$8 sps:$4 sm:$0xff]   ;;  %v3986_v14 = vld [vmem:[%s4703_s21 + $0x1c0] ss:$8 sps:$4 sm:$0xff]  }
  0xac   : > { %2599 = vmatpush1.bf16.msra.mxu1 %v3910_v17  ;;  %v3989_v17 = vld [vmem:[%s4703_s21 + $0x6c0] ss:$8 sps:$4 sm:$0xff]  }
  0xad   : > { %2804 = vmatpush1.bf16.msra.mxu0 %v3911_v18  ;;  %2609 = vmatprep.subr.bf16.mxu1 %v3915_v19  ;;  %v3994_v18 = vld [vmem:[%s4703_s21 + $0x1d4] ss:$8 sps:$4 sm:$0xff]  }
  0xae   : > { %2814 = vmatprep.subr.bf16.mxu0 %v3919_v20  ;;  %v3997_v19 = vld [vmem:[%s4703_s21 + $0x6d4] ss:$8 sps:$4 sm:$0xff]   ;;  %v3992_v20 = vld [vmem:[%s4703_s21 + $0x1d0] ss:$8 sps:$4 sm:$0xff]  }
  0xaf   : > { %2601 = vmatmul.mubr.bf16.vlgmr.msra.gmra.mrb[0].mxu1 %v4817_v22 }
  0xb0   : > { %2806 = vmatmul.mubr.bf16.vlgmr.msra.gmra.mrb[0].mxu0 %v735_v23  ;;  %2610 = vmatpush1.bf16.msra.mxu1 %v3913_v24  ;;  %v4000_v23 = vld [vmem:[%s4703_s21 + $0x1e4] ss:$8 sps:$4 sm:$0xff]  }
  0xb1   : > { %2815 = vmatpush1.bf16.msra.mxu0 %v3917_v25  ;;  %2611 = vmatprep.subr.bf16.mxu1 %v3922_v26  ;;  %v4003_v24 = vld [vmem:[%s4703_s21 + $0x6e4] ss:$8 sps:$4 sm:$0xff]   ;;  %v641_v25 = vcombine.high %v4773_v53, %v4773_v53  ;;  %v3998_v26 = vld [vmem:[%s4703_s21 + $0x1e0] ss:$8 sps:$4 sm:$0xff]   ;;  %v4007_v53 = vld [vmem:[%s4703_s21 + $0x6f0] ss:$8 sps:$4 sm:$0xff]  }
  0xb2   : > { %2816 = vmatprep.subr.bf16.mxu0 %v3925_v27  ;;  %2641 = vmatprep.mubr.bf16.mxu1 %v688_v28  ;;  %v4001_v27 = vld [vmem:[%s4703_s21 + $0x6e0] ss:$8 sps:$4 sm:$0xff]   ;;  %v4006_v28 = vld [vmem:[%s4703_s21 + $0x1f4] ss:$8 sps:$4 sm:$0xff]  }
  0xb3   : > { %2846 = vmatprep.mubr.bf16.mxu0 %v4828_v29 }
  0xb4   : > { %2612 = vmatpush1.bf16.msra.mxu1 %v3920_v30  ;;  %v4009_v30 = vld [vmem:[%s4703_s21 + $0x6f4] ss:$8 sps:$4 sm:$0xff]  }
  0xb5   : > { %2817 = vmatpush1.bf16.msra.mxu0 %v3923_v31  ;;  %2613 = vmatprep.subr.bf16.mxu1 %v3928_v32  ;;  %v4891_v31 = vrot.slane %v641_v25, %v4770_v52  ;;  %v4004_v32 = vld [vmem:[%s4703_s21 + $0x1f0] ss:$8 sps:$4 sm:$0xff]  }
  0xb6   : > { %2818 = vmatprep.subr.bf16.mxu0 %v3931_v33  ;;  %v4012_v33 = vld [vmem:[%s4703_s21 + $0x204] ss:$8 sps:$4 sm:$0xff]   ;;  %v4079_v25 = vld [vmem:[%s4703_s21 + $0x7b0] ss:$8 sps:$4 sm:$0xff]  }
  0xb8   : > { %2614 = vmatpush1.bf16.msra.mxu1 %v3926_v34  ;;  %v4015_v34 = vld [vmem:[%s4703_s21 + $0x704] ss:$8 sps:$4 sm:$0xff]  }
  0xb9   : > { %2819 = vmatpush1.bf16.msra.mxu0 %v3929_v35  ;;  %2615 = vmatprep.subr.bf16.mxu1 %v3934_v36  ;;  %v657_v35 = vcombine.high %v4891_v31, %v4891_v31  ;;  %v686_v36 = vcombine.high %v4817_v22, %v4817_v22  ;;  %v738_v22 = vcombine.high %v4828_v29, %v4828_v29  ;;  %v4022_v29 = vld [vmem:[%s4703_s21 + $0x220] ss:$8 sps:$4 sm:$0xff]  }
  0xba   : > { %2820 = vmatprep.subr.bf16.mxu0 %v3937_v37  ;;  %v4903_v37 = vrot.slane %v4805_v15, %v4770_v52  ;;  %v4016_v15 = vld [vmem:[%s4703_s21 + $0x210] ss:$8 sps:$4 sm:$0xff]  }
  0xbc   : > { %2616 = vmatpush1.bf16.msra.mxu1 %v3932_v38  ;;  %v4010_v38 = vld [vmem:[%s4703_s21 + $0x200] ss:$8 sps:$4 sm:$0xff]  }
  0xbd   : > { %2821 = vmatpush1.bf16.msra.mxu0 %v3935_v39  ;;  %2617 = vmatprep.subr.bf16.mxu1 %v3940_v40  ;;  %v4013_v39 = vld [vmem:[%s4703_s21 + $0x700] ss:$8 sps:$4 sm:$0xff]   ;;  %v4018_v40 = vld [vmem:[%s4703_s21 + $0x214] ss:$8 sps:$4 sm:$0xff]  }
  0xbe   : > { %2822 = vmatprep.subr.bf16.mxu0 %v3943_v41  ;;  %v4021_v41 = vld [vmem:[%s4703_s21 + $0x714] ss:$8 sps:$4 sm:$0xff]  }
  0xc0   : > { %2618 = vmatpush1.bf16.msra.mxu1 %v3938_v42  ;;  %v4910_v42 = vrot.slane %v657_v35, %v4770_v52  ;;  %v4096_v35 = vld [vmem:[%s4703_s21 + $0x2e4] ss:$8 sps:$4 sm:$0xff]  }
  0xc1   : > { %2823 = vmatpush1.bf16.msra.mxu0 %v3941_v43  ;;  %2619 = vmatprep.subr.bf16.mxu1 %v3946_v44  ;;  %v4019_v43 = vld [vmem:[%s4703_s21 + $0x710] ss:$8 sps:$4 sm:$0xff]   ;;  %v4024_v44 = vld [vmem:[%s4703_s21 + $0x224] ss:$8 sps:$4 sm:$0xff]  }
  0xc2   : > { %2824 = vmatprep.subr.bf16.mxu0 %v3949_v45  ;;  %v4027_v45 = vld [vmem:[%s4703_s21 + $0x724] ss:$8 sps:$4 sm:$0xff]  }
  0xc4   : > { %2620 = vmatpush1.bf16.msra.mxu1 %v3944_v46  ;;  %v4025_v46 = vld [vmem:[%s4703_s21 + $0x720] ss:$8 sps:$4 sm:$0xff]  }
  0xc5   : > { %2825 = vmatpush1.bf16.msra.mxu0 %v3947_v48  ;;  %2621 = vmatprep.subr.bf16.mxu1 %v3952_v49  ;;  %v4030_v48 = vld [vmem:[%s4703_s21 + $0x234] ss:$8 sps:$4 sm:$0xff]  }
  0xc6   : > { %2826 = vmatprep.subr.bf16.mxu0 %v3955_v50  ;;  %v4033_v49 = vld [vmem:[%s4703_s21 + $0x734] ss:$8 sps:$4 sm:$0xff]   ;;  %v4028_v50 = vld [vmem:[%s4703_s21 + $0x230] ss:$8 sps:$4 sm:$0xff]  }
  0xc8   : > { %2622 = vmatpush1.bf16.msra.mxu1 %v3950_v51  ;;  %v4031_v51 = vld [vmem:[%s4703_s21 + $0x730] ss:$8 sps:$4 sm:$0xff]  }
  0xc9   : > { %2827 = vmatpush1.bf16.msra.mxu0 %v3953_v54  ;;  %2623 = vmatprep.subr.bf16.mxu1 %v3958_v55  ;;  %v4036_v54 = vld [vmem:[%s4703_s21 + $0x244] ss:$8 sps:$4 sm:$0xff]  }
  0xca   : > { %2828 = vmatprep.subr.bf16.mxu0 %v3961_v56  ;;  %v4039_v55 = vld [vmem:[%s4703_s21 + $0x744] ss:$8 sps:$4 sm:$0xff]   ;;  %v4034_v56 = vld [vmem:[%s4703_s21 + $0x240] ss:$8 sps:$4 sm:$0xff]  }
  0xcc   : > { %2624 = vmatpush1.bf16.msra.mxu1 %v3956_v57  ;;  %v4037_v57 = vld [vmem:[%s4703_s21 + $0x740] ss:$8 sps:$4 sm:$0xff]  }
  0xcd   : > { %2829 = vmatpush1.bf16.msra.mxu0 %v3959_v58  ;;  %2625 = vmatprep.subr.bf16.mxu1 %v3964_v59  ;;  %v4042_v58 = vld [vmem:[%s4703_s21 + $0x254] ss:$8 sps:$4 sm:$0xff]  }
  0xce   : > { %2830 = vmatprep.subr.bf16.mxu0 %v3967_v60  ;;  %v4045_v59 = vld [vmem:[%s4703_s21 + $0x754] ss:$8 sps:$4 sm:$0xff]   ;;  %v4040_v60 = vld [vmem:[%s4703_s21 + $0x250] ss:$8 sps:$4 sm:$0xff]  }
  0xd0   : > { %2626 = vmatpush1.bf16.msra.mxu1 %v3962_v61  ;;  %v4043_v61 = vld [vmem:[%s4703_s21 + $0x750] ss:$8 sps:$4 sm:$0xff]  }
  0xd1   : > { %2831 = vmatpush1.bf16.msra.mxu0 %v3965_v62  ;;  %2627 = vmatprep.subr.bf16.mxu1 %v3970_v63  ;;  %v4048_v62 = vld [vmem:[%s4703_s21 + $0x264] ss:$8 sps:$4 sm:$0xff]  }
  0xd2   : > { %2832 = vmatprep.subr.bf16.mxu0 %v3973_v0  ;;  %v4051_v63 = vld [vmem:[%s4703_s21 + $0x764] ss:$8 sps:$4 sm:$0xff]   ;;  %v4046_v0 = vld [vmem:[%s4703_s21 + $0x260] ss:$8 sps:$4 sm:$0xff]  }
  0xd4   : > { %2628 = vmatpush1.bf16.msra.mxu1 %v3968_v1  ;;  %v4049_v1 = vld [vmem:[%s4703_s21 + $0x760] ss:$8 sps:$4 sm:$0xff]  }
  0xd5   : > { %2833 = vmatpush1.bf16.msra.mxu0 %v3971_v2  ;;  %2629 = vmatprep.subr.bf16.mxu1 %v3976_v3  ;;  %v4054_v2 = vld [vmem:[%s4703_s21 + $0x274] ss:$8 sps:$4 sm:$0xff]  }
  0xd6   : > { %2834 = vmatprep.subr.bf16.mxu0 %v3979_v5  ;;  %v4057_v3 = vld [vmem:[%s4703_s21 + $0x774] ss:$8 sps:$4 sm:$0xff]   ;;  %v4052_v5 = vld [vmem:[%s4703_s21 + $0x270] ss:$8 sps:$4 sm:$0xff]  }
  0xd8   : > { %2630 = vmatpush1.bf16.msra.mxu1 %v3974_v6  ;;  %v4055_v6 = vld [vmem:[%s4703_s21 + $0x770] ss:$8 sps:$4 sm:$0xff]  }
  0xd9   : > { %2835 = vmatpush1.bf16.msra.mxu0 %v3977_v7  ;;  %2631 = vmatprep.subr.bf16.mxu1 %v3982_v8  ;;  %v4060_v7 = vld [vmem:[%s4703_s21 + $0x284] ss:$8 sps:$4 sm:$0xff]  }
  0xda   : > { %2836 = vmatprep.subr.bf16.mxu0 %v3985_v9  ;;  %v4063_v8 = vld [vmem:[%s4703_s21 + $0x784] ss:$8 sps:$4 sm:$0xff]   ;;  %v4058_v9 = vld [vmem:[%s4703_s21 + $0x280] ss:$8 sps:$4 sm:$0xff]  }
  0xdc   : > { %2632 = vmatpush1.bf16.msra.mxu1 %v3980_v10  ;;  %v4061_v10 = vld [vmem:[%s4703_s21 + $0x780] ss:$8 sps:$4 sm:$0xff]  }
  0xdd   : > { %2837 = vmatpush1.bf16.msra.mxu0 %v3983_v11  ;;  %2633 = vmatprep.subr.bf16.mxu1 %v3988_v12  ;;  %v4066_v11 = vld [vmem:[%s4703_s21 + $0x294] ss:$8 sps:$4 sm:$0xff]  }
  0xde   : > { %2838 = vmatprep.subr.bf16.mxu0 %v3991_v13  ;;  %v4069_v12 = vld [vmem:[%s4703_s21 + $0x794] ss:$8 sps:$4 sm:$0xff]   ;;  %v4064_v13 = vld [vmem:[%s4703_s21 + $0x290] ss:$8 sps:$4 sm:$0xff]  }
  0xe0   : > { %2634 = vmatpush1.bf16.msra.mxu1 %v3986_v14  ;;  %v4067_v14 = vld [vmem:[%s4703_s21 + $0x790] ss:$8 sps:$4 sm:$0xff]  }
  0xe1   : > { %2839 = vmatpush1.bf16.msra.mxu0 %v3989_v17  ;;  %2635 = vmatprep.subr.bf16.mxu1 %v3994_v18  ;;  %v4072_v17 = vld [vmem:[%s4703_s21 + $0x2a4] ss:$8 sps:$4 sm:$0xff]  }
  0xe2   : > { %2840 = vmatprep.subr.bf16.mxu0 %v3997_v19  ;;  %v4075_v18 = vld [vmem:[%s4703_s21 + $0x7a4] ss:$8 sps:$4 sm:$0xff]   ;;  %v4070_v19 = vld [vmem:[%s4703_s21 + $0x2a0] ss:$8 sps:$4 sm:$0xff]  }
  0xe4   : > { %2636 = vmatpush1.bf16.msra.mxu1 %v3992_v20  ;;  %v4073_v20 = vld [vmem:[%s4703_s21 + $0x7a0] ss:$8 sps:$4 sm:$0xff]  }
  0xe5   : > { %2841 = vmatpush1.bf16.msra.mxu0 %v3995_v21  ;;  %2637 = vmatprep.subr.bf16.mxu1 %v4000_v23  ;;  %v4078_v21 = vld [vmem:[%s4703_s21 + $0x2b4] ss:$8 sps:$4 sm:$0xff]  }
  0xe6   : > { %2842 = vmatprep.subr.bf16.mxu0 %v4003_v24  ;;  %v4081_v23 = vld [vmem:[%s4703_s21 + $0x7b4] ss:$8 sps:$4 sm:$0xff]   ;;  %v4076_v24 = vld [vmem:[%s4703_s21 + $0x2b0] ss:$8 sps:$4 sm:$0xff]  }
  0xe8   : > { %2638 = vmatpush1.bf16.msra.mxu1 %v3998_v26  ;;  %v4084_v26 = vld [vmem:[%s4703_s21 + $0x2c4] ss:$8 sps:$4 sm:$0xff]  }
  0xe9   : > { %2843 = vmatpush1.bf16.msra.mxu0 %v4001_v27  ;;  %2639 = vmatprep.subr.bf16.mxu1 %v4006_v28  ;;  %v4087_v27 = vld [vmem:[%s4703_s21 + $0x7c4] ss:$8 sps:$4 sm:$0xff]   ;;  %v4082_v28 = vld [vmem:[%s4703_s21 + $0x2c0] ss:$8 sps:$4 sm:$0xff]  }
  0xea   : > { %2844 = vmatprep.subr.bf16.mxu0 %v4009_v30  ;;  %v4085_v30 = vld [vmem:[%s4703_s21 + $0x7c0] ss:$8 sps:$4 sm:$0xff]  }
  0xec   : > { %2640 = vmatpush1.bf16.msra.mxu1 %v4004_v32  ;;  %v4090_v32 = vld [vmem:[%s4703_s21 + $0x2d4] ss:$8 sps:$4 sm:$0xff]  }
  0xed   : > { %2845 = vmatpush1.bf16.msra.mxu0 %v4007_v53  ;;  %2650 = vmatprep.subr.bf16.mxu1 %v4012_v33  ;;  %v4093_v53 = vld [vmem:[%s4703_s21 + $0x7d4] ss:$8 sps:$4 sm:$0xff]   ;;  %v4088_v33 = vld [vmem:[%s4703_s21 + $0x2d0] ss:$8 sps:$4 sm:$0xff]  }
  0xee   : > { %2855 = vmatprep.subr.bf16.mxu0 %v4015_v34  ;;  %v4091_v34 = vld [vmem:[%s4703_s21 + $0x7d0] ss:$8 sps:$4 sm:$0xff]  }
  0xef   : > { %2642 = vmatmul.mubr.bf16.vlgmr.msra.gmra.mrb[0].mxu1 %v686_v36  ;;  %v4099_v36 = vld [vmem:[%s4703_s21 + $0x7e4] ss:$8 sps:$4 sm:$0xff]  }
  0xf0   : > { %2847 = vmatmul.mubr.bf16.vlgmr.msra.gmra.mrb[0].mxu0 %v4903_v37  ;;  %2651 = vmatpush1.bf16.msra.mxu1 %v4010_v38  ;;  %v4094_v38 = vld [vmem:[%s4703_s21 + $0x2e0] ss:$8 sps:$4 sm:$0xff]  }
  0xf1   : > { %2856 = vmatpush1.bf16.msra.mxu0 %v4013_v39  ;;  %2652 = vmatprep.subr.bf16.mxu1 %v4018_v40  ;;  %v4970_v39 = vld [vmem:[%s4717_s13 + $0x10] sm:$0x3f]  ;;  %v4097_v40 = vld [vmem:[%s4703_s21 + $0x7e0] ss:$8 sps:$4 sm:$0xff]  }
  0xf2   : > { %2857 = vmatprep.subr.bf16.mxu0 %v4021_v41  ;;  %2682 = vmatprep.mubr.bf16.mxu1 %v4910_v42  ;;  %v4102_v41 = vld [vmem:[%s4703_s21 + $0x2f4] ss:$8 sps:$4 sm:$0xff]  }
  0xf3   : > { %2887 = vmatprep.mubr.bf16.mxu0 %v738_v22  ;;  %v4105_v22 = vld [vmem:[%s4703_s21 + $0x7f4] ss:$8 sps:$4 sm:$0xff]  }
  0xf4   : > { %2653 = vmatpush1.bf16.msra.mxu1 %v4016_v15  ;;  %v4977_v15 = vrot.slane %v4970_v39, %v4770_v52 }
  0xf5   : > { %2858 = vmatpush1.bf16.msra.mxu0 %v4019_v43  ;;  %2654 = vmatprep.subr.bf16.mxu1 %v4024_v44  ;;  %v4100_v43 = vld [vmem:[%s4703_s21 + $0x2f0] ss:$8 sps:$4 sm:$0xff]  }
  0xf6   : > { %2859 = vmatprep.subr.bf16.mxu0 %v4027_v45  ;;  %v4103_v44 = vld [vmem:[%s4703_s21 + $0x7f0] ss:$8 sps:$4 sm:$0xff]   ;;  %v4108_v45 = vld [vmem:[%s4703_s21 + $0x304] ss:$8 sps:$4 sm:$0xff]  }
  0xf8   : > { %2655 = vmatpush1.bf16.msra.mxu1 %v4022_v29  ;;  %v4111_v29 = vld [vmem:[%s4703_s21 + $0x804] ss:$8 sps:$4 sm:$0xff]  }
  0xf9   : > { %2860 = vmatpush1.bf16.msra.mxu0 %v4025_v46  ;;  %2656 = vmatprep.subr.bf16.mxu1 %v4030_v48  ;;  %v754_v46 = vcombine.high %v4977_v15, %v4977_v15  ;;  %v4106_v48 = vld [vmem:[%s4703_s21 + $0x300] ss:$8 sps:$4 sm:$0xff]  }
  0xfa   : > { %2861 = vmatprep.subr.bf16.mxu0 %v4033_v49  ;;  %v4988_v49 = vrot.slane %v4891_v31, %v4770_v52 }
  0xfb   : > { %v4998_v31 = vrot.slane %v754_v46, %v4770_v52  ;;  %v4187_v46 = vld [vmem:[%s4703_s21 + $0x8d0] ss:$8 sps:$4 sm:$0xff]  }
  0xfc   : > { %2657 = vmatpush1.bf16.msra.mxu1 %v4028_v50  ;;  %v736_v50 = vcombine.high %v4903_v37, %v4903_v37  ;;  %v4112_v37 = vld [vmem:[%s4703_s21 + $0x310] ss:$8 sps:$4 sm:$0xff]  }
  0xfd   : > { %2862 = vmatpush1.bf16.msra.mxu0 %v4031_v51  ;;  %2658 = vmatprep.subr.bf16.mxu1 %v4036_v54  ;;  %v4109_v51 = vld [vmem:[%s4703_s21 + $0x800] ss:$8 sps:$4 sm:$0xff]   ;;  %v4114_v54 = vld [vmem:[%s4703_s21 + $0x314] ss:$8 sps:$4 sm:$0xff]  }
  0xfe   : > { %2863 = vmatprep.subr.bf16.mxu0 %v4039_v55  ;;  %v4117_v55 = vld [vmem:[%s4703_s21 + $0x814] ss:$8 sps:$4 sm:$0xff]  }
 0x100   : > { %2659 = vmatpush1.bf16.msra.mxu1 %v4034_v56  ;;  %v689_v56 = vcombine.high %v4910_v42, %v4910_v42  ;;  %v4123_v42 = vld [vmem:[%s4703_s21 + $0x824] ss:$8 sps:$4 sm:$0xff]  }
 0x101   : > { %2864 = vmatpush1.bf16.msra.mxu0 %v4037_v57  ;;  %2660 = vmatprep.subr.bf16.mxu1 %v4042_v58  ;;  %v4115_v57 = vld [vmem:[%s4703_s21 + $0x810] ss:$8 sps:$4 sm:$0xff]   ;;  %v4120_v58 = vld [vmem:[%s4703_s21 + $0x324] ss:$8 sps:$4 sm:$0xff]  }
 0x102   : > { %2865 = vmatprep.subr.bf16.mxu0 %v4045_v59  ;;  %v4118_v59 = vld [vmem:[%s4703_s21 + $0x320] ss:$8 sps:$4 sm:$0xff]  }
 0x104   : > { %2661 = vmatpush1.bf16.msra.mxu1 %v4040_v60  ;;  %v4121_v60 = vld [vmem:[%s4703_s21 + $0x820] ss:$8 sps:$4 sm:$0xff]  }
 0x105   : > { %2866 = vmatpush1.bf16.msra.mxu0 %v4043_v61  ;;  %2662 = vmatprep.subr.bf16.mxu1 %v4048_v62  ;;  %v4126_v61 = vld [vmem:[%s4703_s21 + $0x334] ss:$8 sps:$4 sm:$0xff]  }
 0x106   : > { %2867 = vmatprep.subr.bf16.mxu0 %v4051_v63  ;;  %v4129_v62 = vld [vmem:[%s4703_s21 + $0x834] ss:$8 sps:$4 sm:$0xff]   ;;  %v4124_v63 = vld [vmem:[%s4703_s21 + $0x330] ss:$8 sps:$4 sm:$0xff]  }
 0x108   : > { %2663 = vmatpush1.bf16.msra.mxu1 %v4046_v0  ;;  %v4127_v0 = vld [vmem:[%s4703_s21 + $0x830] ss:$8 sps:$4 sm:$0xff]  }
 0x109   : > { %2868 = vmatpush1.bf16.msra.mxu0 %v4049_v1  ;;  %2664 = vmatprep.subr.bf16.mxu1 %v4054_v2  ;;  %v4132_v1 = vld [vmem:[%s4703_s21 + $0x344] ss:$8 sps:$4 sm:$0xff]  }
 0x10a   : > { %2869 = vmatprep.subr.bf16.mxu0 %v4057_v3  ;;  %v4135_v2 = vld [vmem:[%s4703_s21 + $0x844] ss:$8 sps:$4 sm:$0xff]   ;;  %v4130_v3 = vld [vmem:[%s4703_s21 + $0x340] ss:$8 sps:$4 sm:$0xff]  }
 0x10c   : > { %2665 = vmatpush1.bf16.msra.mxu1 %v4052_v5  ;;  %v4133_v5 = vld [vmem:[%s4703_s21 + $0x840] ss:$8 sps:$4 sm:$0xff]  }
 0x10d   : > { %2870 = vmatpush1.bf16.msra.mxu0 %v4055_v6  ;;  %2666 = vmatprep.subr.bf16.mxu1 %v4060_v7  ;;  %v4138_v6 = vld [vmem:[%s4703_s21 + $0x354] ss:$8 sps:$4 sm:$0xff]  }
 0x10e   : > { %2871 = vmatprep.subr.bf16.mxu0 %v4063_v8  ;;  %v4141_v7 = vld [vmem:[%s4703_s21 + $0x854] ss:$8 sps:$4 sm:$0xff]   ;;  %v4136_v8 = vld [vmem:[%s4703_s21 + $0x350] ss:$8 sps:$4 sm:$0xff]  }
 0x110   : > { %2667 = vmatpush1.bf16.msra.mxu1 %v4058_v9  ;;  %v4139_v9 = vld [vmem:[%s4703_s21 + $0x850] ss:$8 sps:$4 sm:$0xff]  }
 0x111   : > { %2872 = vmatpush1.bf16.msra.mxu0 %v4061_v10  ;;  %2668 = vmatprep.subr.bf16.mxu1 %v4066_v11  ;;  %v4144_v10 = vld [vmem:[%s4703_s21 + $0x364] ss:$8 sps:$4 sm:$0xff]  }
 0x112   : > { %2873 = vmatprep.subr.bf16.mxu0 %v4069_v12  ;;  %v4147_v11 = vld [vmem:[%s4703_s21 + $0x864] ss:$8 sps:$4 sm:$0xff]   ;;  %v4142_v12 = vld [vmem:[%s4703_s21 + $0x360] ss:$8 sps:$4 sm:$0xff]  }
 0x114   : > { %2669 = vmatpush1.bf16.msra.mxu1 %v4064_v13  ;;  %v4145_v13 = vld [vmem:[%s4703_s21 + $0x860] ss:$8 sps:$4 sm:$0xff]  }
 0x115   : > { %2874 = vmatpush1.bf16.msra.mxu0 %v4067_v14  ;;  %2670 = vmatprep.subr.bf16.mxu1 %v4072_v17  ;;  %v4150_v14 = vld [vmem:[%s4703_s21 + $0x374] ss:$8 sps:$4 sm:$0xff]  }
 0x116   : > { %2875 = vmatprep.subr.bf16.mxu0 %v4075_v18  ;;  %v4153_v17 = vld [vmem:[%s4703_s21 + $0x874] ss:$8 sps:$4 sm:$0xff]   ;;  %v4148_v18 = vld [vmem:[%s4703_s21 + $0x370] ss:$8 sps:$4 sm:$0xff]  }
 0x118   : > { %2671 = vmatpush1.bf16.msra.mxu1 %v4070_v19  ;;  %v4151_v19 = vld [vmem:[%s4703_s21 + $0x870] ss:$8 sps:$4 sm:$0xff]  }
 0x119   : > { %2876 = vmatpush1.bf16.msra.mxu0 %v4073_v20  ;;  %2672 = vmatprep.subr.bf16.mxu1 %v4078_v21  ;;  %v4156_v20 = vld [vmem:[%s4703_s21 + $0x384] ss:$8 sps:$4 sm:$0xff]  }
 0x11a   : > { %2877 = vmatprep.subr.bf16.mxu0 %v4081_v23  ;;  %v4159_v21 = vld [vmem:[%s4703_s21 + $0x884] ss:$8 sps:$4 sm:$0xff]   ;;  %v4154_v23 = vld [vmem:[%s4703_s21 + $0x380] ss:$8 sps:$4 sm:$0xff]  }
 0x11c   : > { %2673 = vmatpush1.bf16.msra.mxu1 %v4076_v24  ;;  %v4157_v24 = vld [vmem:[%s4703_s21 + $0x880] ss:$8 sps:$4 sm:$0xff]  }
 0x11d   : > { %2878 = vmatpush1.bf16.msra.mxu0 %v4079_v25  ;;  %2674 = vmatprep.subr.bf16.mxu1 %v4084_v26  ;;  %v4162_v25 = vld [vmem:[%s4703_s21 + $0x394] ss:$8 sps:$4 sm:$0xff]  }
 0x11e   : > { %2879 = vmatprep.subr.bf16.mxu0 %v4087_v27  ;;  %v4165_v26 = vld [vmem:[%s4703_s21 + $0x894] ss:$8 sps:$4 sm:$0xff]   ;;  %v4160_v27 = vld [vmem:[%s4703_s21 + $0x390] ss:$8 sps:$4 sm:$0xff]  }
 0x120   : > { %2675 = vmatpush1.bf16.msra.mxu1 %v4082_v28  ;;  %v4163_v28 = vld [vmem:[%s4703_s21 + $0x890] ss:$8 sps:$4 sm:$0xff]  }
 0x121   : > { %2880 = vmatpush1.bf16.msra.mxu0 %v4085_v30  ;;  %2676 = vmatprep.subr.bf16.mxu1 %v4090_v32  ;;  %v4168_v30 = vld [vmem:[%s4703_s21 + $0x3a4] ss:$8 sps:$4 sm:$0xff]  }
 0x122   : > { %2881 = vmatprep.subr.bf16.mxu0 %v4093_v53  ;;  %v4171_v32 = vld [vmem:[%s4703_s21 + $0x8a4] ss:$8 sps:$4 sm:$0xff]   ;;  %v4166_v53 = vld [vmem:[%s4703_s21 + $0x3a0] ss:$8 sps:$4 sm:$0xff]  }
 0x124   : > { %2677 = vmatpush1.bf16.msra.mxu1 %v4088_v33  ;;  %v4169_v33 = vld [vmem:[%s4703_s21 + $0x8a0] ss:$8 sps:$4 sm:$0xff]  }
 0x125   : > { %2882 = vmatpush1.bf16.msra.mxu0 %v4091_v34  ;;  %2678 = vmatprep.subr.bf16.mxu1 %v4096_v35  ;;  %v4174_v34 = vld [vmem:[%s4703_s21 + $0x3b4] ss:$8 sps:$4 sm:$0xff]  }
 0x126   : > { %2883 = vmatprep.subr.bf16.mxu0 %v4099_v36  ;;  %v4177_v35 = vld [vmem:[%s4703_s21 + $0x8b4] ss:$8 sps:$4 sm:$0xff]   ;;  %v4172_v36 = vld [vmem:[%s4703_s21 + $0x3b0] ss:$8 sps:$4 sm:$0xff]  }
 0x128   : > { %2679 = vmatpush1.bf16.msra.mxu1 %v4094_v38  ;;  %v4175_v38 = vld [vmem:[%s4703_s21 + $0x8b0] ss:$8 sps:$4 sm:$0xff]  }
 0x129   : > { %2884 = vmatpush1.bf16.msra.mxu0 %v4097_v40  ;;  %2680 = vmatprep.subr.bf16.mxu1 %v4102_v41  ;;  %v4180_v40 = vld [vmem:[%s4703_s21 + $0x3c4] ss:$8 sps:$4 sm:$0xff]  }
 0x12a   : > { %2885 = vmatprep.subr.bf16.mxu0 %v4105_v22  ;;  %v4183_v41 = vld [vmem:[%s4703_s21 + $0x8c4] ss:$8 sps:$4 sm:$0xff]   ;;  %v4178_v22 = vld [vmem:[%s4703_s21 + $0x3c0] ss:$8 sps:$4 sm:$0xff]  }
 0x12c   : > { %2681 = vmatpush1.bf16.msra.mxu1 %v4100_v43  ;;  %v4181_v43 = vld [vmem:[%s4703_s21 + $0x8c0] ss:$8 sps:$4 sm:$0xff]  }
 0x12d   : > { %2886 = vmatpush1.bf16.msra.mxu0 %v4103_v44  ;;  %2691 = vmatprep.subr.bf16.mxu1 %v4108_v45  ;;  %v4186_v44 = vld [vmem:[%s4703_s21 + $0x3d4] ss:$8 sps:$4 sm:$0xff]  }
 0x12e   : > { %2896 = vmatprep.subr.bf16.mxu0 %v4111_v29  ;;  %v4189_v45 = vld [vmem:[%s4703_s21 + $0x8d4] ss:$8 sps:$4 sm:$0xff]   ;;  %v4184_v29 = vld [vmem:[%s4703_s21 + $0x3d0] ss:$8 sps:$4 sm:$0xff]  }
 0x12f   : > { %2683 = vmatmul.mubr.bf16.vlgmr.msra.gmra.mrb[0].mxu1 %v4988_v49 }
 0x130   : > { %2888 = vmatmul.mubr.bf16.vlgmr.msra.gmra.mrb[0].mxu0 %v736_v50  ;;  %2692 = vmatpush1.bf16.msra.mxu1 %v4106_v48  ;;  %v4192_v48 = vld [vmem:[%s4703_s21 + $0x3e4] ss:$8 sps:$4 sm:$0xff]  }
 0x131   : > { %2897 = vmatpush1.bf16.msra.mxu0 %v4109_v51  ;;  %2693 = vmatprep.subr.bf16.mxu1 %v4114_v54  ;;  %v4195_v50 = vld [vmem:[%s4703_s21 + $0x8e4] ss:$8 sps:$4 sm:$0xff]   ;;  %v4190_v51 = vld [vmem:[%s4703_s21 + $0x3e0] ss:$8 sps:$4 sm:$0xff]  }
 0x132   : > { %2898 = vmatprep.subr.bf16.mxu0 %v4117_v55  ;;  %2723 = vmatprep.mubr.bf16.mxu1 %v689_v56  ;;  %v4193_v54 = vld [vmem:[%s4703_s21 + $0x8e0] ss:$8 sps:$4 sm:$0xff]   ;;  %v4198_v55 = vld [vmem:[%s4703_s21 + $0x3f4] ss:$8 sps:$4 sm:$0xff]  }
 0x133   : > { %2928 = vmatprep.mubr.bf16.mxu0 %v4998_v31  ;;  %v4201_v56 = vld [vmem:[%s4703_s21 + $0x8f4] ss:$8 sps:$4 sm:$0xff]  }
 0x134   : > { %2694 = vmatpush1.bf16.msra.mxu1 %v4112_v37  ;;  %v4196_v37 = vld [vmem:[%s4703_s21 + $0x3f0] ss:$8 sps:$4 sm:$0xff]  }
 0x135   : > { %2899 = vmatpush1.bf16.msra.mxu0 %v4115_v57  ;;  %2695 = vmatprep.subr.bf16.mxu1 %v4120_v58  ;;  %v4199_v57 = vld [vmem:[%s4703_s21 + $0x8f0] ss:$8 sps:$4 sm:$0xff]   ;;  %v4204_v58 = vld [vmem:[%s4703_s21 + $0x404] ss:$8 sps:$4 sm:$0xff]  }
 0x136   : > { %2900 = vmatprep.subr.bf16.mxu0 %v4123_v42  ;;  %v4207_v42 = vld [vmem:[%s4703_s21 + $0x904] ss:$8 sps:$4 sm:$0xff]  }
 0x138   : > { %2696 = vmatpush1.bf16.msra.mxu1 %v4118_v59  ;;  %v687_v59 = vcombine.high %v4988_v49, %v4988_v49  ;;  %v4211_v49 = vld [vmem:[%s4703_s21 + $0x910] ss:$8 sps:$4 sm:$0xff]  }
 0x139   : > { %2901 = vmatpush1.bf16.msra.mxu0 %v4121_v60  ;;  %2697 = vmatprep.subr.bf16.mxu1 %v4126_v61  ;;  %v5066_v60 = vrot.slane %v4977_v15, %v4770_v52  ;;  %v4202_v61 = vld [vmem:[%s4703_s21 + $0x400] ss:$8 sps:$4 sm:$0xff]   ;;  %v4208_v15 = vld [vmem:[%s4703_s21 + $0x410] ss:$8 sps:$4 sm:$0xff]  }
 0x13a   : > { %2902 = vmatprep.subr.bf16.mxu0 %v4129_v62  ;;  %v4205_v62 = vld [vmem:[%s4703_s21 + $0x900] ss:$8 sps:$4 sm:$0xff]  }
 0x13c   : > { %2698 = vmatpush1.bf16.msra.mxu1 %v4124_v63  ;;  %v4210_v63 = vld [vmem:[%s4703_s21 + $0x414] ss:$8 sps:$4 sm:$0xff]  }
 0x13d   : > { %2903 = vmatpush1.bf16.msra.mxu0 %v4127_v0  ;;  %2699 = vmatprep.subr.bf16.mxu1 %v4132_v1  ;;  %v4213_v0 = vld [vmem:[%s4703_s21 + $0x914] ss:$8 sps:$4 sm:$0xff]   ;;  %v785_v1 = vcombine.high %v4998_v31, %v4998_v31  ;;  %v4214_v31 = vld [vmem:[%s4703_s21 + $0x420] ss:$8 sps:$4 sm:$0xff]  }
 0x13e   : > { %2904 = vmatprep.subr.bf16.mxu0 %v4135_v2  ;;  %v4216_v2 = vld [vmem:[%s4703_s21 + $0x424] ss:$8 sps:$4 sm:$0xff]  }
 0x140   : > { %2700 = vmatpush1.bf16.msra.mxu1 %v4130_v3  ;;  %v4219_v3 = vld [vmem:[%s4703_s21 + $0x924] ss:$8 sps:$4 sm:$0xff]  }
 0x141   : > { %2905 = vmatpush1.bf16.msra.mxu0 %v4133_v5  ;;  %2701 = vmatprep.subr.bf16.mxu1 %v4138_v6  ;;  %v4217_v5 = vld [vmem:[%s4703_s21 + $0x920] ss:$8 sps:$4 sm:$0xff]   ;;  %v4222_v6 = vld [vmem:[%s4703_s21 + $0x434] ss:$8 sps:$4 sm:$0xff]  }
 0x142   : > { %2906 = vmatprep.subr.bf16.mxu0 %v4141_v7  ;;  %v4225_v7 = vld [vmem:[%s4703_s21 + $0x934] ss:$8 sps:$4 sm:$0xff]  }
 0x144   : > { %2702 = vmatpush1.bf16.msra.mxu1 %v4136_v8  ;;  %v4220_v8 = vld [vmem:[%s4703_s21 + $0x430] ss:$8 sps:$4 sm:$0xff]  }
 0x145   : > { %2907 = vmatpush1.bf16.msra.mxu0 %v4139_v9  ;;  %2703 = vmatprep.subr.bf16.mxu1 %v4144_v10  ;;  %v4228_v9 = vld [vmem:[%s4703_s21 + $0x444] ss:$8 sps:$4 sm:$0xff]  }
 0x146   : > { %2908 = vmatprep.subr.bf16.mxu0 %v4147_v11  ;;  %v4231_v10 = vld [vmem:[%s4703_s21 + $0x944] ss:$8 sps:$4 sm:$0xff]   ;;  %v4226_v11 = vld [vmem:[%s4703_s21 + $0x440] ss:$8 sps:$4 sm:$0xff]  }
 0x148   : > { %2704 = vmatpush1.bf16.msra.mxu1 %v4142_v12  ;;  %v4229_v12 = vld [vmem:[%s4703_s21 + $0x940] ss:$8 sps:$4 sm:$0xff]  }
 0x149   : > { %2909 = vmatpush1.bf16.msra.mxu0 %v4145_v13  ;;  %2705 = vmatprep.subr.bf16.mxu1 %v4150_v14  ;;  %v4234_v13 = vld [vmem:[%s4703_s21 + $0x454] ss:$8 sps:$4 sm:$0xff]  }
 0x14a   : > { %2910 = vmatprep.subr.bf16.mxu0 %v4153_v17  ;;  %v4237_v14 = vld [vmem:[%s4703_s21 + $0x954] ss:$8 sps:$4 sm:$0xff]   ;;  %v4232_v17 = vld [vmem:[%s4703_s21 + $0x450] ss:$8 sps:$4 sm:$0xff]  }
 0x14c   : > { %2706 = vmatpush1.bf16.msra.mxu1 %v4148_v18  ;;  %v4235_v18 = vld [vmem:[%s4703_s21 + $0x950] ss:$8 sps:$4 sm:$0xff]  }
 0x14d   : > { %2911 = vmatpush1.bf16.msra.mxu0 %v4151_v19  ;;  %2707 = vmatprep.subr.bf16.mxu1 %v4156_v20  ;;  %v4240_v19 = vld [vmem:[%s4703_s21 + $0x464] ss:$8 sps:$4 sm:$0xff]  }
 0x14e   : > { %2912 = vmatprep.subr.bf16.mxu0 %v4159_v21  ;;  %v4243_v20 = vld [vmem:[%s4703_s21 + $0x964] ss:$8 sps:$4 sm:$0xff]   ;;  %v4238_v21 = vld [vmem:[%s4703_s21 + $0x460] ss:$8 sps:$4 sm:$0xff]  }
 0x150   : > { %2708 = vmatpush1.bf16.msra.mxu1 %v4154_v23  ;;  %v4241_v23 = vld [vmem:[%s4703_s21 + $0x960] ss:$8 sps:$4 sm:$0xff]  }
 0x151   : > { %2913 = vmatpush1.bf16.msra.mxu0 %v4157_v24  ;;  %2709 = vmatprep.subr.bf16.mxu1 %v4162_v25  ;;  %v4246_v24 = vld [vmem:[%s4703_s21 + $0x474] ss:$8 sps:$4 sm:$0xff]  }
 0x152   : > { %2914 = vmatprep.subr.bf16.mxu0 %v4165_v26  ;;  %v4249_v25 = vld [vmem:[%s4703_s21 + $0x974] ss:$8 sps:$4 sm:$0xff]   ;;  %v4244_v26 = vld [vmem:[%s4703_s21 + $0x470] ss:$8 sps:$4 sm:$0xff]  }
 0x154   : > { %2710 = vmatpush1.bf16.msra.mxu1 %v4160_v27  ;;  %v4247_v27 = vld [vmem:[%s4703_s21 + $0x970] ss:$8 sps:$4 sm:$0xff]  }
 0x155   : > { %2915 = vmatpush1.bf16.msra.mxu0 %v4163_v28  ;;  %2711 = vmatprep.subr.bf16.mxu1 %v4168_v30  ;;  %v4252_v28 = vld [vmem:[%s4703_s21 + $0x484] ss:$8 sps:$4 sm:$0xff]  }
 0x156   : > { %2916 = vmatprep.subr.bf16.mxu0 %v4171_v32  ;;  %v4255_v30 = vld [vmem:[%s4703_s21 + $0x984] ss:$8 sps:$4 sm:$0xff]   ;;  %v4250_v32 = vld [vmem:[%s4703_s21 + $0x480] ss:$8 sps:$4 sm:$0xff]  }
 0x158   : > { %2712 = vmatpush1.bf16.msra.mxu1 %v4166_v53  ;;  %v4253_v53 = vld [vmem:[%s4703_s21 + $0x980] ss:$8 sps:$4 sm:$0xff]  }
 0x159   : > { %2917 = vmatpush1.bf16.msra.mxu0 %v4169_v33  ;;  %2713 = vmatprep.subr.bf16.mxu1 %v4174_v34  ;;  %v4258_v33 = vld [vmem:[%s4703_s21 + $0x494] ss:$8 sps:$4 sm:$0xff]  }
 0x15a   : > { %2918 = vmatprep.subr.bf16.mxu0 %v4177_v35  ;;  %v4261_v34 = vld [vmem:[%s4703_s21 + $0x994] ss:$8 sps:$4 sm:$0xff]   ;;  %v4256_v35 = vld [vmem:[%s4703_s21 + $0x490] ss:$8 sps:$4 sm:$0xff]  }
 0x15c   : > { %2714 = vmatpush1.bf16.msra.mxu1 %v4172_v36  ;;  %v4259_v36 = vld [vmem:[%s4703_s21 + $0x990] ss:$8 sps:$4 sm:$0xff]  }
 0x15d   : > { %2919 = vmatpush1.bf16.msra.mxu0 %v4175_v38  ;;  %2715 = vmatprep.subr.bf16.mxu1 %v4180_v40  ;;  %v4264_v38 = vld [vmem:[%s4703_s21 + $0x4a4] ss:$8 sps:$4 sm:$0xff]  }
 0x15e   : > { %2920 = vmatprep.subr.bf16.mxu0 %v4183_v41  ;;  %v4267_v40 = vld [vmem:[%s4703_s21 + $0x9a4] ss:$8 sps:$4 sm:$0xff]   ;;  %v4262_v41 = vld [vmem:[%s4703_s21 + $0x4a0] ss:$8 sps:$4 sm:$0xff]  }
 0x160   : > { %2716 = vmatpush1.bf16.msra.mxu1 %v4178_v22  ;;  %v4265_v22 = vld [vmem:[%s4703_s21 + $0x9a0] ss:$8 sps:$4 sm:$0xff]  }
 0x161   : > { %2921 = vmatpush1.bf16.msra.mxu0 %v4181_v43  ;;  %2717 = vmatprep.subr.bf16.mxu1 %v4186_v44  ;;  %v4270_v43 = vld [vmem:[%s4703_s21 + $0x4b4] ss:$8 sps:$4 sm:$0xff]  }
 0x162   : > { %2922 = vmatprep.subr.bf16.mxu0 %v4189_v45  ;;  %v4273_v44 = vld [vmem:[%s4703_s21 + $0x9b4] ss:$8 sps:$4 sm:$0xff]   ;;  %v4268_v45 = vld [vmem:[%s4703_s21 + $0x4b0] ss:$8 sps:$4 sm:$0xff]  }
 0x164   : > { %2718 = vmatpush1.bf16.msra.mxu1 %v4184_v29  ;;  %v4271_v29 = vld [vmem:[%s4703_s21 + $0x9b0] ss:$8 sps:$4 sm:$0xff]  }
 0x165   : > { %2923 = vmatpush1.bf16.msra.mxu0 %v4187_v46  ;;  %2719 = vmatprep.subr.bf16.mxu1 %v4192_v48  ;;  %v4276_v46 = vld [vmem:[%s4703_s21 + $0x4c4] ss:$8 sps:$4 sm:$0xff]  }
 0x166   : > { %2924 = vmatprep.subr.bf16.mxu0 %v4195_v50  ;;  %v4279_v48 = vld [vmem:[%s4703_s21 + $0x9c4] ss:$8 sps:$4 sm:$0xff]   ;;  %v4274_v50 = vld [vmem:[%s4703_s21 + $0x4c0] ss:$8 sps:$4 sm:$0xff]  }
 0x168   : > { %2720 = vmatpush1.bf16.msra.mxu1 %v4190_v51  ;;  %v4277_v51 = vld [vmem:[%s4703_s21 + $0x9c0] ss:$8 sps:$4 sm:$0xff]  }
 0x169   : > { %2925 = vmatpush1.bf16.msra.mxu0 %v4193_v54  ;;  %2721 = vmatprep.subr.bf16.mxu1 %v4198_v55  ;;  %v4282_v54 = vld [vmem:[%s4703_s21 + $0x4d4] ss:$8 sps:$4 sm:$0xff]  }
 0x16a   : > { %2926 = vmatprep.subr.bf16.mxu0 %v4201_v56  ;;  %v4285_v55 = vld [vmem:[%s4703_s21 + $0x9d4] ss:$8 sps:$4 sm:$0xff]   ;;  %v4280_v56 = vld [vmem:[%s4703_s21 + $0x4d0] ss:$8 sps:$4 sm:$0xff]  }
 0x16c   : > { %2722 = vmatpush1.bf16.msra.mxu1 %v4196_v37  ;;  %v4283_v37 = vld [vmem:[%s4703_s21 + $0x9d0] ss:$8 sps:$4 sm:$0xff]  }
 0x16d   : > { %2927 = vmatpush1.bf16.msra.mxu0 %v4199_v57  ;;  %2732 = vmatprep.subr.bf16.mxu1 %v4204_v58  ;;  %v739_v57 = vcombine.high %v4970_v39, %v4970_v39  ;;  %v4288_v58 = vld [vmem:[%s4703_s21 + $0x4e4] ss:$8 sps:$4 sm:$0xff]   ;;  %v4297_v39 = vld [vmem:[%s4703_s21 + $0x9f4] ss:$8 sps:$4 sm:$0xff]  }
 0x16e   : > { %2937 = vmatprep.subr.bf16.mxu0 %v4207_v42  ;;  %v4291_v42 = vld [vmem:[%s4703_s21 + $0x9e4] ss:$8 sps:$4 sm:$0xff]  }
 0x16f   : > { %2724 = vmatmul.mubr.bf16.vlgmr.msra.gmra.mrb[0].mxu1 %v687_v59  ;;  %v4286_v59 = vld [vmem:[%s4703_s21 + $0x4e0] ss:$8 sps:$4 sm:$0xff]  }
 0x170   : > { %2929 = vmatmul.mubr.bf16.vlgmr.msra.gmra.mrb[0].mxu0 %v5066_v60  ;;  %2733 = vmatpush1.bf16.msra.mxu1 %v4202_v61  ;;  %v4289_v61 = vld [vmem:[%s4703_s21 + $0x9e0] ss:$8 sps:$4 sm:$0xff]  }
 0x171   : > { %2938 = vmatpush1.bf16.msra.mxu0 %v4205_v62  ;;  %2734 = vmatprep.subr.bf16.mxu1 %v4210_v63  ;;  %v5133_v62 = vrot.slane %v739_v57, %v4770_v52  ;;  %v4294_v63 = vld [vmem:[%s4703_s21 + $0x4f4] ss:$8 sps:$4 sm:$0xff]  }
 0x172   : > { %2939 = vmatprep.subr.bf16.mxu0 %v4213_v0  ;;  %2764 = vmatprep.mubr.bf16.mxu1 %v4791_v4  ;;  %v4223_v4 = vld [vmem:[%s4703_s21 + $0x930] ss:$8 sps:$4 sm:$0xff]  }
 0x173   : > { %2969 = vmatprep.mubr.bf16.mxu0 %v785_v1  ;;  %v4292_v0 = vld [vmem:[%s4703_s21 + $0x4f0] ss:$8 sps:$4 sm:$0xff]  }
 0x174   : > { %2735 = vmatpush1.bf16.msra.mxu1 %v4208_v15  ;;  %v4295_v1 = vld [vmem:[%s4703_s21 + $0x9f0] ss:$8 sps:$4 sm:$0xff]   ;;  %v755_v15 = vcombine.high %v5133_v62, %v5133_v62 }
 0x175   : > { %2940 = vmatpush1.bf16.msra.mxu0 %v4211_v49  ;;  %2736 = vmatprep.subr.bf16.mxu1 %v4216_v2  ;;  %v4300_v49 = vld [vmem:[%s4703_s21 + $0xa04] ss:$8 sps:$4 sm:$0xff]   ;;  %v784_v2 = vcombine.high %v5066_v60, %v5066_v60 }
 0x176   : > { %2941 = vmatprep.subr.bf16.mxu0 %v4219_v3  ;;  %v4298_v3 = vld [vmem:[%s4703_s21 + $0xa00] ss:$8 sps:$4 sm:$0xff]   ;;  %v4306_v60 = vld [vmem:[%s4703_s21 + $0xa24] ss:$8 sps:$4 sm:$0xff]  }
 0x178   : > { %2737 = vmatpush1.bf16.msra.mxu1 %v4214_v31  ;;  %v783_v31 = vrot.slane %v755_v15, %v4770_v52  ;;  %v3060_v15 = vld [vmem:[%s5323_s3 + $0x10] sm:$0xff] (!%p3628_p6) }
 0x179   : > { %2942 = vmatpush1.bf16.msra.mxu0 %v4217_v5  ;;  %2738 = vmatprep.subr.bf16.mxu1 %v4222_v6  ;;  %v4303_v5 = vld [vmem:[%s4703_s21 + $0xa14] ss:$8 sps:$4 sm:$0xff]   ;;  %v4301_v6 = vld [vmem:[%s4703_s21 + $0xa10] ss:$8 sps:$4 sm:$0xff]  }
 0x17a   : > { %2943 = vmatprep.subr.bf16.mxu0 %v4225_v7  ;;  %v4304_v7 = vld [vmem:[%s4703_s21 + $0xa20] ss:$8 sps:$4 sm:$0xff]  }
 0x17c   : > { %2739 = vmatpush1.bf16.msra.mxu1 %v4220_v8  ;;  %v4309_v8 = vld [vmem:[%s4703_s21 + $0xa34] ss:$8 sps:$4 sm:$0xff]  }
 0x17d   : > { %2944 = vmatpush1.bf16.msra.mxu0 %v4223_v4  ;;  %2740 = vmatprep.subr.bf16.mxu1 %v4228_v9  ;;  %v4307_v4 = vld [vmem:[%s4703_s21 + $0xa30] ss:$8 sps:$4 sm:$0xff]   ;;  %v4310_v9 = vld [vmem:[%s4703_s21 + $0xa40] ss:$8 sps:$4 sm:$0xff]  }
 0x17e   : > { %2945 = vmatprep.subr.bf16.mxu0 %v4231_v10  ;;  %v4315_v10 = vld [vmem:[%s4703_s21 + $0xa54] ss:$8 sps:$4 sm:$0xff]  }
 0x180   : > { %2741 = vmatpush1.bf16.msra.mxu1 %v4226_v11  ;;  %v4313_v11 = vld [vmem:[%s4703_s21 + $0xa50] ss:$8 sps:$4 sm:$0xff]  }
 0x181   : > { %2946 = vmatpush1.bf16.msra.mxu0 %v4229_v12  ;;  %2742 = vmatprep.subr.bf16.mxu1 %v4234_v13  ;;  %v4318_v12 = vld [vmem:[%s4703_s21 + $0xa64] ss:$8 sps:$4 sm:$0xff]   ;;  %v4316_v13 = vld [vmem:[%s4703_s21 + $0xa60] ss:$8 sps:$4 sm:$0xff]  }
 0x182   : > { %2947 = vmatprep.subr.bf16.mxu0 %v4237_v14  ;;  %v4321_v14 = vld [vmem:[%s4703_s21 + $0xa74] ss:$8 sps:$4 sm:$0xff]  }
 0x184   : > { %2743 = vmatpush1.bf16.msra.mxu1 %v4232_v17  ;;  %v4319_v17 = vld [vmem:[%s4703_s21 + $0xa70] ss:$8 sps:$4 sm:$0xff]  }
 0x185   : > { %2948 = vmatpush1.bf16.msra.mxu0 %v4235_v18  ;;  %2744 = vmatprep.subr.bf16.mxu1 %v4240_v19  ;;  %v4324_v18 = vld [vmem:[%s4703_s21 + $0xa84] ss:$8 sps:$4 sm:$0xff]   ;;  %v4322_v19 = vld [vmem:[%s4703_s21 + $0xa80] ss:$8 sps:$4 sm:$0xff]  }
 0x186   : > { %2949 = vmatprep.subr.bf16.mxu0 %v4243_v20  ;;  %v4327_v20 = vld [vmem:[%s4703_s21 + $0xa94] ss:$8 sps:$4 sm:$0xff]  }
 0x188   : > { %2745 = vmatpush1.bf16.msra.mxu1 %v4238_v21  ;;  %v4325_v21 = vld [vmem:[%s4703_s21 + $0xa90] ss:$8 sps:$4 sm:$0xff]  }
 0x189   : > { %2950 = vmatpush1.bf16.msra.mxu0 %v4241_v23  ;;  %2746 = vmatprep.subr.bf16.mxu1 %v4246_v24  ;;  %v4330_v23 = vld [vmem:[%s4703_s21 + $0xaa4] ss:$8 sps:$4 sm:$0xff]   ;;  %v4328_v24 = vld [vmem:[%s4703_s21 + $0xaa0] ss:$8 sps:$4 sm:$0xff]  }
 0x18a   : > { %2951 = vmatprep.subr.bf16.mxu0 %v4249_v25  ;;  %v4333_v25 = vld [vmem:[%s4703_s21 + $0xab4] ss:$8 sps:$4 sm:$0xff]  }
 0x18c   : > { %2747 = vmatpush1.bf16.msra.mxu1 %v4244_v26  ;;  %v4331_v26 = vld [vmem:[%s4703_s21 + $0xab0] ss:$8 sps:$4 sm:$0xff]  }
 0x18d   : > { %2952 = vmatpush1.bf16.msra.mxu0 %v4247_v27  ;;  %2748 = vmatprep.subr.bf16.mxu1 %v4252_v28  ;;  %v4336_v27 = vld [vmem:[%s4703_s21 + $0xac4] ss:$8 sps:$4 sm:$0xff]   ;;  %v4334_v28 = vld [vmem:[%s4703_s21 + $0xac0] ss:$8 sps:$4 sm:$0xff]  }
 0x18e   : > { %2953 = vmatprep.subr.bf16.mxu0 %v4255_v30  ;;  %v4339_v30 = vld [vmem:[%s4703_s21 + $0xad4] ss:$8 sps:$4 sm:$0xff]  }
 0x190   : > { %2749 = vmatpush1.bf16.msra.mxu1 %v4250_v32  ;;  %v4337_v32 = vld [vmem:[%s4703_s21 + $0xad0] ss:$8 sps:$4 sm:$0xff]  }
 0x191   : > { %2954 = vmatpush1.bf16.msra.mxu0 %v4253_v53  ;;  %2750 = vmatprep.subr.bf16.mxu1 %v4258_v33  ;;  %v4342_v53 = vld [vmem:[%s4703_s21 + $0xae4] ss:$8 sps:$4 sm:$0xff]   ;;  %v4340_v33 = vld [vmem:[%s4703_s21 + $0xae0] ss:$8 sps:$4 sm:$0xff]  }
 0x192   : > { %2955 = vmatprep.subr.bf16.mxu0 %v4261_v34  ;;  %v4345_v34 = vld [vmem:[%s4703_s21 + $0xaf4] ss:$8 sps:$4 sm:$0xff]  }
 0x194   : > { %2751 = vmatpush1.bf16.msra.mxu1 %v4256_v35  ;;  %v4343_v35 = vld [vmem:[%s4703_s21 + $0xaf0] ss:$8 sps:$4 sm:$0xff]  }
 0x195   : > { %2956 = vmatpush1.bf16.msra.mxu0 %v4259_v36  ;;  %2752 = vmatprep.subr.bf16.mxu1 %v4264_v38  ;;  %v769_v36 = vrot.slane %v5133_v62, %v4770_v52  ;;  %v282_v52 = vld [vmem:[#allocation2] sm:$0xf]  ;;  %v3059_v62 = vld [vmem:[%s5323_s3 + $0x8] sm:$0xff] (!%p3628_p6) }
 0x196   : > { %2957 = vmatprep.subr.bf16.mxu0 %v4267_v40 }
 0x198   : > { %2753 = vmatpush1.bf16.msra.mxu1 %v4262_v41 }
 0x199   : > { %2958 = vmatpush1.bf16.msra.mxu0 %v4265_v22  ;;  %2754 = vmatprep.subr.bf16.mxu1 %v4270_v43  ;;  %v4510_v43 = vmov 1983009808  }
 0x19a   : > { %2959 = vmatprep.subr.bf16.mxu0 %v4273_v44  ;;  %v3023_v44 = vunpack.c.l.s4 %v4510_v43  ;;  %v3071_v43 = vld [vmem:[%s5323_s3 + $0x68] sm:$0xff] (!%p3628_p6) }
 0x19c   : > { %2755 = vmatpush1.bf16.msra.mxu1 %v4268_v45  ;;  %v3024_v45 = vunpack.c.0.s8 %v3023_v44  ;;  %v3088_v44 = vld [vmem:[%s5323_s3 + $0xf0] sm:$0xff] (!%p3628_p6) }
 0x19d   : > { %2960 = vmatpush1.bf16.msra.mxu0 %v4271_v29  ;;  %2756 = vmatprep.subr.bf16.mxu1 %v4276_v46 }
 0x19e   : > { %2961 = vmatprep.subr.bf16.mxu0 %v4279_v48 }
 0x1a0   : > { %2757 = vmatpush1.bf16.msra.mxu1 %v4274_v50 }
 0x1a1   : > { %2962 = vmatpush1.bf16.msra.mxu0 %v4277_v51  ;;  %2758 = vmatprep.subr.bf16.mxu1 %v4282_v54  ;;  %v5180_v51 = vsub.s32 %v3024_v45, %v4763_v47  ;;  %v3089_v45 = vld [vmem:[%s5323_s3 + $0xf8] sm:$0xff] (!%p3628_p6) }
 0x1a2   : > { %2963 = vmatprep.subr.bf16.mxu0 %v4285_v55 }
 0x1a4   : > { %2759 = vmatpush1.bf16.msra.mxu1 %v4280_v56 }
 0x1a5   : > { %2964 = vmatpush1.bf16.msra.mxu0 %v4283_v37  ;;  %2760 = vmatprep.subr.bf16.mxu1 %v4288_v58  ;;  %v3074_v58 = vld [vmem:[%s5323_s3 + $0x80] sm:$0xff] (!%p3628_p6) }
 0x1a6   : > { %2965 = vmatprep.subr.bf16.mxu0 %v4291_v42  ;;  %v3075_v42 = vld [vmem:[%s5323_s3 + $0x88] sm:$0xff] (!%p3628_p6) }
 0x1a8   : > { %2761 = vmatpush1.bf16.msra.mxu1 %v4286_v59  ;;  %v3058_v59 = vld [vmem:[%s5323_s3] sm:$0xff] (!%p3628_p6) }
 0x1a9   : > { %2966 = vmatpush1.bf16.msra.mxu0 %v4289_v61  ;;  %2762 = vmatprep.subr.bf16.mxu1 %v4294_v63  ;;  %v3672_v61 = vpack.c.bf16 (!%p3628_p6), %v3075_v42, %v3074_v58  ;;  %v3076_v63 = vld [vmem:[%s5323_s3 + $0x90] sm:$0xff] (!%p3628_p6) }
 0x1aa   : > { %2967 = vmatprep.subr.bf16.mxu0 %v4297_v39  ;;  %v3077_v39 = vld [vmem:[%s5323_s3 + $0x98] sm:$0xff] (!%p3628_p6) }
 0x1ac   : > { %2763 = vmatpush1.bf16.msra.mxu1 %v4292_v0  ;;  %v3674_v0 = vpack.c.bf16 (!%p3628_p6), %v3059_v62, %v3058_v59 }
 0x1ad   : > { %2968 = vmatpush1.bf16.msra.mxu0 %v4295_v1  ;;  %v3676_v1 = vpack.c.bf16 (!%p3628_p6), %v3077_v39, %v3076_v63 }
 0x1ae   : > { %2978 = vmatprep.subr.bf16.mxu0 %v4300_v49  ;;  %v3061_v49 = vld [vmem:[%s5323_s3 + $0x18] sm:$0xff] (!%p3628_p6) }
 0x1af   : > { %2765 = vmatmul.mubr.bf16.vlgmr.msra.gmra.mrb[0].mxu1 %v4808_v16  ;;  %v4312_v16 = vld [vmem:[%s4703_s21 + $0xa44] ss:$8 sps:$4 sm:$0xff]  }
 0x1b0   : > { %2970 = vmatmul.mubr.bf16.vlgmr.msra.gmra.mrb[0].mxu0 %v784_v2  ;;  %v3078_v2 = vld [vmem:[%s5323_s3 + $0xa0] sm:$0xff] (!%p3628_p6) }
 0x1b1   : > { %2979 = vmatpush1.bf16.msra.mxu0 %v4298_v3  ;;  %3010 = vmatprep.mubr.bf16.mxu0 %v783_v31  ;;  %v3079_v3 = vld [vmem:[%s5323_s3 + $0xa8] sm:$0xff] (!%p3628_p6)  ;;  %v3678_v31 = vpack.c.bf16 (!%p3628_p6), %v3061_v49, %v3060_v15 }
 0x1b2   : > { %2980 = vmatprep.subr.bf16.mxu0 %v4303_v5  ;;  %v3680_v5 = vpack.c.bf16 (!%p3628_p6), %v3079_v3, %v3078_v2 }
 0x1b5   : > { %2981 = vmatpush1.bf16.msra.mxu0 %v4301_v6  ;;  %v3062_v6 = vld [vmem:[%s5323_s3 + $0x20] sm:$0xff] (!%p3628_p6) }
 0x1b6   : > { %2982 = vmatprep.subr.bf16.mxu0 %v4306_v60  ;;  %v3063_v60 = vld [vmem:[%s5323_s3 + $0x28] sm:$0xff] (!%p3628_p6) }
 0x1b9   : > { %2983 = vmatpush1.bf16.msra.mxu0 %v4304_v7  ;;  %v3080_v7 = vld [vmem:[%s5323_s3 + $0xb0] sm:$0xff] (!%p3628_p6) }
 0x1ba   : > { %2984 = vmatprep.subr.bf16.mxu0 %v4309_v8  ;;  %v3081_v8 = vld [vmem:[%s5323_s3 + $0xb8] sm:$0xff] (!%p3628_p6) }
 0x1bd   : > { %2985 = vmatpush1.bf16.msra.mxu0 %v4307_v4  ;;  %v3682_v4 = vpack.c.bf16 (!%p3628_p6), %v3063_v60, %v3062_v6 }
 0x1be   : > { %2986 = vmatprep.subr.bf16.mxu0 %v4312_v16  ;;  %v3041_v16 = vsub.s32 (!%p3628_p6), 0, %v4763_v47 }
 0x1c1   : > { %2987 = vmatpush1.bf16.msra.mxu0 %v4310_v9  ;;  %v3045_v9 = vsub.s32 (!%p3628_p6), 1, %v4763_v47 }
 0x1c2   : > { %2988 = vmatprep.subr.bf16.mxu0 %v4315_v10  ;;  %v3684_v10 = vpack.c.bf16 (!%p3628_p6), %v3081_v8, %v3080_v7 }
 0x1c5   : > { %2989 = vmatpush1.bf16.msra.mxu0 %v4313_v11  ;;  %v3064_v11 = vld [vmem:[%s5323_s3 + $0x30] sm:$0xff] (!%p3628_p6) }
 0x1c6   : > { %2990 = vmatprep.subr.bf16.mxu0 %v4318_v12  ;;  %v3065_v12 = vld [vmem:[%s5323_s3 + $0x38] sm:$0xff] (!%p3628_p6) }
 0x1c7   : > { %v3686_v47 = vpack.c.bf16 (!%p3628_p6), %v3065_v12, %v3064_v11 }
 0x1c9   : > { %2991 = vmatpush1.bf16.msra.mxu0 %v4316_v13  ;;  %v3082_v13 = vld [vmem:[%s5323_s3 + $0xc0] sm:$0xff] (!%p3628_p6) }
 0x1ca   : > { %2992 = vmatprep.subr.bf16.mxu0 %v4321_v14  ;;  %v3083_v14 = vld [vmem:[%s5323_s3 + $0xc8] sm:$0xff] (!%p3628_p6) }
 0x1cd   : > { %2993 = vmatpush1.bf16.msra.mxu0 %v4319_v17  ;;  %v3037_v17 = vld [vmem:[#allocation6] sm:$0x3] (!%p3628_p6) }
 0x1ce   : > { %2994 = vmatprep.subr.bf16.mxu0 %v4324_v18  ;;  %v3042_v18 = vrot.slane (!%p3628_p6), %v3037_v17, %v3041_v16 }
 0x1d1   : > { %2995 = vmatpush1.bf16.msra.mxu0 %v4322_v19  ;;  %v3046_v19 = vrot.slane (!%p3628_p6), %v3037_v17, %v3045_v9 }
 0x1d2   : > { %2996 = vmatprep.subr.bf16.mxu0 %v4327_v20  ;;  %v3688_v20 = vpack.c.bf16 (!%p3628_p6), %v3083_v14, %v3082_v13 }
 0x1d5   : > { %2997 = vmatpush1.bf16.msra.mxu0 %v4325_v21  ;;  %v3066_v21 = vld [vmem:[%s5323_s3 + $0x40] sm:$0xff] (!%p3628_p6) }
 0x1d6   : > { %2998 = vmatprep.subr.bf16.mxu0 %v4330_v23  ;;  %v3067_v23 = vld [vmem:[%s5323_s3 + $0x48] sm:$0xff] (!%p3628_p6) }
 0x1d9   : > { %2999 = vmatpush1.bf16.msra.mxu0 %v4328_v24  ;;  %v3084_v24 = vld [vmem:[%s5323_s3 + $0xd0] sm:$0xff] (!%p3628_p6) }
 0x1da   : > { %3000 = vmatprep.subr.bf16.mxu0 %v4333_v25  ;;  %v3085_v25 = vld [vmem:[%s5323_s3 + $0xd8] sm:$0xff] (!%p3628_p6) }
 0x1dd   : > { %3001 = vmatpush1.bf16.msra.mxu0 %v4331_v26  ;;  %v3047_v26 = vcombine.low (!%p3628_p6), %v3042_v18, %v3046_v19 }
 0x1de   : > { %3002 = vmatprep.subr.bf16.mxu0 %v4336_v27 }
 0x1e1   : > { %3003 = vmatpush1.bf16.msra.mxu0 %v4334_v28  ;;  %v3690_v28 = vpack.c.bf16 (!%p3628_p6), %v3067_v23, %v3066_v21 }
 0x1e2   : > { %3004 = vmatprep.subr.bf16.mxu0 %v4339_v30  ;;  %v3054_v30 = vrot.slane (!%p3628_p6), %v3047_v26, %v5180_v51 }
 0x1e5   : > { %3005 = vmatpush1.bf16.msra.mxu0 %v4337_v32  ;;  %v3692_v32 = vpack.c.bf16 (!%p3628_p6), %v3085_v25, %v3084_v24 }
 0x1e6   : > { %3006 = vmatprep.subr.bf16.mxu0 %v4342_v53  ;;  %v3068_v53 = vld [vmem:[%s5323_s3 + $0x50] sm:$0xff] (!%p3628_p6) }
 0x1e9   : > { %3007 = vmatpush1.bf16.msra.mxu0 %v4340_v33  ;;  %v3069_v33 = vld [vmem:[%s5323_s3 + $0x58] sm:$0xff] (!%p3628_p6) }
 0x1ea   : > { %3008 = vmatprep.subr.bf16.mxu0 %v4345_v34  ;;  %v3086_v34 = vld [vmem:[%s5323_s3 + $0xe0] sm:$0xff] (!%p3628_p6) }
 0x1ed   : > { %3009 = vmatpush1.bf16.msra.mxu0 %v4343_v35  ;;  %v3087_v35 = vld [vmem:[%s5323_s3 + $0xe8] sm:$0xff] (!%p3628_p6) }
 0x1ee   : > { %3673 = vmatprep.subr.bf16.mxu0 (!%p3628_p6), %v3672_v61 }
 0x1f0   : > { %3011 = vmatmul.mubr.bf16.vlgmr.msra.gmra.mrb[0].mxu0 %v769_v36 }
 0x1f1   : > { %3675 = vmatpush3.bf16.msra.mxu0 (!%p3628_p6), %v3674_v0 }
 0x1f2   : > { %3677 = vmatprep.subr.bf16.mxu0 (!%p3628_p6), %v3676_v1 }
 0x1f5   : > { %3679 = vmatpush3.bf16.msra.mxu0 (!%p3628_p6), %v3678_v31 }
 0x1f6   : > { %3681 = vmatprep.subr.bf16.mxu0 (!%p3628_p6), %v3680_v5 }
 0x1f9   : > { %3683 = vmatpush3.bf16.msra.mxu0 (!%p3628_p6), %v3682_v4 }
 0x1fa   : > { %3685 = vmatprep.subr.bf16.mxu0 (!%p3628_p6), %v3684_v10 }
 0x1fd   : > { %3687 = vmatpush3.bf16.msra.mxu0 (!%p3628_p6), %v3686_v47 }
 0x1fe   : > { %3689 = vmatprep.subr.bf16.mxu0 (!%p3628_p6), %v3688_v20 }
 0x201   : > { %3691 = vmatpush3.bf16.msra.mxu0 (!%p3628_p6), %v3690_v28 }
 0x202   : > { %3693 = vmatprep.subr.bf16.mxu0 (!%p3628_p6), %v3692_v32 }
 0x282   : > { %v2766_v38 = vpop.f32.mrb[0].mxu1 }
 0x283   : > { %v2768_v40 = vpop.f32.mrb[1].mxu1 }
 0x284   : > { %v2770_v41 = vpop.f32.mrb[2].mxu1 }
 0x285   : > { %v2771_v22 = vpop.f32.mrb[3].mxu1  ;;  %v3696_v41 = vpack.c.bf16 (!%p3628_p6), %v3087_v35, %v3086_v34 }
 0x286   : > { %v3070_v22 = vld [vmem:[%s5323_s3 + $0x60] sm:$0xff] (!%p3628_p6) }
 0x2c3   : > { %v3012_v29 = vpop.f32.mrb[0].mxu0 }
 0x2c4   : > { %v3704_v46 = vadd.f32 %v3012_v29, %v2766_v38  ;;  %v3014_v48 = vpop.f32.mrb[1].mxu0  ;;  %v3694_v38 = vpack.c.bf16 (!%p3628_p6), %v3069_v33, %v3068_v53 }
 0x2c5   : > { %v3705_v50 = vadd.f32 %v3014_v48, %v2768_v40  ;;  %v3016_v54 = vpop.f32.mrb[2].mxu0 }
 0x2c6   : > { %v3017_v55 = vpop.f32.mrb[3].mxu0  ;;  %3695 = vmatpush3.bf16.msra.mxu0 (!%p3628_p6), %v3694_v38  ;;  %v3072_v54 = vld [vmem:[%s5323_s3 + $0x70] sm:$0xff] (!%p3628_p6) }
 0x2c7   : > { %v3021_v56 = vcombine.low %v3704_v46, %v3705_v50  ;;  %3035 = sbr.rel (%p3628_p6) target bundleno = 952 (0x3b8), region = 60  ;;  %v3698_v46 = vpack.c.bf16 (!%p3628_p6), %v3071_v43, %v3070_v22  ;;  %3697 = vmatprep.subr.bf16.mxu0 (!%p3628_p6), %v3696_v41  ;;  %v3700_v50 = vpack.c.bf16 (!%p3628_p6), %v3089_v45, %v3088_v44  ;;  %v3073_v55 = vld [vmem:[%s5323_s3 + $0x78] sm:$0xff] (!%p3628_p6) }
 0x2c9   : > { %v3028_v37 = vrot.slane %v3021_v56, %v5180_v51  ;;  %v3702_v56 = vpack.c.bf16 (!%p3628_p6), %v3073_v55, %v3072_v54 }
 0x2ca   : > { %3699 = vmatpush3.bf16.msra.mxu0 (!%p3628_p6), %v3698_v46 }
 0x2cb   : > { %v3030_v57 = vadd.f32 %v3028_v37, %v282_v52  ;;  %3701 = vmatprep.subr.bf16.mxu0 (!%p3628_p6), %v3700_v50  ;;  %v3629_v52 = vld [vmem:[#allocation8] ss:$0 sm:$0xff] (!%p3628_p6) }
 0x2cd   : > { %3031 = vst [vmem:[#allocation2] sm:$0xf] %v3030_v57 }
 0x2ce   : > { %3703 = vmatpush3.bf16.msra.mxu0 %v3702_v56 }
 0x2d4   : > { %v3036_v27 = vld [vmem:[#allocation2] sm:$0xf] }
 0x2d5   : > { %v3056_v36 = vadd.f32 %v3054_v30, %v3036_v27 }
 0x2d7   : > { %v3057_v40 = vmax.f32 %v3056_v36, 0.0 }
 0x2d9   : > { %v3104_v29 = vrot.slane %v3057_v40, %v5180_v51 }
 0x2db   : > { %v3105_v48 = vcombine.high %v3104_v29, %v3104_v29 }
 0x2dd   : > { %3172 = vmatprep.mubr.f32.mxu0 %v3105_v48 }
 0x2de   : > { %3173 = vmatmul.mubr.f32.vlgmr.msra.gmra.mrb[0].mxu0 %v3104_v29 }
 0x3b1   : > { %v3669_v51 = vpop.f32.mrb[0].mxu0 }
 0x3b2   : > { %v3670_v37 = vpop.f32.mrb[1].mxu0 }
 0x3b3   : > { %v3671_v57 = vadd.f32 %v3670_v37, %v3669_v51 }
 0x3b5   : > { %v3175_v58 = vadd.f32 %v3671_v57, %v3629_v52 }
 0x3b7   : > { %3179 = vst.msk [vmem:[#allocation9] sm:$0x3] %vm3178_vm0, %v3175_v58 }
 0x3b8 PF: > { %p3774_p7 = scmp.eq.s32.totalorder %s4561_s22, 2  ;;  %s4511_s6 = smov [#allocation9]  }
 0x3b9   : > { %s3187_s17 = sshll.u32 %s4511_s6, 4  ;;  %s3188_s17 = int_to_ptr.vmem [resolvable:$true] %s3187_s17 }
 0x3ba   : > { %s4433_s11 = scalar_lea.vmem %s3188_s17, 32  ;;  %p4440_p5 = scmp.lt.s32.totalorder %s3188_s17, %s3188_s17 }
 0x3bb   : > { %p4434_p11 = scmp.ne.s32.totalorder %s3188_s17, %s4433_s11  ;;  %p4441_p9 = scmp.lt.s32.totalorder %s4433_s11, %s4433_s11 }
 0x3bd   : > { %p4435_p12 = pnand %p4434_p11, %p3774_p7  ;;  %p4442_p10 = por %p4441_p9, %p4440_p5 }
 0x3bf   : > { %p4436_p13 = pneg %p4435_p12 }
 0x3c1   : > { %p4443_p1 = pnand %p4442_p10, %p4436_p13 }
 0x3c3   : > { %4446 = shalt.err (!%p4443_p1)
}
 0x3c4   : > { %s4447_s25 = scalar_lea.hbm %s5325_s5, 32 }
 0x3c5   : > { %p4448_p8 = scmp.ne.s32.totalorder %s5325_s5, %s4447_s25  ;;  %p4453_p3 = scmp.lt.u32.totalorder %s4447_s25, %s5325_s5 }
 0x3c7   : > { %p4449_p0 = pnand %p4448_p8, %p3774_p7 }
 0x3c9   : > { %p4450_p2 = pneg %p4449_p0 }
 0x3cb   : > { %p4455_p4 = pnand %p4453_p3, %p4450_p2 }
 0x3cd   : > { %4458 = shalt.err (!%p4455_p4)
}
 0x3ce   : > { %3755 = dma.vmem_to_hbm [thread:$0]  (%p3774_p7), %s3188_s17, 32, %s5325_s5, [#allocation5]  }
 0x3cf   : > { %4484 = dma.done.wait (%p3774_p7), [#allocation5], 32  }
 0x3d0   : > { %4486 = vsyncadd (%p3774_p7), [#allocation5], 4294967264 }
 0x3d1 PF: > { %p17_p6 = scmp.ge.s32.totalorder %s4564_s23, 5   ;;  %s5341_s18 = smov %s4493_s19 }
 0x3d2   : > { %s5342_s19 = smov %s4497_s20  ;;  %s5343_s20 = smov %s4574_s26 }
 0x3d3   : > { %s5344_s21 = smov %s4564_s23  ;;  %19 = sbr.rel (!%p17_p6) target bundleno = 5 (0x5), region = 96 }
 0x3da   :  { %3200 = vsyncpa [#allocation4], 1 }
 0x3db   :  { %3202 = vsyncpa [#allocation4 + $0x1], 1 }
 0x3dc   :  { %3203 = vsyncpa [#allocation7], 1 }
 0x3dd   :  { %3204 = vsyncpa [#allocation5], 1 }
 0x3de   :  { %3206 = vsyncpa [#allocation5 + $0x1], 1 }

</bundles_post_ra>
